<compile_context>
chip_gen: v5e
topology: v5e:2x2
jax: 0.10.0
libtpu: 0.0.40
codegen_flags: <defaults>
</compile_context>

<pallas_src>
import jax
import jax.numpy as jnp
from jax.experimental import pallas as pl
from jax.experimental.pallas import tpu as pltpu


def _dec_mnist_kernel(z_ref, w1_ref, b1_ref, w2_ref, b2_ref, w3_ref, b3_ref,
                      out_ref):
    # Layer 1: (TB, L) bf16 @ (L, 128) bf16 -> f32 acc, +bias, ReLU
    z = z_ref[...].astype(jnp.bfloat16)
    h1 = jnp.dot(z, w1_ref[...], preferred_element_type=jnp.float32)
    h1 = jnp.maximum(h1 + b1_ref[...], 0.0)

    # Layer 2: (TB, 128) @ (128, 512)
    h2 = jnp.dot(h1.astype(jnp.bfloat16), w2_ref[...],
                 preferred_element_type=jnp.float32)
    h2 = jnp.maximum(h2 + b2_ref[...], 0.0)

    # Layer 3: (TB, 512) @ (512, 784) + bias -> Sigmoid
    logits = jnp.dot(h2.astype(jnp.bfloat16), w3_ref[...],
                     preferred_element_type=jnp.float32)
    logits = logits + b3_ref[...]
    # TODO(synk): if profiling shows the sigmoid EUP epilogue co-binding with
    # the bf16 matmuls (v6e/v7x), compute it in bf16 and/or emit a bf16 output.
    out_ref[...] = jax.nn.sigmoid(logits).astype(out_ref.dtype)


def _cdiv(a, b):
    return -(-a // b)


def _round_up(x, m):
    return _cdiv(x, m) * m


def _choose_batch_tiling(batch, max_tile=512):
    """Pad B to a multiple of 8 only; >=2 grid steps when possible (v7x)."""
    b_pad = _round_up(batch, 8)
    n_steps = max(_cdiv(b_pad, max_tile), 2 if b_pad >= 16 else 1)
    tile_b = _round_up(_cdiv(b_pad, n_steps), 8)
    return n_steps * tile_b, tile_b


def prepare_params(params):
    """One-time parameter prep (hoisted out of the forward pass).

    Weights -> bfloat16 for the fast MXU path (f32 accumulation happens in the
    kernel); biases stay f32 and are added post-accumulation.
    """
    return {
        "w1": params["w1"].astype(jnp.bfloat16),
        "w2": params["w2"].astype(jnp.bfloat16),
        "w3": params["w3"].astype(jnp.bfloat16),
        "b1": params["b1"].astype(jnp.float32),
        "b2": params["b2"].astype(jnp.float32),
        "b3": params["b3"].astype(jnp.float32),
    }


def dec_mnist_forward(z, prepped, max_tile=512):
    """Pallas implementation of DecMNIST.forward.

    Args:
      z: (B, latent_dim) float32.
      prepped: output of prepare_params() (bf16 weights, f32 biases).
      max_tile: cap on batch rows per grid step (512 keeps v5e's 16 MiB
        default scoped VMEM comfortable; v6e/v7x have headroom to spare).
    Returns:
      (recon, scale) where recon is (B, 784) float32 and scale is 0.75.
    """
    B, L = z.shape
    dim_mnist = prepped["w3"].shape[1]                  # 784 (no lane padding)

    B_pad, tile_b = _choose_batch_tiling(B, max_tile)
    z_p = z if B_pad == B else jnp.pad(z, ((0, B_pad - B), (0, 0)))

    def run(single_buffer_weights):
        const_kwargs = {}
        if single_buffer_weights:
            # Constant index_map -> never re-DMA'd; single buffer reclaims the
            # second weight-buffer set (VMEM headroom, esp. v5e / v7x).
            const_kwargs["pipeline_mode"] = pl.Buffered(1)
        const = lambda shape: pl.BlockSpec(shape, lambda i: (0, 0),
                                           **const_kwargs)
        return pl.pallas_call(
            _dec_mnist_kernel,
            out_shape=jax.ShapeDtypeStruct((B_pad, dim_mnist), jnp.float32),
            grid=(B_pad // tile_b,),
            in_specs=[
                pl.BlockSpec((tile_b, L), lambda i: (i, 0)),   # z tile
                const(prepped["w1"].shape), const(prepped["b1"].shape),
                const(prepped["w2"].shape), const(prepped["b2"].shape),
                const(prepped["w3"].shape), const(prepped["b3"].shape),
            ],
            out_specs=pl.BlockSpec((tile_b, dim_mnist), lambda i: (i, 0)),
            compiler_params=pltpu.CompilerParams(
                dimension_semantics=("parallel",)),
        )(z_p, prepped["w1"], prepped["b1"], prepped["w2"], prepped["b2"],
          prepped["w3"], prepped["b3"])

    try:
        recon = run(single_buffer_weights=True)
    except Exception:
        # Fallback for JAX versions whose TPU lowering rejects
        # BlockSpec(pipeline_mode=...); kernel semantics are identical.
        recon = run(single_buffer_weights=False)

    if B_pad != B:
        recon = recon[:B]
    return recon, jnp.asarray(0.75, dtype=jnp.float32)


def init_params(key, latent_dim):
    """Deterministic synthetic parameters (PyTorch-Linear-like uniform init)."""
    dims = [(latent_dim, 128), (128, 512), (512, 28 * 28)]
    params = {}
    for i, (fan_in, fan_out) in enumerate(dims, start=1):
        key, kw, kb = jax.random.split(key, 3)
        bound = 1.0 / jnp.sqrt(jnp.float32(fan_in))
        params[f"w{i}"] = jax.random.uniform(
            kw, (fan_in, fan_out), jnp.float32, -bound, bound)
        params[f"b{i}"] = jax.random.uniform(
            kb, (1, fan_out), jnp.float32, -bound, bound)
    return params


if __name__ == "__main__":
    latent_dim = 32
    batch = 8

    key = jax.random.PRNGKey(0)
    key, kz = jax.random.split(key)
    params = init_params(key, latent_dim)
    z = jax.random.normal(kz, (batch, latent_dim), jnp.float32)

    prepped = prepare_params(params)          # one-time weight cast (bf16)
    recon, scale = dec_mnist_forward(z, prepped)
    jax.block_until_ready(recon)
    jax.block_until_ready(scale)

    # Reference A: same bf16-rounded weights/activations in plain JAX
    # (tight structural check of the kernel itself).
    w1 = prepped["w1"].astype(jnp.float32)
    w2 = prepped["w2"].astype(jnp.float32)
    w3 = prepped["w3"].astype(jnp.float32)
    zb = z.astype(jnp.bfloat16).astype(jnp.float32)
    h1 = jnp.maximum(zb @ w1 + params["b1"], 0.0)
    h1 = h1.astype(jnp.bfloat16).astype(jnp.float32)
    h2 = jnp.maximum(h1 @ w2 + params["b2"], 0.0)
    h2 = h2.astype(jnp.bfloat16).astype(jnp.float32)
    ref_a = jax.nn.sigmoid(h2 @ w3 + params["b3"])

    # Reference B: full-f32 reference (bf16 weight-quantization tolerance).
    h1f = jnp.maximum(z @ params["w1"] + params["b1"], 0.0)
    h2f = jnp.maximum(h1f @ params["w2"] + params["b2"], 0.0)
    ref_b = jax.nn.sigmoid(h2f @ params["w3"] + params["b3"])

    assert recon.shape == (batch, 28 * 28)
    assert jnp.allclose(recon, ref_a, atol=2e-3), "mismatch vs bf16 reference"
    assert jnp.allclose(recon, ref_b, atol=3e-2), "mismatch vs f32 reference"
    assert float(scale) == 0.75

    print("KERNEL_OK")
</pallas_src>

<mosaic_0001>
module attributes {stable_mosaic.version = 11 : i64} {
  func.func @_dec_mnist_kernel(%arg0: i32, %arg1: memref<8x32xf32, #tpu.memory_space<vmem>>, %arg2: memref<32x128xbf16, #tpu.memory_space<vmem>>, %arg3: memref<1x128xf32, #tpu.memory_space<vmem>>, %arg4: memref<128x512xbf16, #tpu.memory_space<vmem>>, %arg5: memref<1x512xf32, #tpu.memory_space<vmem>>, %arg6: memref<512x784xbf16, #tpu.memory_space<vmem>>, %arg7: memref<1x784xf32, #tpu.memory_space<vmem>>, %arg8: memref<8x784xf32, #tpu.memory_space<vmem>>) attributes {dimension_semantics = [#tpu.dimension_semantics<parallel>], iteration_bounds = array<i64: 1>, scalar_prefetch = 0 : i64, scratch_operands = 0 : i64, tpu.core_type = #tpu.core_type<tc>, window_params = [{transform_indices = @transform_0, window_bounds = array<i64: 8, 32>}, {pipeline_mode = #tpu.pipeline_mode<synchronous>, transform_indices = @transform_1, window_bounds = array<i64: 32, 128>}, {pipeline_mode = #tpu.pipeline_mode<synchronous>, transform_indices = @transform_2, window_bounds = array<i64: 1, 128>}, {pipeline_mode = #tpu.pipeline_mode<synchronous>, transform_indices = @transform_3, window_bounds = array<i64: 128, 512>}, {pipeline_mode = #tpu.pipeline_mode<synchronous>, transform_indices = @transform_4, window_bounds = array<i64: 1, 512>}, {pipeline_mode = #tpu.pipeline_mode<synchronous>, transform_indices = @transform_5, window_bounds = array<i64: 512, 784>}, {pipeline_mode = #tpu.pipeline_mode<synchronous>, transform_indices = @transform_6, window_bounds = array<i64: 1, 784>}, {transform_indices = @transform_7, window_bounds = array<i64: 8, 784>}]} {
    %c0 = arith.constant 0 : index
    %c0_0 = arith.constant 0 : index
    %0 = vector.load %arg1[%c0, %c0_0] : memref<8x32xf32, #tpu.memory_space<vmem>>, vector<8x32xf32>
    %1 = arith.truncf %0 : vector<8x32xf32> to vector<8x32xbf16>
    %c0_1 = arith.constant 0 : index
    %c0_2 = arith.constant 0 : index
    %2 = vector.load %arg2[%c0_1, %c0_2] : memref<32x128xbf16, #tpu.memory_space<vmem>>, vector<32x128xbf16>
    %cst = arith.constant dense<0.000000e+00> : vector<8x128xf32>
    %3 = tpu.matmul %1, %2, %cst {dimension_numbers = #tpu.dot_dimension_numbers<[1], [0], [0], [1], [0, 0, 1, 1], [], []>} : vector<8x32xbf16>, vector<32x128xbf16>, vector<8x128xf32> -> vector<8x128xf32>
    %c0_3 = arith.constant 0 : index
    %c0_4 = arith.constant 0 : index
    %4 = vector.load %arg3[%c0_3, %c0_4] : memref<1x128xf32, #tpu.memory_space<vmem>>, vector<1x128xf32>
    %5 = vector.broadcast %4 : vector<1x128xf32> to vector<8x128xf32>
    %6 = arith.addf %3, %5 : vector<8x128xf32>
    %cst_5 = arith.constant 0.000000e+00 : f32
    %7 = vector.broadcast %cst_5 : f32 to vector<8x128xf32>
    %8 = arith.maximumf %6, %7 : vector<8x128xf32>
    %9 = arith.truncf %8 : vector<8x128xf32> to vector<8x128xbf16>
    %c0_6 = arith.constant 0 : index
    %c0_7 = arith.constant 0 : index
    %10 = vector.load %arg4[%c0_6, %c0_7] : memref<128x512xbf16, #tpu.memory_space<vmem>>, vector<128x512xbf16>
    %cst_8 = arith.constant dense<0.000000e+00> : vector<8x512xf32>
    %11 = tpu.matmul %9, %10, %cst_8 {dimension_numbers = #tpu.dot_dimension_numbers<[1], [0], [0], [1], [0, 0, 1, 1], [], []>} : vector<8x128xbf16>, vector<128x512xbf16>, vector<8x512xf32> -> vector<8x512xf32>
    %c0_9 = arith.constant 0 : index
    %c0_10 = arith.constant 0 : index
    %12 = vector.load %arg5[%c0_9, %c0_10] : memref<1x512xf32, #tpu.memory_space<vmem>>, vector<1x512xf32>
    %13 = vector.broadcast %12 : vector<1x512xf32> to vector<8x512xf32>
    %14 = arith.addf %11, %13 : vector<8x512xf32>
    %cst_11 = arith.constant 0.000000e+00 : f32
    %15 = vector.broadcast %cst_11 : f32 to vector<8x512xf32>
    %16 = arith.maximumf %14, %15 : vector<8x512xf32>
    %17 = arith.truncf %16 : vector<8x512xf32> to vector<8x512xbf16>
    %c0_12 = arith.constant 0 : index
    %c0_13 = arith.constant 0 : index
    %18 = vector.load %arg6[%c0_12, %c0_13] : memref<512x784xbf16, #tpu.memory_space<vmem>>, vector<512x784xbf16>
    %cst_14 = arith.constant dense<0.000000e+00> : vector<8x784xf32>
    %19 = tpu.matmul %17, %18, %cst_14 {dimension_numbers = #tpu.dot_dimension_numbers<[1], [0], [0], [1], [0, 0, 1, 1], [], []>} : vector<8x512xbf16>, vector<512x784xbf16>, vector<8x784xf32> -> vector<8x784xf32>
    %c0_15 = arith.constant 0 : index
    %c0_16 = arith.constant 0 : index
    %20 = vector.load %arg7[%c0_15, %c0_16] : memref<1x784xf32, #tpu.memory_space<vmem>>, vector<1x784xf32>
    %21 = vector.broadcast %20 : vector<1x784xf32> to vector<8x784xf32>
    %22 = arith.addf %19, %21 : vector<8x784xf32>
    %23 = arith.negf %22 : vector<8x784xf32>
    %24 = math.exp %23 : vector<8x784xf32>
    %cst_17 = arith.constant 1.000000e+00 : f32
    %25 = vector.broadcast %cst_17 : f32 to vector<8x784xf32>
    %26 = arith.addf %25, %24 : vector<8x784xf32>
    %27 = arith.divf %25, %26 : vector<8x784xf32>
    %c0_18 = arith.constant 0 : index
    %c0_19 = arith.constant 0 : index
    %28 = vector.load %arg8[%c0_18, %c0_19] : memref<8x784xf32, #tpu.memory_space<vmem>>, vector<8x784xf32>
    tpu.vector_store %arg8[%c0_18, %c0_19], %27 {strides = array<i32>} : memref<8x784xf32, #tpu.memory_space<vmem>>, vector<8x784xf32>,
    return
  }
  func.func @transform_0(%arg0: i32) -> (i32, i32) {
    %c0_i32 = arith.constant 0 : i32
    %c0_i32_0 = arith.constant 0 : i32
    return %arg0, %c0_i32 : i32, i32
  }
  func.func @transform_1(%arg0: i32) -> (i32, i32) {
    %c0_i32 = arith.constant 0 : i32
    %c0_i32_0 = arith.constant 0 : i32
    %c0_i32_1 = arith.constant 0 : i32
    return %c0_i32, %c0_i32_0 : i32, i32
  }
  func.func @transform_2(%arg0: i32) -> (i32, i32) {
    %c0_i32 = arith.constant 0 : i32
    %c0_i32_0 = arith.constant 0 : i32
    %c0_i32_1 = arith.constant 0 : i32
    return %c0_i32, %c0_i32_0 : i32, i32
  }
  func.func @transform_3(%arg0: i32) -> (i32, i32) {
    %c0_i32 = arith.constant 0 : i32
    %c0_i32_0 = arith.constant 0 : i32
    %c0_i32_1 = arith.constant 0 : i32
    return %c0_i32, %c0_i32_0 : i32, i32
  }
  func.func @transform_4(%arg0: i32) -> (i32, i32) {
    %c0_i32 = arith.constant 0 : i32
    %c0_i32_0 = arith.constant 0 : i32
    %c0_i32_1 = arith.constant 0 : i32
    return %c0_i32, %c0_i32_0 : i32, i32
  }
  func.func @transform_5(%arg0: i32) -> (i32, i32) {
    %c0_i32 = arith.constant 0 : i32
    %c0_i32_0 = arith.constant 0 : i32
    %c0_i32_1 = arith.constant 0 : i32
    return %c0_i32, %c0_i32_0 : i32, i32
  }
  func.func @transform_6(%arg0: i32) -> (i32, i32) {
    %c0_i32 = arith.constant 0 : i32
    %c0_i32_0 = arith.constant 0 : i32
    %c0_i32_1 = arith.constant 0 : i32
    return %c0_i32, %c0_i32_0 : i32, i32
  }
  func.func @transform_7(%arg0: i32) -> (i32, i32) {
    %c0_i32 = arith.constant 0 : i32
    %c0_i32_0 = arith.constant 0 : i32
    return %arg0, %c0_i32 : i32, i32
  }
}

module attributes {stable_mosaic.version = 11 : i64} {
  func.func @_dec_mnist_kernel(%arg0: i32, %arg1: memref<8x32xf32, #tpu.memory_space<vmem>>, %arg2: memref<32x128xbf16, #tpu.memory_space<vmem>>, %arg3: memref<1x128xf32, #tpu.memory_space<vmem>>, %arg4: memref<128x512xbf16, #tpu.memory_space<vmem>>, %arg5: memref<1x512xf32, #tpu.memory_space<vmem>>, %arg6: memref<512x784xbf16, #tpu.memory_space<vmem>>, %arg7: memref<1x784xf32, #tpu.memory_space<vmem>>, %arg8: memref<8x784xf32, #tpu.memory_space<vmem>>) attributes {dimension_semantics = [#tpu.dimension_semantics<parallel>], iteration_bounds = array<i64: 1>, scalar_prefetch = 0 : i64, scratch_operands = 0 : i64, tpu.core_type = #tpu.core_type<tc>, window_params = [{transform_indices = @transform_0, window_bounds = array<i64: 8, 32>}, {pipeline_mode = #tpu.pipeline_mode<synchronous>, transform_indices = @transform_1, window_bounds = array<i64: 32, 128>}, {pipeline_mode = #tpu.pipeline_mode<synchronous>, transform_indices = @transform_2, window_bounds = array<i64: 1, 128>}, {pipeline_mode = #tpu.pipeline_mode<synchronous>, transform_indices = @transform_3, window_bounds = array<i64: 128, 512>}, {pipeline_mode = #tpu.pipeline_mode<synchronous>, transform_indices = @transform_4, window_bounds = array<i64: 1, 512>}, {pipeline_mode = #tpu.pipeline_mode<synchronous>, transform_indices = @transform_5, window_bounds = array<i64: 512, 784>}, {pipeline_mode = #tpu.pipeline_mode<synchronous>, transform_indices = @transform_6, window_bounds = array<i64: 1, 784>}, {transform_indices = @transform_7, window_bounds = array<i64: 8, 784>}]} {
    %c0 = arith.constant 0 : index
    %c0_0 = arith.constant 0 : index
    %0 = vector.load %arg1[%c0, %c0_0] : memref<8x32xf32, #tpu.memory_space<vmem>>, vector<8x32xf32>
    %1 = arith.truncf %0 : vector<8x32xf32> to vector<8x32xbf16>
    %c0_1 = arith.constant 0 : index
    %c0_2 = arith.constant 0 : index
    %2 = vector.load %arg2[%c0_1, %c0_2] : memref<32x128xbf16, #tpu.memory_space<vmem>>, vector<32x128xbf16>
    %cst = arith.constant dense<0.000000e+00> : vector<8x128xf32>
    %3 = tpu.matmul %1, %2, %cst {dimension_numbers = #tpu.dot_dimension_numbers<[1], [0], [0], [1], [0, 0, 1, 1], [], []>} : vector<8x32xbf16>, vector<32x128xbf16>, vector<8x128xf32> -> vector<8x128xf32>
    %c0_3 = arith.constant 0 : index
    %c0_4 = arith.constant 0 : index
    %4 = vector.load %arg3[%c0_3, %c0_4] : memref<1x128xf32, #tpu.memory_space<vmem>>, vector<1x128xf32>
    %5 = vector.broadcast %4 : vector<1x128xf32> to vector<8x128xf32>
    %6 = arith.addf %3, %5 : vector<8x128xf32>
    %cst_5 = arith.constant 0.000000e+00 : f32
    %7 = vector.broadcast %cst_5 : f32 to vector<8x128xf32>
    %8 = arith.maximumf %6, %7 : vector<8x128xf32>
    %9 = arith.truncf %8 : vector<8x128xf32> to vector<8x128xbf16>
    %c0_6 = arith.constant 0 : index
    %c0_7 = arith.constant 0 : index
    %10 = vector.load %arg4[%c0_6, %c0_7] : memref<128x512xbf16, #tpu.memory_space<vmem>>, vector<128x512xbf16>
    %cst_8 = arith.constant dense<0.000000e+00> : vector<8x512xf32>
    %11 = tpu.matmul %9, %10, %cst_8 {dimension_numbers = #tpu.dot_dimension_numbers<[1], [0], [0], [1], [0, 0, 1, 1], [], []>} : vector<8x128xbf16>, vector<128x512xbf16>, vector<8x512xf32> -> vector<8x512xf32>
    %c0_9 = arith.constant 0 : index
    %c0_10 = arith.constant 0 : index
    %12 = vector.load %arg5[%c0_9, %c0_10] : memref<1x512xf32, #tpu.memory_space<vmem>>, vector<1x512xf32>
    %13 = vector.broadcast %12 : vector<1x512xf32> to vector<8x512xf32>
    %14 = arith.addf %11, %13 : vector<8x512xf32>
    %cst_11 = arith.constant 0.000000e+00 : f32
    %15 = vector.broadcast %cst_11 : f32 to vector<8x512xf32>
    %16 = arith.maximumf %14, %15 : vector<8x512xf32>
    %17 = arith.truncf %16 : vector<8x512xf32> to vector<8x512xbf16>
    %c0_12 = arith.constant 0 : index
    %c0_13 = arith.constant 0 : index
    %18 = vector.load %arg6[%c0_12, %c0_13] : memref<512x784xbf16, #tpu.memory_space<vmem>>, vector<512x784xbf16>
    %cst_14 = arith.constant dense<0.000000e+00> : vector<8x784xf32>
    %19 = tpu.matmul %17, %18, %cst_14 {dimension_numbers = #tpu.dot_dimension_numbers<[1], [0], [0], [1], [0, 0, 1, 1], [], []>} : vector<8x512xbf16>, vector<512x784xbf16>, vector<8x784xf32> -> vector<8x784xf32>
    %c0_15 = arith.constant 0 : index
    %c0_16 = arith.constant 0 : index
    %20 = vector.load %arg7[%c0_15, %c0_16] : memref<1x784xf32, #tpu.memory_space<vmem>>, vector<1x784xf32>
    %21 = vector.broadcast %20 : vector<1x784xf32> to vector<8x784xf32>
    %22 = arith.addf %19, %21 : vector<8x784xf32>
    %23 = arith.negf %22 : vector<8x784xf32>
    %24 = math.exp %23 : vector<8x784xf32>
    %cst_17 = arith.constant 1.000000e+00 : f32
    %25 = vector.broadcast %cst_17 : f32 to vector<8x784xf32>
    %26 = arith.addf %25, %24 : vector<8x784xf32>
    %27 = arith.divf %25, %26 : vector<8x784xf32>
    %c0_18 = arith.constant 0 : index
    %c0_19 = arith.constant 0 : index
    %28 = vector.load %arg8[%c0_18, %c0_19] : memref<8x784xf32, #tpu.memory_space<vmem>>, vector<8x784xf32>
    tpu.vector_store %arg8[%c0_18, %c0_19], %27 {strides = array<i32>} : memref<8x784xf32, #tpu.memory_space<vmem>>, vector<8x784xf32>,
    return
  }
  func.func @transform_0(%arg0: i32) -> (i32, i32) {
    %c0_i32 = arith.constant 0 : i32
    %c0_i32_0 = arith.constant 0 : i32
    return %arg0, %c0_i32 : i32, i32
  }
  func.func @transform_1(%arg0: i32) -> (i32, i32) {
    %c0_i32 = arith.constant 0 : i32
    %c0_i32_0 = arith.constant 0 : i32
    %c0_i32_1 = arith.constant 0 : i32
    return %c0_i32, %c0_i32_0 : i32, i32
  }
  func.func @transform_2(%arg0: i32) -> (i32, i32) {
    %c0_i32 = arith.constant 0 : i32
    %c0_i32_0 = arith.constant 0 : i32
    %c0_i32_1 = arith.constant 0 : i32
    return %c0_i32, %c0_i32_0 : i32, i32
  }
  func.func @transform_3(%arg0: i32) -> (i32, i32) {
    %c0_i32 = arith.constant 0 : i32
    %c0_i32_0 = arith.constant 0 : i32
    %c0_i32_1 = arith.constant 0 : i32
    return %c0_i32, %c0_i32_0 : i32, i32
  }
  func.func @transform_4(%arg0: i32) -> (i32, i32) {
    %c0_i32 = arith.constant 0 : i32
    %c0_i32_0 = arith.constant 0 : i32
    %c0_i32_1 = arith.constant 0 : i32
    return %c0_i32, %c0_i32_0 : i32, i32
  }
  func.func @transform_5(%arg0: i32) -> (i32, i32) {
    %c0_i32 = arith.constant 0 : i32
    %c0_i32_0 = arith.constant 0 : i32
    %c0_i32_1 = arith.constant 0 : i32
    return %c0_i32, %c0_i32_0 : i32, i32
  }
  func.func @transform_6(%arg0: i32) -> (i32, i32) {
    %c0_i32 = arith.constant 0 : i32
    %c0_i32_0 = arith.constant 0 : i32
    %c0_i32_1 = arith.constant 0 : i32
    return %c0_i32, %c0_i32_0 : i32, i32
  }
  func.func @transform_7(%arg0: i32) -> (i32, i32) {
    %c0_i32 = arith.constant 0 : i32
    %c0_i32_0 = arith.constant 0 : i32
    return %arg0, %c0_i32 : i32, i32
  }
}

</mosaic_0001>

<bundles_post_ra>
// kernel: tpu_custom_call.1
= control target key start
LH: loop header
LB: loop body
LE: loop exit
PB: predicated region body
PF: predicated region fallthrough
CT: control target
= control target key end

     0   :  { %vm50_vm0 = vcmask 261120   ;;  %s5277_s0 = inlined_call_operand.vmem [shape: f32[8,32], index: 0, kind: input, shape index: {}]   ;;  %s5278_s1 = inlined_call_operand.vmem [shape: bf16[32,128], index: 1, kind: input, shape index: {}]   ;;  %s5279_s2 = inlined_call_operand.vmem [shape: f32[1,128], index: 2, kind: input, shape index: {}]   ;;  %s5280_s3 = inlined_call_operand.vmem [shape: bf16[128,512], index: 3, kind: input, shape index: {}]   ;;  %s5281_s4 = inlined_call_operand.vmem [shape: f32[1,512], index: 4, kind: input, shape index: {}]   ;;  %s5282_s5 = inlined_call_operand.vmem [shape: bf16[512,784], index: 5, kind: input, shape index: {}]   ;;  %s5283_s6 = inlined_call_operand.vmem [shape: f32[1,784], index: 6, kind: input, shape index: {}]   ;;  %s5284_s7 = inlined_call_operand.hbm [shape: f32[8,784], index: 7, kind: output, shape index: {}]  }
   0x1   :  { %v3317_v0 = vld [vmem:[%s5278_s1 + $0x8] sm:$0xff]  ;;  %v3316_v1 = vld [vmem:[%s5278_s1] sm:$0xff]  ;;  %v3348_v4 = vld [vmem:[%s5280_s3 + $0xec] sm:$0xf0] }
   0x2   :  { %v28_v2 = vld [vmem:[%s5277_s0] sm:$0xff]  ;;  %60 = vmatpush.bf16.msra.mxu0 %v3317_v0  ;;  %v2401_v7 = vld [vmem:[%s5280_s3 + $0xf0] sm:$0xf0]  ;;  %v2407_v8 = vld [vmem:[%s5280_s3 + $0xe8] sm:$0xf] }
   0x3   :  { %v2399_v3 = vld [vmem:[%s5280_s3 + $0xe0] sm:$0xf]  ;;  %v3346_v5 = vld [vmem:[%s5280_s3 + $0xe4] sm:$0xf]  ;;  %v3349_v9 = vld [vmem:[%s5280_s3 + $0xf4] sm:$0xf0]  ;;  %v29_v19 = vpack.c.bf16 %v28_v2, %v28_v2 }
   0x4   :  { %v2400_v6 = vor.u32 %v3348_v4, %v2399_v3  ;;  %v2404_v10 = vor.u32 %v3346_v5, %v2401_v7  ;;  %v2408_v11 = vor.u32 %v3349_v9, %v2407_v8  ;;  %v3347_v12 = vld [vmem:[%s5280_s3 + $0xec] sm:$0xf]  ;;  %v2409_v13 = vld [vmem:[%s5280_s3 + $0xf8] sm:$0xf0]  ;;  %v2383_v14 = vld [vmem:[%s5280_s3 + $0xc0] sm:$0xf] }
   0x5   :  { %v2412_v15 = vor.u32 %v3347_v12, %v2409_v13  ;;  %v3344_v16 = vld [vmem:[%s5280_s3 + $0xcc] sm:$0xf0]  ;;  %v3342_v17 = vld [vmem:[%s5280_s3 + $0xc4] sm:$0xf]  ;;  %v2385_v18 = vld [vmem:[%s5280_s3 + $0xd0] sm:$0xf0] }
   0x6   :  { %271 = vmatpush.bf16.msra.mxu1 %v2400_v6  ;;  %284 = vmatpush.bf16.msra.mxu2 %v2404_v10  ;;  %v2384_v20 = vor.u32 %v3344_v16, %v2383_v14  ;;  %v2388_v21 = vor.u32 %v3342_v17, %v2385_v18  ;;  %v2391_v22 = vld [vmem:[%s5280_s3 + $0xc8] sm:$0xf]  ;;  %v3345_v23 = vld [vmem:[%s5280_s3 + $0xd4] sm:$0xf0]  ;;  %v3343_v24 = vld [vmem:[%s5280_s3 + $0xcc] sm:$0xf] }
   0x7   :  { %297 = vmatpush.bf16.msra.mxu3 %v2408_v11  ;;  %61 = vmatpush.bf16.msra.mxu0 %v3316_v1  ;;  %v2392_v25 = vor.u32 %v3345_v23, %v2391_v22  ;;  %v2393_v26 = vld [vmem:[%s5280_s3 + $0xd8] sm:$0xf0]  ;;  %v2367_v27 = vld [vmem:[%s5280_s3 + $0xa0] sm:$0xf]  ;;  %v3340_v28 = vld [vmem:[%s5280_s3 + $0xac] sm:$0xf0] }
   0x8   :  { %v2396_v29 = vor.u32 %v3343_v24, %v2393_v26  ;;  %v3338_v30 = vld [vmem:[%s5280_s3 + $0xa4] sm:$0xf]  ;;  %v2369_v31 = vld [vmem:[%s5280_s3 + $0xb0] sm:$0xf0]  ;;  %v2375_v32 = vld [vmem:[%s5280_s3 + $0xa8] sm:$0xf]  ;;  %v2368_v33 = vor.u32 %v3340_v28, %v2367_v27 }
   0x9   :  { %v3341_v34 = vld [vmem:[%s5280_s3 + $0xb4] sm:$0xf0]  ;;  %v3339_v35 = vld [vmem:[%s5280_s3 + $0xac] sm:$0xf]  ;;  %v2377_v36 = vld [vmem:[%s5280_s3 + $0xb8] sm:$0xf0]  ;;  %v2372_v37 = vor.u32 %v3338_v30, %v2369_v31 }
   0xa   :  { %272 = vmatpush.bf16.msra.mxu1 %v2384_v20  ;;  %2284 = vmatmul.msk.bf16.vlgmr.msra.gmra.mxu0 %vm50_vm0, %v29_v19  ;;  %v2351_v38 = vld [vmem:[%s5280_s3 + $0x80] sm:$0xf]  ;;  %v3336_v39 = vld [vmem:[%s5280_s3 + $0x8c] sm:$0xf0]  ;;  %v2376_v40 = vor.u32 %v3341_v34, %v2375_v32  ;;  %v3334_v41 = vld [vmem:[%s5280_s3 + $0x84] sm:$0xf]  ;;  %v2380_v43 = vor.u32 %v3339_v35, %v2377_v36 }
   0xb   :  { %310 = vmatpush.bf16.msrb.mxu0 %v2412_v15  ;;  %285 = vmatpush.bf16.msra.mxu2 %v2388_v21  ;;  %v2353_v42 = vld [vmem:[%s5280_s3 + $0x90] sm:$0xf0]  ;;  %v2359_v44 = vld [vmem:[%s5280_s3 + $0x88] sm:$0xf]  ;;  %v3337_v45 = vld [vmem:[%s5280_s3 + $0x94] sm:$0xf0]  ;;  %v2352_v46 = vor.u32 %v3336_v39, %v2351_v38 }
   0xc   :  { %298 = vmatpush.bf16.msra.mxu3 %v2392_v25  ;;  %v3335_v47 = vld [vmem:[%s5280_s3 + $0x8c] sm:$0xf]  ;;  %v2361_v48 = vld [vmem:[%s5280_s3 + $0x98] sm:$0xf0]  ;;  %v2356_v49 = vor.u32 %v3334_v41, %v2353_v42  ;;  %v2335_v50 = vld [vmem:[%s5280_s3 + $0x60] sm:$0xf]  ;;  %v2360_v52 = vor.u32 %v3337_v45, %v2359_v44 }
   0xd   :  { %v3332_v51 = vld [vmem:[%s5280_s3 + $0x6c] sm:$0xf0]  ;;  %v3330_v53 = vld [vmem:[%s5280_s3 + $0x64] sm:$0xf]  ;;  %v2337_v54 = vld [vmem:[%s5280_s3 + $0x70] sm:$0xf0]  ;;  %v2364_v55 = vor.u32 %v3335_v47, %v2361_v48 }
   0xe   :  { %273 = vmatpush.bf16.msra.mxu1 %v2368_v33  ;;  %v2343_v56 = vld [vmem:[%s5280_s3 + $0x68] sm:$0xf]  ;;  %v3333_v57 = vld [vmem:[%s5280_s3 + $0x74] sm:$0xf0]  ;;  %v2336_v58 = vor.u32 %v3332_v51, %v2335_v50  ;;  %v3331_v59 = vld [vmem:[%s5280_s3 + $0x6c] sm:$0xf]  ;;  %v2340_v62 = vor.u32 %v3330_v53, %v2337_v54 }
   0xf   :  { %311 = vmatpush.bf16.msrb.mxu0 %v2396_v29  ;;  %286 = vmatpush.bf16.msra.mxu2 %v2372_v37  ;;  %v2345_v60 = vld [vmem:[%s5280_s3 + $0x78] sm:$0xf0]  ;;  %v2319_v61 = vld [vmem:[%s5280_s3 + $0x40] sm:$0xf]  ;;  %v3328_v63 = vld [vmem:[%s5280_s3 + $0x4c] sm:$0xf0] }
  0x10   :  { %299 = vmatpush.bf16.msra.mxu3 %v2376_v40 }
  0x12   :  { %274 = vmatpush.bf16.msra.mxu1 %v2352_v46 }
  0x13   :  { %312 = vmatpush.bf16.msrb.mxu0 %v2380_v43  ;;  %287 = vmatpush.bf16.msra.mxu2 %v2356_v49 }
  0x14   :  { %12 = vsyncpa [#allocation3], 0  ;;  %300 = vmatpush.bf16.msra.mxu3 %v2360_v52  ;;  %v2344_v0 = vor.u32 %v3333_v57, %v2343_v56  ;;  %v3326_v1 = vld [vmem:[%s5280_s3 + $0x44] sm:$0xf]  ;;  %v2321_v2 = vld [vmem:[%s5280_s3 + $0x50] sm:$0xf0]  ;;  %v2348_v3 = vor.u32 %v3331_v59, %v2345_v60  ;;  %v2320_v6 = vor.u32 %v3328_v63, %v2319_v61 }
  0x15   :  { %v2327_v4 = vld [vmem:[%s5280_s3 + $0x48] sm:$0xf]  ;;  %v3329_v5 = vld [vmem:[%s5280_s3 + $0x54] sm:$0xf0]  ;;  %v3327_v7 = vld [vmem:[%s5280_s3 + $0x4c] sm:$0xf]  ;;  %v2324_v9 = vor.u32 %v3326_v1, %v2321_v2 }
  0x16   :  { %275 = vmatpush.bf16.msra.mxu1 %v2336_v58  ;;  %v2329_v8 = vld [vmem:[%s5280_s3 + $0x58] sm:$0xf0]  ;;  %v2328_v10 = vor.u32 %v3329_v5, %v2327_v4  ;;  %v2303_v12 = vld [vmem:[%s5280_s3 + $0x20] sm:$0xf]  ;;  %v3324_v13 = vld [vmem:[%s5280_s3 + $0x2c] sm:$0xf0] }
  0x17   :  { %313 = vmatpush.bf16.msrb.mxu0 %v2364_v55  ;;  %288 = vmatpush.bf16.msra.mxu2 %v2340_v62  ;;  %v2332_v11 = vor.u32 %v3327_v7, %v2329_v8  ;;  %v3322_v14 = vld [vmem:[%s5280_s3 + $0x24] sm:$0xf]  ;;  %v2304_v15 = vor.u32 %v3324_v13, %v2303_v12  ;;  %v2305_v16 = vld [vmem:[%s5280_s3 + $0x30] sm:$0xf0]  ;;  %v2311_v17 = vld [vmem:[%s5280_s3 + $0x28] sm:$0xf] }
  0x18   :  { %301 = vmatpush.bf16.msra.mxu3 %v2344_v0  ;;  %v3325_v18 = vld [vmem:[%s5280_s3 + $0x34] sm:$0xf0]  ;;  %v2308_v19 = vor.u32 %v3322_v14, %v2305_v16  ;;  %v3323_v21 = vld [vmem:[%s5280_s3 + $0x2c] sm:$0xf]  ;;  %v2313_v22 = vld [vmem:[%s5280_s3 + $0x38] sm:$0xf0] }
  0x19   :  { %v2312_v20 = vor.u32 %v3325_v18, %v2311_v17  ;;  %v2316_v23 = vor.u32 %v3323_v21, %v2313_v22  ;;  %v2287_v24 = vld [vmem:[%s5280_s3] sm:$0xf]  ;;  %v3320_v25 = vld [vmem:[%s5280_s3 + $0xc] sm:$0xf0]  ;;  %v3318_v26 = vld [vmem:[%s5280_s3 + $0x4] sm:$0xf] }
  0x1a   :  { %276 = vmatpush.bf16.msra.mxu1 %v2320_v6  ;;  %v2288_v27 = vor.u32 %v3320_v25, %v2287_v24  ;;  %v2289_v28 = vld [vmem:[%s5280_s3 + $0x10] sm:$0xf0]  ;;  %v2295_v29 = vld [vmem:[%s5280_s3 + $0x8] sm:$0xf]  ;;  %v3321_v30 = vld [vmem:[%s5280_s3 + $0x14] sm:$0xf0] }
  0x1b   :  { %314 = vmatpush.bf16.msrb.mxu0 %v2348_v3  ;;  %289 = vmatpush.bf16.msra.mxu2 %v2324_v9  ;;  %v2292_v31 = vor.u32 %v3318_v26, %v2289_v28  ;;  %v2296_v32 = vor.u32 %v3321_v30, %v2295_v29  ;;  %v3319_v33 = vld [vmem:[%s5280_s3 + $0xc] sm:$0xf]  ;;  %v2297_v34 = vld [vmem:[%s5280_s3 + $0x18] sm:$0xf0]  ;;  %v2611_v36 = vld [vmem:[%s5282_s5 + $0x188] sm:$0xf] }
  0x1c   :  { %302 = vmatpush.bf16.msra.mxu3 %v2328_v10  ;;  %v2300_v35 = vor.u32 %v3319_v33, %v2297_v34  ;;  %v3402_v37 = vld [vmem:[%s5282_s5 + $0x1a0] sm:$0xf0]  ;;  %v3283_v38 = vld [vmem:[%s5282_s5 + $0x6c8] sm:$0xf]  ;;  %v2583_v41 = vld [vmem:[%s5282_s5 + $0x150] sm:$0xf] }
  0x1d   :  { %v2612_v39 = vor.u32 %v3402_v37, %v2611_v36  ;;  %v3570_v40 = vld [vmem:[%s5282_s5 + $0x6e0] sm:$0xf0]  ;;  %v3395_v42 = vld [vmem:[%s5282_s5 + $0x168] sm:$0xf0]  ;;  %v3255_v44 = vld [vmem:[%s5282_s5 + $0x690] sm:$0xf] }
  0x1e   :  { %277 = vmatpush.bf16.msra.mxu1 %v2304_v15  ;;  %v3284_v43 = vor.u32 %v3570_v40, %v3283_v38  ;;  %v3563_v45 = vld [vmem:[%s5282_s5 + $0x6a8] sm:$0xf0]  ;;  %v2835_v46 = vld [vmem:[%s5282_s5 + $0x348] sm:$0xf]  ;;  %v2584_v47 = vor.u32 %v3395_v42, %v2583_v41  ;;  %v3458_v48 = vld [vmem:[%s5282_s5 + $0x360] sm:$0xf0] }
  0x1f   :  { %315 = vmatpush.bf16.msrb.mxu0 %v2332_v11  ;;  %290 = vmatpush.bf16.msra.mxu2 %v2308_v19  ;;  %v3059_v49 = vld [vmem:[%s5282_s5 + $0x508] sm:$0xf]  ;;  %v3514_v50 = vld [vmem:[%s5282_s5 + $0x520] sm:$0xf0]  ;;  %v3256_v51 = vor.u32 %v3563_v45, %v3255_v44  ;;  %v2836_v52 = vor.u32 %v3458_v48, %v2835_v46  ;;  %v2555_v54 = vld [vmem:[%s5282_s5 + $0x118] sm:$0xf] }
  0x20   :  { %303 = vmatpush.bf16.msra.mxu3 %v2312_v20  ;;  %v3060_v53 = vor.u32 %v3514_v50, %v3059_v49  ;;  %v3388_v55 = vld [vmem:[%s5282_s5 + $0x130] sm:$0xf0]  ;;  %v3227_v56 = vld [vmem:[%s5282_s5 + $0x658] sm:$0xf]  ;;  %v2807_v58 = vld [vmem:[%s5282_s5 + $0x310] sm:$0xf] }
  0x21   :  { %v3556_v57 = vld [vmem:[%s5282_s5 + $0x670] sm:$0xf0]  ;;  %v3451_v59 = vld [vmem:[%s5282_s5 + $0x328] sm:$0xf0]  ;;  %v3031_v61 = vld [vmem:[%s5282_s5 + $0x4d0] sm:$0xf]  ;;  %v2556_v63 = vor.u32 %v3388_v55, %v2555_v54 }
  0x22   :  { %278 = vmatpush.bf16.msra.mxu1 %v2288_v27  ;;  %v2808_v60 = vor.u32 %v3451_v59, %v2807_v58  ;;  %v3507_v62 = vld [vmem:[%s5282_s5 + $0x4e8] sm:$0xf0]  ;;  %v2527_v1 = vld [vmem:[%s5282_s5 + $0xe0] sm:$0xf]  ;;  %v3381_v2 = vld [vmem:[%s5282_s5 + $0xf8] sm:$0xf0]  ;;  %v3228_v3 = vor.u32 %v3556_v57, %v3227_v56 }
  0x23   :  { %316 = vmatpush.bf16.msrb.mxu0 %v2316_v23  ;;  %291 = vmatpush.bf16.msra.mxu2 %v2292_v31  ;;  %v3032_v0 = vor.u32 %v3507_v62, %v3031_v61  ;;  %v2779_v4 = vld [vmem:[%s5282_s5 + $0x2d8] sm:$0xf]  ;;  %v3444_v5 = vld [vmem:[%s5282_s5 + $0x2f0] sm:$0xf0]  ;;  %v3199_v7 = vld [vmem:[%s5282_s5 + $0x620] sm:$0xf]  ;;  %v2528_v13 = vor.u32 %v3381_v2, %v2527_v1 }
  0x24   :  { %304 = vmatpush.bf16.msra.mxu3 %v2296_v32  ;;  %v3003_v6 = vld [vmem:[%s5282_s5 + $0x498] sm:$0xf]  ;;  %v3549_v8 = vld [vmem:[%s5282_s5 + $0x638] sm:$0xf0]  ;;  %v3500_v9 = vld [vmem:[%s5282_s5 + $0x4b0] sm:$0xf0]  ;;  %v2780_v10 = vor.u32 %v3444_v5, %v2779_v4 }
  0x25   :  { %v3004_v11 = vor.u32 %v3500_v9, %v3003_v6  ;;  %v2751_v12 = vld [vmem:[%s5282_s5 + $0x2a0] sm:$0xf]  ;;  %v3437_v14 = vld [vmem:[%s5282_s5 + $0x2b8] sm:$0xf0]  ;;  %v3200_v17 = vor.u32 %v3549_v8, %v3199_v7  ;;  %v2499_v18 = vld [vmem:[%s5282_s5 + $0xa8] sm:$0xf] }
  0x26   :  { %1755 = vmatpush.bf16.msrb.mxu1 %v2612_v39  ;;  %v2975_v15 = vld [vmem:[%s5282_s5 + $0x460] sm:$0xf]  ;;  %v3493_v16 = vld [vmem:[%s5282_s5 + $0x478] sm:$0xf0]  ;;  %v3374_v19 = vld [vmem:[%s5282_s5 + $0xc0] sm:$0xf0]  ;;  %v2752_v22 = vor.u32 %v3437_v14, %v2751_v12 }
  0x27   :  { %317 = vmatpush.bf16.msrb.mxu0 %v2300_v35  ;;  %1768 = vmatpush.bf16.msrb.mxu2 %v2836_v52  ;;  %v3171_v20 = vld [vmem:[%s5282_s5 + $0x5e8] sm:$0xf]  ;;  %v3542_v21 = vld [vmem:[%s5282_s5 + $0x600] sm:$0xf0]  ;;  %v2976_v23 = vor.u32 %v3493_v16, %v2975_v15  ;;  %v2500_v25 = vor.u32 %v3374_v19, %v2499_v18  ;;  %v2471_v30 = vld [vmem:[%s5282_s5 + $0x70] sm:$0xf] }
  0x28   :  { %1781 = vmatpush.bf16.msrb.mxu3 %v3060_v53  ;;  %v2723_v24 = vld [vmem:[%s5282_s5 + $0x268] sm:$0xf]  ;;  %v3430_v26 = vld [vmem:[%s5282_s5 + $0x280] sm:$0xf0]  ;;  %v3172_v29 = vor.u32 %v3542_v21, %v3171_v20  ;;  %v3367_v31 = vld [vmem:[%s5282_s5 + $0x88] sm:$0xf0] }
  0x29   :  { %v2947_v27 = vld [vmem:[%s5282_s5 + $0x428] sm:$0xf]  ;;  %v3486_v28 = vld [vmem:[%s5282_s5 + $0x440] sm:$0xf0]  ;;  %v3143_v32 = vld [vmem:[%s5282_s5 + $0x5b0] sm:$0xf]  ;;  %v2724_v34 = vor.u32 %v3430_v26, %v2723_v24  ;;  %v2472_v37 = vor.u32 %v3367_v31, %v2471_v30 }
  0x2a   :  { %1756 = vmatpush.bf16.msrb.mxu1 %v2584_v47  ;;  %v3535_v33 = vld [vmem:[%s5282_s5 + $0x5c8] sm:$0xf0]  ;;  %v2948_v35 = vor.u32 %v3486_v28, %v2947_v27  ;;  %v2695_v36 = vld [vmem:[%s5282_s5 + $0x230] sm:$0xf]  ;;  %v2443_v42 = vld [vmem:[%s5282_s5 + $0x38] sm:$0xf] }
  0x2b   :  { %1794 = vmatpush.bf16.msra.mxu0 %v3284_v43  ;;  %1769 = vmatpush.bf16.msrb.mxu2 %v2808_v60  ;;  %v3423_v38 = vld [vmem:[%s5282_s5 + $0x248] sm:$0xf0]  ;;  %v2919_v39 = vld [vmem:[%s5282_s5 + $0x3f0] sm:$0xf]  ;;  %v3144_v41 = vor.u32 %v3535_v33, %v3143_v32  ;;  %v3360_v43 = vld [vmem:[%s5282_s5 + $0x50] sm:$0xf0] }
  0x2c   :  { %1782 = vmatpush.bf16.msrb.mxu3 %v3032_v0  ;;  %v3479_v40 = vld [vmem:[%s5282_s5 + $0x408] sm:$0xf0]  ;;  %v3575_v44 = vld [vmem:[%s5279_s2] ss:$0 sm:$0xff]  ;;  %v3115_v45 = vld [vmem:[%s5282_s5 + $0x578] sm:$0xf]  ;;  %v2696_v47 = vor.u32 %v3423_v38, %v2695_v36  ;;  %v2444_v50 = vor.u32 %v3360_v43, %v2443_v42 }
  0x2d   :  { %v3528_v46 = vld [vmem:[%s5282_s5 + $0x590] sm:$0xf0]  ;;  %v2920_v48 = vor.u32 %v3479_v40, %v2919_v39  ;;  %v2667_v49 = vld [vmem:[%s5282_s5 + $0x1f8] sm:$0xf]  ;;  %v2415_v56 = vld [vmem:[%s5282_s5] sm:$0xf] }
  0x2e   :  { %1757 = vmatpush.bf16.msrb.mxu1 %v2556_v63  ;;  %v2891_v52 = vld [vmem:[%s5282_s5 + $0x3b8] sm:$0xf]  ;;  %v3472_v53 = vld [vmem:[%s5282_s5 + $0x3d0] sm:$0xf0]  ;;  %v3116_v55 = vor.u32 %v3528_v46, %v3115_v45  ;;  %v3353_v57 = vld [vmem:[%s5282_s5 + $0x18] sm:$0xf0] }
  0x2f   :  { %1795 = vmatpush.bf16.msra.mxu0 %v3256_v51  ;;  %1770 = vmatpush.bf16.msrb.mxu2 %v2780_v10  ;;  %v3416_v51 = vld [vmem:[%s5282_s5 + $0x210] sm:$0xf0]  ;;  %v3087_v59 = vld [vmem:[%s5282_s5 + $0x540] sm:$0xf]  ;;  %v3521_v60 = vld [vmem:[%s5282_s5 + $0x558] sm:$0xf0]  ;;  %v2892_v2 = vor.u32 %v3472_v53, %v2891_v52  ;;  %v2416_v10 = vor.u32 %v3353_v57, %v2415_v56 }
  0x30   :  { %1783 = vmatpush.bf16.msrb.mxu3 %v3004_v11  ;;  %v3399_v61 = vld [vmem:[%s5282_s5 + $0x18c] sm:$0xf]  ;;  %v2613_v62 = vld [vmem:[%s5282_s5 + $0x1a4] sm:$0xf0]  ;;  %v2668_v1 = vor.u32 %v3416_v51, %v2667_v49  ;;  %v2639_v4 = vld [vmem:[%s5282_s5 + $0x1c0] sm:$0xf]  ;;  %v3088_v11 = vor.u32 %v3521_v60, %v3087_v59 }
  0x31   :  { %v3567_v63 = vld [vmem:[%s5282_s5 + $0x6cc] sm:$0xf]  ;;  %v3285_v0 = vld [vmem:[%s5282_s5 + $0x6e4] sm:$0xf0]  ;;  %v3409_v5 = vld [vmem:[%s5282_s5 + $0x1d8] sm:$0xf0]  ;;  %v2616_v15 = vor.u32 %v3399_v61, %v2613_v62 }
  0x32   :  { %1758 = vmatpush.bf16.msrb.mxu1 %v2528_v13  ;;  %v2863_v6 = vld [vmem:[%s5282_s5 + $0x380] sm:$0xf]  ;;  %v3465_v7 = vld [vmem:[%s5282_s5 + $0x398] sm:$0xf0]  ;;  %v3455_v8 = vld [vmem:[%s5282_s5 + $0x34c] sm:$0xf]  ;;  %v3288_v16 = vor.u32 %v3567_v63, %v3285_v0  ;;  %v2640_v21 = vor.u32 %v3409_v5, %v2639_v4 }
  0x33   :  { %1796 = vmatpush.bf16.msra.mxu0 %v3228_v3  ;;  %1771 = vmatpush.bf16.msrb.mxu2 %v2752_v22  ;;  %v2837_v12 = vld [vmem:[%s5282_s5 + $0x364] sm:$0xf0]  ;;  %v3511_v13 = vld [vmem:[%s5282_s5 + $0x50c] sm:$0xf]  ;;  %v2585_v18 = vld [vmem:[%s5282_s5 + $0x16c] sm:$0xf0]  ;;  %v2864_v22 = vor.u32 %v3465_v7, %v2863_v6 }
  0x34   :  { %1784 = vmatpush.bf16.msrb.mxu3 %v2976_v23  ;;  %v3061_v14 = vld [vmem:[%s5282_s5 + $0x524] sm:$0xf0]  ;;  %v3560_v19 = vld [vmem:[%s5282_s5 + $0x694] sm:$0xf]  ;;  %v3257_v20 = vld [vmem:[%s5282_s5 + $0x6ac] sm:$0xf0]  ;;  %v2840_v24 = vor.u32 %v3455_v8, %v2837_v12 }
  0x35   :  { %v3448_v26 = vld [vmem:[%s5282_s5 + $0x314] sm:$0xf]  ;;  %v2809_v27 = vld [vmem:[%s5282_s5 + $0x32c] sm:$0xf0]  ;;  %v3260_v31 = vor.u32 %v3560_v19, %v3257_v20  ;;  %v3385_v32 = vld [vmem:[%s5282_s5 + $0x11c] sm:$0xf] }
  0x36   :  { %1759 = vmatpush.bf16.msrb.mxu1 %v2500_v25  ;;  %v3064_v25 = vor.u32 %v3511_v13, %v3061_v14  ;;  %v3504_v28 = vld [vmem:[%s5282_s5 + $0x4d4] sm:$0xf]  ;;  %v2557_v33 = vld [vmem:[%s5282_s5 + $0x134] sm:$0xf0]  ;;  %v2812_v36 = vor.u32 %v3448_v26, %v2809_v27  ;;  %v3441_v38 = vld [vmem:[%s5282_s5 + $0x2dc] sm:$0xf] }
  0x37   :  { %1797 = vmatpush.bf16.msra.mxu0 %v3200_v17  ;;  %1772 = vmatpush.bf16.msrb.mxu2 %v2724_v34  ;;  %v3392_v17 = vld [vmem:[%s5282_s5 + $0x154] sm:$0xf]  ;;  %v3553_v34 = vld [vmem:[%s5282_s5 + $0x65c] sm:$0xf]  ;;  %v2781_v39 = vld [vmem:[%s5282_s5 + $0x2f4] sm:$0xf0]  ;;  %v2560_v42 = vor.u32 %v3385_v32, %v2557_v33 }
  0x38   :  { %1785 = vmatpush.bf16.msrb.mxu3 %v2948_v35  ;;  %v2588_v30 = vor.u32 %v3392_v17, %v2585_v18  ;;  %v3229_v35 = vld [vmem:[%s5282_s5 + $0x674] sm:$0xf0]  ;;  %v3497_v40 = vld [vmem:[%s5282_s5 + $0x49c] sm:$0xf]  ;;  %v2529_v45 = vld [vmem:[%s5282_s5 + $0xfc] sm:$0xf0] }
  0x39   :  { %v3232_v43 = vor.u32 %v3553_v34, %v3229_v35  ;;  %v3546_v46 = vld [vmem:[%s5282_s5 + $0x624] sm:$0xf]  ;;  %v2753_v51 = vld [vmem:[%s5282_s5 + $0x2bc] sm:$0xf0]  ;;  %v3371_v56 = vld [vmem:[%s5282_s5 + $0xac] sm:$0xf] }
  0x3a   :  { %1760 = vmatpush.bf16.msrb.mxu1 %v2472_v37  ;;  %v3490_v52 = vld [vmem:[%s5282_s5 + $0x464] sm:$0xf]  ;;  %v2977_v53 = vld [vmem:[%s5282_s5 + $0x47c] sm:$0xf0]  ;;  %v2501_v57 = vld [vmem:[%s5282_s5 + $0xc4] sm:$0xf0] }
  0x3b   :  { %1798 = vmatpush.bf16.msra.mxu0 %v3172_v29  ;;  %1773 = vmatpush.bf16.msrb.mxu2 %v2696_v47  ;;  %v3033_v29 = vld [vmem:[%s5282_s5 + $0x4ec] sm:$0xf0]  ;;  %v3201_v47 = vld [vmem:[%s5282_s5 + $0x63c] sm:$0xf0]  ;;  %v3173_v59 = vld [vmem:[%s5282_s5 + $0x604] sm:$0xf0]  ;;  %v2980_v61 = vor.u32 %v3490_v52, %v2977_v53  ;;  %v2504_v62 = vor.u32 %v3371_v56, %v2501_v57 }
  0x3c   :  { %1786 = vmatpush.bf16.msrb.mxu3 %v2920_v48  ;;  %v3036_v37 = vor.u32 %v3504_v28, %v3033_v29  ;;  %v2784_v48 = vor.u32 %v3441_v38, %v2781_v39  ;;  %v3364_v0 = vld [vmem:[%s5282_s5 + $0x74] sm:$0xf]  ;;  %v3427_v6 = vld [vmem:[%s5282_s5 + $0x26c] sm:$0xf]  ;;  %v2725_v7 = vld [vmem:[%s5282_s5 + $0x284] sm:$0xf0] }
  0x3d   :  { %v3483_v8 = vld [vmem:[%s5282_s5 + $0x42c] sm:$0xf]  ;;  %v3357_v12 = vld [vmem:[%s5282_s5 + $0x3c] sm:$0xf]  ;;  %v2445_v13 = vld [vmem:[%s5282_s5 + $0x54] sm:$0xf0] }
  0x3e   :  { %1761 = vmatpush.bf16.msrb.mxu1 %v2444_v50  ;;  %v3434_v50 = vld [vmem:[%s5282_s5 + $0x2a4] sm:$0xf]  ;;  %v2448_v14 = vor.u32 %v3357_v12, %v2445_v13  ;;  %v3420_v18 = vld [vmem:[%s5282_s5 + $0x234] sm:$0xf]  ;;  %v2697_v19 = vld [vmem:[%s5282_s5 + $0x24c] sm:$0xf0] }
  0x3f   :  { %1799 = vmatpush.bf16.msra.mxu0 %v3144_v41  ;;  %1774 = vmatpush.bf16.msrb.mxu2 %v2668_v1  ;;  %v3005_v41 = vld [vmem:[%s5282_s5 + $0x4b4] sm:$0xf0]  ;;  %v2756_v60 = vor.u32 %v3434_v50, %v2753_v51  ;;  %v2473_v1 = vld [vmem:[%s5282_s5 + $0x8c] sm:$0xf0]  ;;  %v3476_v20 = vld [vmem:[%s5282_s5 + $0x3f4] sm:$0xf] }
  0x40   :  { %1787 = vmatpush.bf16.msrb.mxu3 %v2892_v2  ;;  %v3008_v49 = vor.u32 %v3497_v40, %v3005_v41  ;;  %v3532_v2 = vld [vmem:[%s5282_s5 + $0x5b4] sm:$0xf]  ;;  %v2476_v4 = vor.u32 %v3364_v0, %v2473_v1  ;;  %v3518_v26 = vld [vmem:[%s5282_s5 + $0x544] sm:$0xf]  ;;  %v3089_v28 = vld [vmem:[%s5282_s5 + $0x55c] sm:$0xf0] }
  0x41   :  { %v3092_v29 = vor.u32 %v3518_v26, %v3089_v28  ;;  %v3469_v32 = vld [vmem:[%s5282_s5 + $0x3bc] sm:$0xf]  ;;  %v2893_v34 = vld [vmem:[%s5282_s5 + $0x3d4] sm:$0xf0]  ;;  %v3462_v39 = vld [vmem:[%s5282_s5 + $0x384] sm:$0xf] }
  0x42   :  { %1762 = vmatpush.bf16.msrb.mxu1 %v2416_v10  ;;  %v2949_v10 = vld [vmem:[%s5282_s5 + $0x444] sm:$0xf0]  ;;  %v2896_v35 = vor.u32 %v3469_v32, %v2893_v34  ;;  %v2865_v40 = vld [vmem:[%s5282_s5 + $0x39c] sm:$0xf0]  ;;  %v3291_v51 = vld [vmem:[%s5282_s5 + $0x6d0] sm:$0xf] }
  0x43   :  { %1800 = vmatpush.bf16.msra.mxu0 %v3116_v55  ;;  %1775 = vmatpush.bf16.msrb.mxu2 %v2640_v21  ;;  %v3204_v55 = vor.u32 %v3546_v46, %v3201_v47  ;;  %v2700_v21 = vor.u32 %v3420_v18, %v2697_v19  ;;  %v2868_v41 = vor.u32 %v3462_v39, %v2865_v40  ;;  %v3571_v52 = vld [vmem:[%s5282_s5 + $0x6e8] sm:$0xf0]  ;;  %v3263_v0 = vld [vmem:[%s5282_s5 + $0x698] sm:$0xf]  ;;  %v3564_v1 = vld [vmem:[%s5282_s5 + $0x6b0] sm:$0xf0] }
  0x44   :  { %1788 = vmatpush.bf16.msrb.mxu3 %v2864_v22  ;;  %v2921_v22 = vld [vmem:[%s5282_s5 + $0x40c] sm:$0xf0]  ;;  %v3264_v13 = vor.u32 %v3564_v1, %v3263_v0  ;;  %v3235_v18 = vld [vmem:[%s5282_s5 + $0x660] sm:$0xf]  ;;  %v3557_v19 = vld [vmem:[%s5282_s5 + $0x678] sm:$0xf0] }
  0x45   :  { %v3039_v26 = vld [vmem:[%s5282_s5 + $0x4d8] sm:$0xf]  ;;  %v3236_v28 = vor.u32 %v3557_v19, %v3235_v18  ;;  %v3550_v34 = vld [vmem:[%s5282_s5 + $0x640] sm:$0xf0]  ;;  %v3011_v40 = vld [vmem:[%s5282_s5 + $0x4a0] sm:$0xf] }
  0x46   :  { %v3431_v0 = vld [vmem:[%s5282_s5 + $0x288] sm:$0xf0]  ;;  %v3354_v18 = vld [vmem:[%s5282_s5 + $0x20] sm:$0xf0]  ;;  %v3095_v19 = vld [vmem:[%s5282_s5 + $0x548] sm:$0xf] }
  0x47   :  { %1801 = vmatpush.bf16.msra.mxu0 %v3088_v11  ;;  %v2952_v11 = vor.u32 %v3483_v8, %v2949_v10  ;;  %v3515_v10 = vld [vmem:[%s5282_s5 + $0x528] sm:$0xf0]  ;;  %s2267_s26 = sshll.u32 %s5284_s7, 4  ;;  %s2268_s26 = int_to_ptr.hbm [resolvable:$true] %s2267_s26 }
  0x87   :  { %v63_v54 = vpop.f32.mrf.mxu0 }
  0x88   :  { %v64_v58 = vadd.f32 %v3575_v44, %v63_v54  ;;  %v3378_v44 = vld [vmem:[%s5282_s5 + $0xe4] sm:$0xf] }
  0x89   :  { %v2532_v54 = vor.u32 %v3378_v44, %v2529_v45 }
  0x8a   :  { %v67_v3 = vmax.f32 %v64_v58, 0.0  ;;  %v3539_v58 = vld [vmem:[%s5282_s5 + $0x5ec] sm:$0xf] }
  0x8b   :  { %v3176_v63 = vor.u32 %v3539_v58, %v3173_v59  ;;  %v3292_v59 = vor.u32 %v3571_v52, %v3291_v51  ;;  %v2983_v52 = vld [vmem:[%s5282_s5 + $0x468] sm:$0xf] }
  0x8c   :  { %v68_v9 = vpack.c.bf16 %v67_v3, %v67_v3  ;;  %v3145_v3 = vld [vmem:[%s5282_s5 + $0x5cc] sm:$0xf0] }
  0x8d   :  { %v3148_v5 = vor.u32 %v3532_v2, %v3145_v3 }
  0x8e   :  { %279 = vmatmul.bf16.vlgmr.msra.gmra.mxu1 %v68_v9  ;;  %292 = vmatmul.bf16.vlgmr.msra.gmra.mxu2 %v68_v9 }
  0x8f   :  { %305 = vmatmul.bf16.vlgmr.msra.gmra.mxu3 %v68_v9  ;;  %318 = vmatmul.bf16.vlgmr.msrb.gmra.mxu0 %v68_v9  ;;  %v65_v23 = vpop.f32.mrf.mxu0  ;;  %v2728_v9 = vor.u32 %v3427_v6, %v2725_v7 }
  0x90   :  { %1807 = vmatpush.bf16.msra.mxu1 %v2616_v15  ;;  %1846 = vmatpush.bf16.msrb.mxu0 %v3288_v16  ;;  %v3525_v15 = vld [vmem:[%s5282_s5 + $0x57c] sm:$0xf]  ;;  %v3117_v16 = vld [vmem:[%s5282_s5 + $0x594] sm:$0xf0]  ;;  %v2924_v23 = vor.u32 %v3476_v20, %v2921_v22 }
  0x91   :  { %1820 = vmatpush.bf16.msra.mxu2 %v2840_v24  ;;  %1833 = vmatpush.bf16.msra.mxu3 %v3064_v25  ;;  %v3120_v17 = vor.u32 %v3525_v15, %v3117_v16  ;;  %v3350_v24 = vld [vmem:[%s5282_s5 + $0x4] sm:$0xf]  ;;  %v2417_v25 = vld [vmem:[%s5282_s5 + $0x1c] sm:$0xf0]  ;;  %v3389_v15 = vld [vmem:[%s5282_s5 + $0x138] sm:$0xf0] }
  0x92   :  { %v2420_v27 = vor.u32 %v3350_v24, %v2417_v25  ;;  %v2815_v22 = vld [vmem:[%s5282_s5 + $0x318] sm:$0xf] }
  0x94   :  { %1808 = vmatpush.bf16.msra.mxu1 %v2588_v30  ;;  %1847 = vmatpush.bf16.msrb.mxu0 %v3260_v31  ;;  %v3413_v30 = vld [vmem:[%s5282_s5 + $0x1fc] sm:$0xf]  ;;  %v2669_v31 = vld [vmem:[%s5282_s5 + $0x214] sm:$0xf0] }
  0x95   :  { %1821 = vmatpush.bf16.msra.mxu2 %v2812_v36  ;;  %1834 = vmatpush.bf16.msra.mxu3 %v3036_v37  ;;  %v2672_v33 = vor.u32 %v3413_v30, %v2669_v31  ;;  %v3406_v36 = vld [vmem:[%s5282_s5 + $0x1c4] sm:$0xf]  ;;  %v2641_v37 = vld [vmem:[%s5282_s5 + $0x1dc] sm:$0xf0] }
  0x96   :  { %v2644_v38 = vor.u32 %v3406_v36, %v2641_v37  ;;  %v3382_v30 = vld [vmem:[%s5282_s5 + $0x100] sm:$0xf0]  ;;  %v2787_v37 = vld [vmem:[%s5282_s5 + $0x2e0] sm:$0xf] }
  0x98   :  { %1809 = vmatpush.bf16.msra.mxu1 %v2560_v42  ;;  %1848 = vmatpush.bf16.msrb.mxu0 %v3232_v43  ;;  %v101_v42 = vld [vmem:[%s5281_s4] sm:$0xf] }
  0x99   :  { %1822 = vmatpush.bf16.msra.mxu2 %v2784_v48  ;;  %1835 = vmatpush.bf16.msra.mxu3 %v3008_v49  ;;  %v103_v43 = vperm.slane %v101_v42, 0  ;;  %v106_v44 = vperm.slane %v101_v42, 3  ;;  %v2619_v48 = vld [vmem:[%s5282_s5 + $0x190] sm:$0xf]  ;;  %v3403_v49 = vld [vmem:[%s5282_s5 + $0x1a8] sm:$0xf0] }
  0x9a   :  { %v105_v56 = vperm.slane %v101_v42, 2  ;;  %v2620_v57 = vor.u32 %v3403_v49, %v2619_v48  ;;  %v2759_v49 = vld [vmem:[%s5282_s5 + $0x2a8] sm:$0xf] }
  0x9c   :  { %1810 = vmatpush.bf16.msra.mxu1 %v2532_v54  ;;  %1849 = vmatpush.bf16.msrb.mxu0 %v3204_v55  ;;  %v104_v54 = vperm.slane %v101_v42, 1 }
  0x9d   :  { %1823 = vmatpush.bf16.msra.mxu2 %v2756_v60  ;;  %1836 = vmatpush.bf16.msra.mxu3 %v2980_v61  ;;  %v2591_v60 = vld [vmem:[%s5282_s5 + $0x158] sm:$0xf]  ;;  %v3396_v61 = vld [vmem:[%s5282_s5 + $0x170] sm:$0xf0] }
  0x9e   :  { %v2592_v8 = vor.u32 %v3396_v61, %v2591_v60  ;;  %v3536_v60 = vld [vmem:[%s5282_s5 + $0x5d0] sm:$0xf0] }
  0xa0   :  { %1811 = vmatpush.bf16.msra.mxu1 %v2504_v62  ;;  %1850 = vmatpush.bf16.msrb.mxu0 %v3176_v63 }
  0xa1   :  { %1824 = vmatpush.bf16.msra.mxu2 %v2728_v9  ;;  %1837 = vmatpush.bf16.msra.mxu3 %v2952_v11  ;;  %v3067_v9 = vld [vmem:[%s5282_s5 + $0x510] sm:$0xf] }
  0xa4   :  { %1812 = vmatpush.bf16.msra.mxu1 %v2476_v4  ;;  %1851 = vmatpush.bf16.msrb.mxu0 %v3148_v5  ;;  %v2843_v4 = vld [vmem:[%s5282_s5 + $0x350] sm:$0xf]  ;;  %v3459_v5 = vld [vmem:[%s5282_s5 + $0x368] sm:$0xf0] }
  0xa5   :  { %1825 = vmatpush.bf16.msra.mxu2 %v2700_v21  ;;  %1838 = vmatpush.bf16.msra.mxu3 %v2924_v23  ;;  %v3068_v21 = vor.u32 %v3515_v10, %v3067_v9  ;;  %v3452_v23 = vld [vmem:[%s5282_s5 + $0x330] sm:$0xf0]  ;;  %v3529_v9 = vld [vmem:[%s5282_s5 + $0x598] sm:$0xf0] }
  0xa6   :  { %v2816_v32 = vor.u32 %v3452_v23, %v2815_v22  ;;  %v3400_v23 = vld [vmem:[%s5282_s5 + $0x194] sm:$0xf] }
  0xa8   :  { %1813 = vmatpush.bf16.msra.mxu1 %v2448_v14  ;;  %1852 = vmatpush.bf16.msrb.mxu0 %v3120_v17  ;;  %v2563_v14 = vld [vmem:[%s5282_s5 + $0x120] sm:$0xf]  ;;  %v2844_v17 = vor.u32 %v3459_v5, %v2843_v4 }
  0xa9   :  { %1826 = vmatpush.bf16.msra.mxu2 %v2672_v33  ;;  %1839 = vmatpush.bf16.msra.mxu3 %v2896_v35  ;;  %v2564_v25 = vor.u32 %v3389_v15, %v2563_v14  ;;  %v3207_v33 = vld [vmem:[%s5282_s5 + $0x628] sm:$0xf]  ;;  %v2451_v5 = vld [vmem:[%s5282_s5 + $0x40] sm:$0xf]  ;;  %v2927_v14 = vld [vmem:[%s5282_s5 + $0x3f8] sm:$0xf] }
  0xaa   :  { %v3208_v42 = vor.u32 %v3550_v34, %v3207_v33  ;;  %v3480_v15 = vld [vmem:[%s5282_s5 + $0x410] sm:$0xf0]  ;;  %v3473_v33 = vld [vmem:[%s5282_s5 + $0x3d8] sm:$0xf0] }
  0xac   :  { %1814 = vmatpush.bf16.msra.mxu1 %v2420_v27  ;;  %1853 = vmatpush.bf16.msrb.mxu0 %v3092_v29  ;;  %v3508_v27 = vld [vmem:[%s5282_s5 + $0x4f0] sm:$0xf0]  ;;  %v2535_v29 = vld [vmem:[%s5282_s5 + $0xe8] sm:$0xf] }
  0xad   :  { %1827 = vmatpush.bf16.msra.mxu2 %v2644_v38  ;;  %1840 = vmatpush.bf16.msra.mxu3 %v2868_v41  ;;  %v3040_v36 = vor.u32 %v3508_v27, %v3039_v26  ;;  %v3445_v38 = vld [vmem:[%s5282_s5 + $0x2f8] sm:$0xf0]  ;;  %v2536_v39 = vor.u32 %v3382_v30, %v2535_v29  ;;  %v3568_v26 = vld [vmem:[%s5282_s5 + $0x6d4] sm:$0xf]  ;;  %v2928_v27 = vor.u32 %v3480_v15, %v2927_v14  ;;  %v2675_v29 = vld [vmem:[%s5282_s5 + $0x200] sm:$0xf] }
  0xae   :  { %v3501_v41 = vld [vmem:[%s5282_s5 + $0x4b8] sm:$0xf0]  ;;  %v3498_v14 = vld [vmem:[%s5282_s5 + $0x4a4] sm:$0xf]  ;;  %v3013_v15 = vld [vmem:[%s5282_s5 + $0x4bc] sm:$0xf0] }
  0xaf   :  { %v3012_v48 = vor.u32 %v3501_v41, %v3011_v40  ;;  %v3417_v30 = vld [vmem:[%s5282_s5 + $0x218] sm:$0xf0]  ;;  %v3265_v41 = vld [vmem:[%s5282_s5 + $0x6b4] sm:$0xf0] }
  0xb0   :  { %v3561_v40 = vld [vmem:[%s5282_s5 + $0x69c] sm:$0xf] }
 0x10b   :  { %v280_v45 = vpop.f32.mrf.mxu1 }
 0x10c   :  { %v281_v46 = vadd.f32 %v280_v45, %v103_v43  ;;  %v319_v47 = vpop.f32.mrf.mxu0  ;;  %v2507_v43 = vld [vmem:[%s5282_s5 + $0xb0] sm:$0xf]  ;;  %v2788_v45 = vor.u32 %v3445_v38, %v2787_v37  ;;  %v2676_v38 = vor.u32 %v3417_v30, %v2675_v29  ;;  %v2985_v29 = vld [vmem:[%s5282_s5 + $0x484] sm:$0xf0] }
 0x10d   :  { %v320_v50 = vadd.f32 %v319_v47, %v106_v44  ;;  %v3375_v44 = vld [vmem:[%s5282_s5 + $0xc8] sm:$0xf0] }
 0x10e   :  { %v323_v53 = vmax.f32 %v281_v46, 0.0  ;;  %v3179_v46 = vld [vmem:[%s5282_s5 + $0x5f0] sm:$0xf]  ;;  %v3543_v47 = vld [vmem:[%s5282_s5 + $0x608] sm:$0xf0]  ;;  %v2508_v51 = vor.u32 %v3375_v44, %v2507_v43 }
 0x10f   :  { %v326_v55 = vmax.f32 %v320_v50, 0.0  ;;  %v3438_v50 = vld [vmem:[%s5282_s5 + $0x2c0] sm:$0xf0]  ;;  %v2647_v43 = vld [vmem:[%s5282_s5 + $0x1c8] sm:$0xf] }
 0x110   :  { %v4275_v58 = vpack.c.bf16 %v323_v53, %v323_v53  ;;  %v3494_v53 = vld [vmem:[%s5282_s5 + $0x480] sm:$0xf0] }
 0x111   :  { %v4283_v62 = vpack.c.bf16 %v326_v55, %v326_v55  ;;  %v293_v63 = vpop.f32.mrf.mxu2  ;;  %v2479_v55 = vld [vmem:[%s5282_s5 + $0x78] sm:$0xf]  ;;  %v2984_v61 = vor.u32 %v3494_v53, %v2983_v52  ;;  %v3410_v44 = vld [vmem:[%s5282_s5 + $0x1e0] sm:$0xf0]  ;;  %v3268_v52 = vor.u32 %v3561_v40, %v3265_v41  ;;  %v3484_v40 = vld [vmem:[%s5282_s5 + $0x434] sm:$0xf] }
 0x112   :  { %v294_v2 = vadd.f32 %v293_v63, %v104_v54  ;;  %v306_v3 = vpop.f32.mrf.mxu3  ;;  %1763 = vmatmul.bf16.vlgmr.msrb.gmra.mxu1 %v4275_v58  ;;  %v3180_v54 = vor.u32 %v3543_v47, %v3179_v46  ;;  %v2731_v63 = vld [vmem:[%s5282_s5 + $0x270] sm:$0xf]  ;;  %v3466_v46 = vld [vmem:[%s5282_s5 + $0x3a0] sm:$0xf0]  ;;  %v3456_v47 = vld [vmem:[%s5282_s5 + $0x354] sm:$0xf]  ;;  %v2648_v53 = vor.u32 %v3410_v44, %v2647_v43 }
 0x113   :  { %v307_v6 = vadd.f32 %v306_v3, %v105_v56  ;;  %1802 = vmatmul.bf16.vlgmr.msra.gmra.mxu0 %v4283_v62  ;;  %1859 = vmatpush.bf16.msrb.mxu1 %v2620_v57  ;;  %v282_v7 = vpop.f32.mrf.mxu1  ;;  %v3368_v56 = vld [vmem:[%s5282_s5 + $0x90] sm:$0xf0]  ;;  %v2760_v57 = vor.u32 %v3438_v50, %v2759_v49  ;;  %v3487_v3 = vld [vmem:[%s5282_s5 + $0x448] sm:$0xf0]  ;;  %v2957_v41 = vld [vmem:[%s5282_s5 + $0x44c] sm:$0xf0] }
 0x114   :  { %v324_v11 = vmax.f32 %v294_v2, 0.0  ;;  %1898 = vmatpush.bf16.msra.mxu0 %v3292_v59  ;;  %v321_v12 = vpop.f32.mrf.mxu0  ;;  %v3151_v59 = vld [vmem:[%s5282_s5 + $0x5b8] sm:$0xf]  ;;  %v2480_v1 = vor.u32 %v3368_v56, %v2479_v55  ;;  %v2955_v2 = vld [vmem:[%s5282_s5 + $0x430] sm:$0xf]  ;;  %v2732_v7 = vor.u32 %v3431_v0, %v2731_v63 }
 0x115   :  { %v325_v16 = vmax.f32 %v307_v6, 0.0  ;;  %v3152_v4 = vor.u32 %v3536_v60, %v3151_v59  ;;  %v3361_v6 = vld [vmem:[%s5282_s5 + $0x58] sm:$0xf0]  ;;  %v2956_v10 = vor.u32 %v3487_v3, %v2955_v2  ;;  %v3424_v12 = vld [vmem:[%s5282_s5 + $0x250] sm:$0xf0] }
 0x116   :  { %v4317_v20 = vpack.c.bf16 %v324_v11, %v324_v11  ;;  %v2703_v11 = vld [vmem:[%s5282_s5 + $0x238] sm:$0xf]  ;;  %v3512_v50 = vld [vmem:[%s5282_s5 + $0x514] sm:$0xf]  ;;  %v2565_v55 = vld [vmem:[%s5282_s5 + $0x13c] sm:$0xf0] }
 0x117   :  { %v4325_v24 = vpack.c.bf16 %v325_v16, %v325_v16  ;;  %1860 = vmatpush.bf16.msrb.mxu1 %v2592_v8  ;;  %v3123_v8 = vld [vmem:[%s5282_s5 + $0x580] sm:$0xf]  ;;  %v2423_v16 = vld [vmem:[%s5282_s5 + $0x8] sm:$0xf]  ;;  %v2704_v22 = vor.u32 %v3424_v12, %v2703_v11  ;;  %v3554_v59 = vld [vmem:[%s5282_s5 + $0x664] sm:$0xf] }
 0x118   :  { %1899 = vmatpush.bf16.msra.mxu0 %v3264_v13  ;;  %1776 = vmatmul.bf16.vlgmr.msrb.gmra.mxu2 %v4317_v20  ;;  %v2452_v13 = vor.u32 %v3361_v6, %v2451_v5  ;;  %v3237_v60 = vld [vmem:[%s5282_s5 + $0x67c] sm:$0xf0]  ;;  %v3449_v63 = vld [vmem:[%s5282_s5 + $0x31c] sm:$0xf]  ;;  %v2817_v0 = vld [vmem:[%s5282_s5 + $0x334] sm:$0xf0] }
 0x119   :  { %1789 = vmatmul.bf16.vlgmr.msrb.gmra.mxu3 %v4325_v24  ;;  %1872 = vmatpush.bf16.msrb.mxu2 %v2844_v17  ;;  %v295_v31 = vpop.f32.mrf.mxu2  ;;  %v3124_v17 = vor.u32 %v3529_v9, %v3123_v8  ;;  %v3505_v2 = vld [vmem:[%s5282_s5 + $0x4dc] sm:$0xf]  ;;  %v3041_v3 = vld [vmem:[%s5282_s5 + $0x4f4] sm:$0xf0]  ;;  %v3379_v5 = vld [vmem:[%s5282_s5 + $0xec] sm:$0xf] }
 0x11a   :  { %1885 = vmatpush.bf16.msrb.mxu3 %v3068_v21  ;;  %v308_v35 = vpop.f32.mrf.mxu3  ;;  %v3522_v21 = vld [vmem:[%s5282_s5 + $0x560] sm:$0xf0]  ;;  %v2424_v31 = vor.u32 %v3354_v18, %v2423_v16  ;;  %v2537_v6 = vld [vmem:[%s5282_s5 + $0x104] sm:$0xf0]  ;;  %v3547_v8 = vld [vmem:[%s5282_s5 + $0x62c] sm:$0xf] }
 0x11b   :  { %1861 = vmatpush.bf16.msrb.mxu1 %v2564_v25  ;;  %v2621_v25 = vld [vmem:[%s5282_s5 + $0x1ac] sm:$0xf0]  ;;  %v3096_v34 = vor.u32 %v3522_v21, %v3095_v19  ;;  %v3209_v9 = vld [vmem:[%s5282_s5 + $0x644] sm:$0xf0]  ;;  %v3442_v11 = vld [vmem:[%s5282_s5 + $0x2e4] sm:$0xf] }
 0x11c   :  { %1900 = vmatpush.bf16.msra.mxu0 %v3236_v28  ;;  %v3293_v28 = vld [vmem:[%s5282_s5 + $0x6ec] sm:$0xf0]  ;;  %v2624_v35 = vor.u32 %v3400_v23, %v2621_v25  ;;  %v2789_v12 = vld [vmem:[%s5282_s5 + $0x2fc] sm:$0xf0]  ;;  %v3212_v16 = vor.u32 %v3547_v8, %v3209_v9  ;;  %v3540_v21 = vld [vmem:[%s5282_s5 + $0x5f4] sm:$0xf]  ;;  %v3016_v23 = vor.u32 %v3498_v14, %v3013_v15 }
 0x11d   :  { %1873 = vmatpush.bf16.msrb.mxu2 %v2816_v32  ;;  %v2899_v32 = vld [vmem:[%s5282_s5 + $0x3c0] sm:$0xf]  ;;  %v3296_v37 = vor.u32 %v3568_v26, %v3293_v28  ;;  %v2509_v18 = vld [vmem:[%s5282_s5 + $0xcc] sm:$0xf0]  ;;  %v2792_v19 = vor.u32 %v3442_v11, %v2789_v12  ;;  %v3435_v25 = vld [vmem:[%s5282_s5 + $0x2ac] sm:$0xf] }
 0x11e   :  { %1886 = vmatpush.bf16.msrb.mxu3 %v3040_v36  ;;  %v3393_v36 = vld [vmem:[%s5282_s5 + $0x15c] sm:$0xf]  ;;  %v2761_v26 = vld [vmem:[%s5282_s5 + $0x2c4] sm:$0xf0]  ;;  %v3491_v28 = vld [vmem:[%s5282_s5 + $0x46c] sm:$0xf] }
 0x11f   :  { %1862 = vmatpush.bf16.msrb.mxu1 %v2536_v39  ;;  %v2593_v39 = vld [vmem:[%s5282_s5 + $0x174] sm:$0xf0]  ;;  %v3358_v43 = vld [vmem:[%s5282_s5 + $0x44] sm:$0xf]  ;;  %v2453_v44 = vld [vmem:[%s5282_s5 + $0x5c] sm:$0xf0] }
 0x120   :  { %1901 = vmatpush.bf16.msra.mxu0 %v3208_v42  ;;  %v2900_v42 = vor.u32 %v3473_v33, %v2899_v32  ;;  %v2596_v49 = vor.u32 %v3393_v36, %v2593_v39  ;;  %v2481_v32 = vld [vmem:[%s5282_s5 + $0x94] sm:$0xf0]  ;;  %v2764_v33 = vor.u32 %v3435_v25, %v2761_v26  ;;  %v2988_v36 = vor.u32 %v3491_v28, %v2985_v29  ;;  %v3271_v14 = vld [vmem:[%s5282_s5 + $0x6a0] sm:$0xf]  ;;  %v3565_v15 = vld [vmem:[%s5282_s5 + $0x6b8] sm:$0xf0] }
 0x121   :  { %1874 = vmatpush.bf16.msrb.mxu2 %v2788_v45  ;;  %v2871_v45 = vld [vmem:[%s5282_s5 + $0x388] sm:$0xf]  ;;  %v3075_v26 = vld [vmem:[%s5282_s5 + $0x518] sm:$0xf]  ;;  %v3272_v28 = vor.u32 %v3565_v15, %v3271_v14  ;;  %v3488_v15 = vld [vmem:[%s5282_s5 + $0x450] sm:$0xf0] }
 0x122   :  { %1887 = vmatpush.bf16.msrb.mxu3 %v3012_v48  ;;  %1815 = vmatmul.bf16.vlgmr.msra.gmra.mxu1 %v4275_v58  ;;  %v2845_v48 = vld [vmem:[%s5282_s5 + $0x36c] sm:$0xf0]  ;;  %v2872_v56 = vor.u32 %v3466_v46, %v2871_v45  ;;  %v3526_v46 = vld [vmem:[%s5282_s5 + $0x584] sm:$0xf]  ;;  %v2963_v14 = vld [vmem:[%s5282_s5 + $0x438] sm:$0xf] }
 0x123   :  { %1854 = vmatmul.bf16.vlgmr.msrb.gmra.mxu0 %v4283_v62  ;;  %1863 = vmatpush.bf16.msrb.mxu1 %v2508_v51  ;;  %v3069_v51 = vld [vmem:[%s5282_s5 + $0x52c] sm:$0xf0] }
 0x124   :  { %1902 = vmatpush.bf16.msra.mxu0 %v3180_v54  ;;  %v3386_v54 = vld [vmem:[%s5282_s5 + $0x124] sm:$0xf] }
 0x125   :  { %1875 = vmatpush.bf16.msrb.mxu2 %v2760_v57  ;;  %v2848_v57 = vor.u32 %v3456_v47, %v2845_v48  ;;  %v3125_v47 = vld [vmem:[%s5282_s5 + $0x59c] sm:$0xf0]  ;;  %v2960_v48 = vor.u32 %v3484_v40, %v2957_v41  ;;  %v3509_v41 = vld [vmem:[%s5282_s5 + $0x4f8] sm:$0xf0] }
 0x126   :  { %1888 = vmatpush.bf16.msrb.mxu3 %v2984_v61  ;;  %v3072_v61 = vor.u32 %v3512_v50, %v3069_v51  ;;  %v2705_v50 = vld [vmem:[%s5282_s5 + $0x254] sm:$0xf0]  ;;  %v2456_v51 = vor.u32 %v3358_v43, %v2453_v44  ;;  %v3047_v40 = vld [vmem:[%s5282_s5 + $0x4e0] sm:$0xf]  ;;  %v2543_v43 = vld [vmem:[%s5282_s5 + $0xf0] sm:$0xf] }
 0x127   :  { %1864 = vmatpush.bf16.msrb.mxu1 %v2480_v1  ;;  %v2568_v1 = vor.u32 %v3386_v54, %v2565_v55  ;;  %v3351_v54 = vld [vmem:[%s5282_s5 + $0xc] sm:$0xf]  ;;  %v3128_v55 = vor.u32 %v3526_v46, %v3125_v47  ;;  %v3215_v46 = vld [vmem:[%s5282_s5 + $0x630] sm:$0xf] }
 0x128   :  { %1903 = vmatpush.bf16.msra.mxu0 %v3152_v4  ;;  %1828 = vmatmul.bf16.vlgmr.msra.gmra.mxu2 %v4317_v20  ;;  %v3240_v4 = vor.u32 %v3554_v59, %v3237_v60  ;;  %v3097_v59 = vld [vmem:[%s5282_s5 + $0x564] sm:$0xf0]  ;;  %v3383_v44 = vld [vmem:[%s5282_s5 + $0x108] sm:$0xf0] }
 0x129   :  { %1841 = vmatmul.bf16.vlgmr.msra.gmra.mxu3 %v4325_v24  ;;  %1876 = vmatpush.bf16.msrb.mxu2 %v2732_v7  ;;  %v2820_v7 = vor.u32 %v3449_v63, %v2817_v0  ;;  %v3404_v63 = vld [vmem:[%s5282_s5 + $0x1b0] sm:$0xf0]  ;;  %v3299_v0 = vld [vmem:[%s5282_s5 + $0x6d8] sm:$0xf]  ;;  %v3551_v47 = vld [vmem:[%s5282_s5 + $0x648] sm:$0xf0] }
 0x12a   :  { %1889 = vmatpush.bf16.msrb.mxu3 %v2956_v10  ;;  %v3044_v10 = vor.u32 %v3505_v2, %v3041_v3  ;;  %v3572_v2 = vld [vmem:[%s5282_s5 + $0x6f0] sm:$0xf0]  ;;  %v3414_v3 = vld [vmem:[%s5282_s5 + $0x204] sm:$0xf] }
 0x12b   :  { %1865 = vmatpush.bf16.msrb.mxu1 %v2452_v13  ;;  %v2540_v13 = vor.u32 %v3379_v5, %v2537_v6  ;;  %v3470_v6 = vld [vmem:[%s5282_s5 + $0x3c4] sm:$0xf]  ;;  %v3300_v11 = vor.u32 %v3572_v2, %v3299_v0  ;;  %v3439_v0 = vld [vmem:[%s5282_s5 + $0x2c8] sm:$0xf0]  ;;  %v2991_v2 = vld [vmem:[%s5282_s5 + $0x470] sm:$0xf] }
 0x12c   :  { %1904 = vmatpush.bf16.msra.mxu0 %v3124_v17  ;;  %v3372_v17 = vld [vmem:[%s5282_s5 + $0xb4] sm:$0xf] }
 0x12d   :  { %1877 = vmatpush.bf16.msrb.mxu2 %v2704_v22  ;;  %v3181_v22 = vld [vmem:[%s5282_s5 + $0x60c] sm:$0xf0] }
 0x12e   :  { %1890 = vmatpush.bf16.msrb.mxu3 %v2928_v27  ;;  %v2512_v27 = vor.u32 %v3372_v17, %v2509_v18  ;;  %v3184_v30 = vor.u32 %v3540_v21, %v3181_v22  ;;  %v3407_v17 = vld [vmem:[%s5282_s5 + $0x1cc] sm:$0xf]  ;;  %v2649_v18 = vld [vmem:[%s5282_s5 + $0x1e4] sm:$0xf0]  ;;  %v2851_v22 = vld [vmem:[%s5282_s5 + $0x358] sm:$0xf] }
 0x12f   :  { %1866 = vmatpush.bf16.msrb.mxu1 %v2424_v31  ;;  %v3365_v31 = vld [vmem:[%s5282_s5 + $0x7c] sm:$0xf]  ;;  %v2873_v21 = vld [vmem:[%s5282_s5 + $0x3a4] sm:$0xf0]  ;;  %v2652_v29 = vor.u32 %v3407_v17, %v2649_v18  ;;  %v3362_v18 = vld [vmem:[%s5282_s5 + $0x60] sm:$0xf0] }
 0x130   :  { %1905 = vmatpush.bf16.msra.mxu0 %v3096_v34  ;;  %v3533_v34 = vld [vmem:[%s5282_s5 + $0x5bc] sm:$0xf]  ;;  %v2484_v39 = vor.u32 %v3365_v31, %v2481_v32  ;;  %v3390_v31 = vld [vmem:[%s5282_s5 + $0x140] sm:$0xf0]  ;;  %v2459_v17 = vld [vmem:[%s5282_s5 + $0x48] sm:$0xf] }
 0x131   :  { %1878 = vmatpush.bf16.msrb.mxu2 %v2676_v38  ;;  %v2733_v38 = vld [vmem:[%s5282_s5 + $0x28c] sm:$0xf0] }
 0x132   :  { %1891 = vmatpush.bf16.msrb.mxu3 %v2900_v42  ;;  %1867 = vmatmul.bf16.vlgmr.msrb.gmra.mxu1 %v4275_v58 }
 0x133   :  { %1911 = vmatpush.bf16.msra.mxu1 %v2624_v35  ;;  %1906 = vmatmul.bf16.vlgmr.msra.gmra.mxu0 %v4283_v62  ;;  %v3153_v35 = vld [vmem:[%s5282_s5 + $0x5d4] sm:$0xf0] }
 0x134   :  { %1950 = vmatpush.bf16.msrb.mxu0 %v3296_v37  ;;  %v3428_v37 = vld [vmem:[%s5282_s5 + $0x274] sm:$0xf]  ;;  %v3156_v42 = vor.u32 %v3533_v34, %v3153_v35  ;;  %v3243_v34 = vld [vmem:[%s5282_s5 + $0x668] sm:$0xf]  ;;  %v3558_v35 = vld [vmem:[%s5282_s5 + $0x680] sm:$0xf0] }
 0x135   :  { %1879 = vmatpush.bf16.msrb.mxu2 %v2648_v53  ;;  %v2736_v45 = vor.u32 %v3428_v37, %v2733_v38  ;;  %v2929_v53 = vld [vmem:[%s5282_s5 + $0x414] sm:$0xf0]  ;;  %v2823_v37 = vld [vmem:[%s5282_s5 + $0x320] sm:$0xf]  ;;  %v3453_v38 = vld [vmem:[%s5282_s5 + $0x338] sm:$0xf0] }
 0x136   :  { %1892 = vmatpush.bf16.msrb.mxu3 %v2872_v56  ;;  %v2425_v56 = vld [vmem:[%s5282_s5 + $0x24] sm:$0xf0] }
 0x137   :  { %1912 = vmatpush.bf16.msra.mxu1 %v2596_v49  ;;  %v3421_v49 = vld [vmem:[%s5282_s5 + $0x23c] sm:$0xf]  ;;  %v2428_v5 = vor.u32 %v3351_v54, %v2425_v56  ;;  %v3216_v54 = vor.u32 %v3551_v47, %v3215_v46  ;;  %v3376_v56 = vld [vmem:[%s5282_s5 + $0xd0] sm:$0xf0] }
 0x138   :  { %1951 = vmatpush.bf16.msrb.mxu0 %v3268_v52  ;;  %1880 = vmatmul.bf16.vlgmr.msrb.gmra.mxu2 %v4317_v20  ;;  %v3477_v52 = vld [vmem:[%s5282_s5 + $0x3fc] sm:$0xf]  ;;  %v2708_v60 = vor.u32 %v3421_v49, %v2705_v50  ;;  %v2795_v49 = vld [vmem:[%s5282_s5 + $0x2e8] sm:$0xf]  ;;  %v3446_v50 = vld [vmem:[%s5282_s5 + $0x300] sm:$0xf0] }
 0x139   :  { %1924 = vmatpush.bf16.msra.mxu2 %v2848_v57  ;;  %1893 = vmatmul.bf16.vlgmr.msrb.gmra.mxu3 %v4325_v24  ;;  %v3519_v57 = vld [vmem:[%s5282_s5 + $0x54c] sm:$0xf] }
 0x13a   :  { %1937 = vmatpush.bf16.msra.mxu3 %v3072_v61  ;;  %v2627_v61 = vld [vmem:[%s5282_s5 + $0x198] sm:$0xf]  ;;  %v3100_v8 = vor.u32 %v3519_v57, %v3097_v59  ;;  %v2796_v57 = vor.u32 %v3446_v50, %v2795_v49 }
 0x13b   :  { %1913 = vmatpush.bf16.msra.mxu1 %v2568_v1  ;;  %v2932_v1 = vor.u32 %v3477_v52, %v2929_v53  ;;  %v2628_v9 = vor.u32 %v3404_v63, %v2627_v61  ;;  %v3019_v52 = vld [vmem:[%s5282_s5 + $0x4a8] sm:$0xf]  ;;  %v3502_v53 = vld [vmem:[%s5282_s5 + $0x4c0] sm:$0xf0]  ;;  %v3187_v59 = vld [vmem:[%s5282_s5 + $0x5f8] sm:$0xf] }
 0x13c   :  { %1952 = vmatpush.bf16.msrb.mxu0 %v3240_v4  ;;  %v2677_v4 = vld [vmem:[%s5282_s5 + $0x21c] sm:$0xf0]  ;;  %v3020_v61 = vor.u32 %v3502_v53, %v3019_v52  ;;  %v2767_v63 = vld [vmem:[%s5282_s5 + $0x2b0] sm:$0xf]  ;;  %v3562_v52 = vld [vmem:[%s5282_s5 + $0x6a4] sm:$0xf] }
 0x13d   :  { %1925 = vmatpush.bf16.msra.mxu2 %v2820_v7  ;;  %v2901_v7 = vld [vmem:[%s5282_s5 + $0x3dc] sm:$0xf0]  ;;  %v2680_v12 = vor.u32 %v3414_v3, %v2677_v4  ;;  %v3495_v3 = vld [vmem:[%s5282_s5 + $0x488] sm:$0xf0] }
 0x13e   :  { %1938 = vmatpush.bf16.msra.mxu3 %v3044_v10  ;;  %v2599_v10 = vld [vmem:[%s5282_s5 + $0x160] sm:$0xf] }
 0x13f   :  { %1914 = vmatpush.bf16.msra.mxu1 %v2540_v13  ;;  %v3397_v13 = vld [vmem:[%s5282_s5 + $0x178] sm:$0xf0]  ;;  %v3273_v53 = vld [vmem:[%s5282_s5 + $0x6bc] sm:$0xf0] }
 0x140   :  { %1953 = vmatpush.bf16.msrb.mxu0 %v3212_v16  ;;  %v2904_v16 = vor.u32 %v3470_v6, %v2901_v7  ;;  %v2600_v25 = vor.u32 %v3397_v13, %v2599_v10  ;;  %v3369_v6 = vld [vmem:[%s5282_s5 + $0x98] sm:$0xf0]  ;;  %v2768_v7 = vor.u32 %v3439_v0, %v2767_v63  ;;  %v2992_v10 = vor.u32 %v3495_v3, %v2991_v2 }
 0x141   :  { %1926 = vmatpush.bf16.msra.mxu2 %v2792_v19  ;;  %v3463_v19 = vld [vmem:[%s5282_s5 + $0x38c] sm:$0xf]  ;;  %v3513_v0 = vld [vmem:[%s5282_s5 + $0x51c] sm:$0xf]  ;;  %v3276_v2 = vor.u32 %v3562_v52, %v3273_v53  ;;  %v2965_v53 = vld [vmem:[%s5282_s5 + $0x454] sm:$0xf0] }
 0x142   :  { %1939 = vmatpush.bf16.msra.mxu3 %v3016_v23  ;;  %v3460_v23 = vld [vmem:[%s5282_s5 + $0x370] sm:$0xf0]  ;;  %v2876_v32 = vor.u32 %v3463_v19, %v2873_v21  ;;  %v3131_v21 = vld [vmem:[%s5282_s5 + $0x588] sm:$0xf]  ;;  %v3485_v52 = vld [vmem:[%s5282_s5 + $0x43c] sm:$0xf] }
 0x143   :  { %1915 = vmatpush.bf16.msra.mxu1 %v2512_v27  ;;  %v3516_v27 = vld [vmem:[%s5282_s5 + $0x530] sm:$0xf0] }
 0x144   :  { %1954 = vmatpush.bf16.msrb.mxu0 %v3184_v30  ;;  %v2571_v30 = vld [vmem:[%s5282_s5 + $0x128] sm:$0xf] }
 0x145   :  { %1927 = vmatpush.bf16.msra.mxu2 %v2764_v33  ;;  %v2852_v33 = vor.u32 %v3460_v23, %v2851_v22  ;;  %v3530_v22 = vld [vmem:[%s5282_s5 + $0x5a0] sm:$0xf0]  ;;  %v2964_v23 = vor.u32 %v3488_v15, %v2963_v14  ;;  %v3049_v15 = vld [vmem:[%s5282_s5 + $0x4fc] sm:$0xf0] }
 0x146   :  { %1940 = vmatpush.bf16.msra.mxu3 %v2988_v36  ;;  %v3076_v36 = vor.u32 %v3516_v27, %v3075_v26  ;;  %v3425_v26 = vld [vmem:[%s5282_s5 + $0x258] sm:$0xf0]  ;;  %v2460_v27 = vor.u32 %v3362_v18, %v2459_v17  ;;  %v3506_v14 = vld [vmem:[%s5282_s5 + $0x4e4] sm:$0xf]  ;;  %v3380_v17 = vld [vmem:[%s5282_s5 + $0xf4] sm:$0xf] }
 0x147   :  { %1916 = vmatpush.bf16.msra.mxu1 %v2484_v39  ;;  %v2572_v39 = vor.u32 %v3390_v31, %v2571_v30  ;;  %v2431_v30 = vld [vmem:[%s5282_s5 + $0x10] sm:$0xf]  ;;  %v3132_v31 = vor.u32 %v3530_v22, %v3131_v21  ;;  %v3548_v21 = vld [vmem:[%s5282_s5 + $0x634] sm:$0xf] }
 0x148   :  { %1955 = vmatpush.bf16.msrb.mxu0 %v3156_v42  ;;  %v3244_v42 = vor.u32 %v3558_v35, %v3243_v34  ;;  %v3523_v34 = vld [vmem:[%s5282_s5 + $0x568] sm:$0xf0]  ;;  %v2545_v18 = vld [vmem:[%s5282_s5 + $0x10c] sm:$0xf0] }
 0x149   :  { %1928 = vmatpush.bf16.msra.mxu2 %v2736_v45  ;;  %v2824_v45 = vor.u32 %v3453_v38, %v2823_v37  ;;  %v2629_v37 = vld [vmem:[%s5282_s5 + $0x1b4] sm:$0xf0]  ;;  %v3569_v38 = vld [vmem:[%s5282_s5 + $0x6dc] sm:$0xf]  ;;  %v3217_v22 = vld [vmem:[%s5282_s5 + $0x64c] sm:$0xf0] }
 0x14a   :  { %1941 = vmatpush.bf16.msra.mxu3 %v2960_v48  ;;  %v3048_v48 = vor.u32 %v3509_v41, %v3047_v40  ;;  %v3301_v40 = vld [vmem:[%s5282_s5 + $0x6f4] sm:$0xf0]  ;;  %v2683_v41 = vld [vmem:[%s5282_s5 + $0x208] sm:$0xf] }
 0x14b   :  { %1917 = vmatpush.bf16.msra.mxu1 %v2456_v51  ;;  %v2544_v51 = vor.u32 %v3383_v44, %v2543_v43  ;;  %v2907_v44 = vld [vmem:[%s5282_s5 + $0x3c8] sm:$0xf]  ;;  %v3304_v49 = vor.u32 %v3569_v38, %v3301_v40  ;;  %v2769_v38 = vld [vmem:[%s5282_s5 + $0x2cc] sm:$0xf0]  ;;  %v3492_v40 = vld [vmem:[%s5282_s5 + $0x474] sm:$0xf] }
 0x14c   :  { %1956 = vmatpush.bf16.msrb.mxu0 %v3128_v55  ;;  %v2515_v55 = vld [vmem:[%s5282_s5 + $0xb8] sm:$0xf] }
 0x14d   :  { %1929 = vmatpush.bf16.msra.mxu2 %v2708_v60  ;;  %v3544_v60 = vld [vmem:[%s5282_s5 + $0x610] sm:$0xf0] }
 0x14e   :  { %1942 = vmatpush.bf16.msra.mxu3 %v2932_v1  ;;  %v2516_v1 = vor.u32 %v3376_v56, %v2515_v55  ;;  %v3188_v4 = vor.u32 %v3544_v60, %v3187_v59  ;;  %v2655_v55 = vld [vmem:[%s5282_s5 + $0x1d0] sm:$0xf]  ;;  %v3411_v56 = vld [vmem:[%s5282_s5 + $0x1e8] sm:$0xf0]  ;;  %v3457_v60 = vld [vmem:[%s5282_s5 + $0x35c] sm:$0xf] }
 0x14f   :  { %1918 = vmatpush.bf16.msra.mxu1 %v2428_v5  ;;  %v2487_v5 = vld [vmem:[%s5282_s5 + $0x80] sm:$0xf]  ;;  %v3467_v59 = vld [vmem:[%s5282_s5 + $0x3a8] sm:$0xf0]  ;;  %v2656_v3 = vor.u32 %v3411_v56, %v2655_v55  ;;  %v2461_v56 = vld [vmem:[%s5282_s5 + $0x64] sm:$0xf0] }
 0x150   :  { %1957 = vmatpush.bf16.msrb.mxu0 %v3100_v8  ;;  %v3159_v8 = vld [vmem:[%s5282_s5 + $0x5c0] sm:$0xf]  ;;  %v2488_v13 = vor.u32 %v3369_v6, %v2487_v5  ;;  %v2573_v5 = vld [vmem:[%s5282_s5 + $0x144] sm:$0xf0]  ;;  %v3359_v55 = vld [vmem:[%s5282_s5 + $0x4c] sm:$0xf] }
 0x151   :  { %1930 = vmatpush.bf16.msra.mxu2 %v2680_v12  ;;  %v3432_v12 = vld [vmem:[%s5282_s5 + $0x290] sm:$0xf0] }
 0x152   :  { %1943 = vmatpush.bf16.msra.mxu3 %v2904_v16  ;;  %1919 = vmatmul.bf16.vlgmr.msra.gmra.mxu1 %v4275_v58 }
 0x153   :  { %1963 = vmatpush.bf16.msrb.mxu1 %v2628_v9  ;;  %1958 = vmatmul.bf16.vlgmr.msrb.gmra.mxu0 %v4283_v62  ;;  %v3537_v9 = vld [vmem:[%s5282_s5 + $0x5d8] sm:$0xf0] }
 0x154   :  { %2002 = vmatpush.bf16.msra.mxu0 %v3300_v11  ;;  %v2739_v11 = vld [vmem:[%s5282_s5 + $0x278] sm:$0xf]  ;;  %v3160_v16 = vor.u32 %v3537_v9, %v3159_v8  ;;  %v3555_v8 = vld [vmem:[%s5282_s5 + $0x66c] sm:$0xf]  ;;  %v3245_v9 = vld [vmem:[%s5282_s5 + $0x684] sm:$0xf0] }
 0x155   :  { %1931 = vmatpush.bf16.msra.mxu2 %v2652_v29  ;;  %v2740_v19 = vor.u32 %v3432_v12, %v2739_v11  ;;  %v3481_v29 = vld [vmem:[%s5282_s5 + $0x418] sm:$0xf0]  ;;  %v3450_v11 = vld [vmem:[%s5282_s5 + $0x324] sm:$0xf]  ;;  %v2825_v12 = vld [vmem:[%s5282_s5 + $0x33c] sm:$0xf0] }
 0x156   :  { %1944 = vmatpush.bf16.msra.mxu3 %v2876_v32  ;;  %v3355_v32 = vld [vmem:[%s5282_s5 + $0x28] sm:$0xf0] }
 0x157   :  { %1964 = vmatpush.bf16.msrb.mxu1 %v2600_v25  ;;  %v2711_v25 = vld [vmem:[%s5282_s5 + $0x240] sm:$0xf]  ;;  %v2432_v43 = vor.u32 %v3355_v32, %v2431_v30  ;;  %v3220_v30 = vor.u32 %v3548_v21, %v3217_v22  ;;  %v2517_v32 = vld [vmem:[%s5282_s5 + $0xd4] sm:$0xf0] }
 0x158   :  { %2003 = vmatpush.bf16.msra.mxu0 %v3272_v28  ;;  %1932 = vmatmul.bf16.vlgmr.msra.gmra.mxu2 %v4317_v20  ;;  %v2935_v28 = vld [vmem:[%s5282_s5 + $0x400] sm:$0xf]  ;;  %v2712_v35 = vor.u32 %v3425_v26, %v2711_v25  ;;  %v3443_v25 = vld [vmem:[%s5282_s5 + $0x2ec] sm:$0xf]  ;;  %v2797_v26 = vld [vmem:[%s5282_s5 + $0x304] sm:$0xf0] }
 0x159   :  { %1976 = vmatpush.bf16.msrb.mxu2 %v2852_v33  ;;  %1945 = vmatmul.bf16.vlgmr.msra.gmra.mxu3 %v4325_v24  ;;  %v3103_v33 = vld [vmem:[%s5282_s5 + $0x550] sm:$0xf] }
 0x15a   :  { %1989 = vmatpush.bf16.msrb.mxu3 %v3076_v36  ;;  %v3401_v36 = vld [vmem:[%s5282_s5 + $0x19c] sm:$0xf]  ;;  %v3104_v46 = vor.u32 %v3523_v34, %v3103_v33  ;;  %v2800_v33 = vor.u32 %v3443_v25, %v2797_v26 }
 0x15b   :  { %1965 = vmatpush.bf16.msrb.mxu1 %v2572_v39  ;;  %v2936_v39 = vor.u32 %v3481_v29, %v2935_v28  ;;  %v2632_v47 = vor.u32 %v3401_v36, %v2629_v37  ;;  %v3499_v28 = vld [vmem:[%s5282_s5 + $0x4ac] sm:$0xf]  ;;  %v3021_v29 = vld [vmem:[%s5282_s5 + $0x4c4] sm:$0xf0]  ;;  %v3541_v34 = vld [vmem:[%s5282_s5 + $0x5fc] sm:$0xf] }
 0x15c   :  { %2004 = vmatpush.bf16.msra.mxu0 %v3244_v42  ;;  %v3418_v42 = vld [vmem:[%s5282_s5 + $0x220] sm:$0xf0]  ;;  %v3024_v36 = vor.u32 %v3499_v28, %v3021_v29  ;;  %v3436_v37 = vld [vmem:[%s5282_s5 + $0x2b4] sm:$0xf]  ;;  %v3279_v28 = vld [vmem:[%s5282_s5 + $0x6a8] sm:$0xf] }
 0x15d   :  { %1977 = vmatpush.bf16.msrb.mxu2 %v2824_v45  ;;  %v3474_v45 = vld [vmem:[%s5282_s5 + $0x3e0] sm:$0xf0]  ;;  %v2684_v50 = vor.u32 %v3418_v42, %v2683_v41  ;;  %v2993_v41 = vld [vmem:[%s5282_s5 + $0x48c] sm:$0xf0] }
 0x15e   :  { %1990 = vmatpush.bf16.msrb.mxu3 %v3048_v48  ;;  %v3394_v48 = vld [vmem:[%s5282_s5 + $0x164] sm:$0xf] }
 0x15f   :  { %1966 = vmatpush.bf16.msrb.mxu1 %v2544_v51  ;;  %v2601_v51 = vld [vmem:[%s5282_s5 + $0x17c] sm:$0xf0]  ;;  %v3566_v29 = vld [vmem:[%s5282_s5 + $0x6c0] sm:$0xf0] }
 0x160   :  { %2005 = vmatpush.bf16.msra.mxu0 %v3216_v54  ;;  %v2908_v54 = vor.u32 %v3474_v45, %v2907_v44  ;;  %v2604_v63 = vor.u32 %v3394_v48, %v2601_v51  ;;  %v2489_v44 = vld [vmem:[%s5282_s5 + $0x9c] sm:$0xf0]  ;;  %v2772_v45 = vor.u32 %v3436_v37, %v2769_v38  ;;  %v2996_v48 = vor.u32 %v3492_v40, %v2993_v41 }
 0x161   :  { %1978 = vmatpush.bf16.msrb.mxu2 %v2796_v57  ;;  %v2879_v57 = vld [vmem:[%s5282_s5 + $0x390] sm:$0xf]  ;;  %v3083_v38 = vld [vmem:[%s5282_s5 + $0x520] sm:$0xf]  ;;  %v3280_v40 = vor.u32 %v3566_v29, %v3279_v28 }
 0x162   :  { %1991 = vmatpush.bf16.msrb.mxu3 %v3020_v61  ;;  %v2853_v61 = vld [vmem:[%s5282_s5 + $0x374] sm:$0xf0]  ;;  %v2880_v6 = vor.u32 %v3467_v59, %v2879_v57  ;;  %v3527_v59 = vld [vmem:[%s5282_s5 + $0x58c] sm:$0xf]  ;;  %v2747_v29 = vld [vmem:[%s5282_s5 + $0x280] sm:$0xf] }
 0x163   :  { %1967 = vmatpush.bf16.msrb.mxu1 %v2516_v1  ;;  %v3077_v1 = vld [vmem:[%s5282_s5 + $0x534] sm:$0xf0] }
 0x164   :  { %2006 = vmatpush.bf16.msra.mxu0 %v3188_v4  ;;  %v3387_v4 = vld [vmem:[%s5282_s5 + $0x12c] sm:$0xf] }
 0x165   :  { %1979 = vmatpush.bf16.msrb.mxu2 %v2768_v7  ;;  %v2856_v7 = vor.u32 %v3457_v60, %v2853_v61  ;;  %v3133_v60 = vld [vmem:[%s5282_s5 + $0x5a4] sm:$0xf0]  ;;  %v2968_v61 = vor.u32 %v3485_v52, %v2965_v53  ;;  %v3510_v53 = vld [vmem:[%s5282_s5 + $0x500] sm:$0xf0] }
 0x166   :  { %1992 = vmatpush.bf16.msrb.mxu3 %v2992_v10  ;;  %v3080_v10 = vor.u32 %v3513_v0, %v3077_v1  ;;  %v2713_v0 = vld [vmem:[%s5282_s5 + $0x25c] sm:$0xf0]  ;;  %v2464_v1 = vor.u32 %v3359_v55, %v2461_v56  ;;  %v3055_v52 = vld [vmem:[%s5282_s5 + $0x4e8] sm:$0xf]  ;;  %v2551_v55 = vld [vmem:[%s5282_s5 + $0xf8] sm:$0xf] }
 0x167   :  { %1968 = vmatpush.bf16.msrb.mxu1 %v2488_v13  ;;  %v2576_v13 = vor.u32 %v3387_v4, %v2573_v5  ;;  %v3352_v4 = vld [vmem:[%s5282_s5 + $0x14] sm:$0xf]  ;;  %v3136_v5 = vor.u32 %v3527_v59, %v3133_v60  ;;  %v3223_v59 = vld [vmem:[%s5282_s5 + $0x638] sm:$0xf] }
 0x168   :  { %2007 = vmatpush.bf16.msra.mxu0 %v3160_v16  ;;  %v3248_v16 = vor.u32 %v3555_v8, %v3245_v9  ;;  %v3105_v8 = vld [vmem:[%s5282_s5 + $0x56c] sm:$0xf0]  ;;  %v3384_v56 = vld [vmem:[%s5282_s5 + $0x110] sm:$0xf0] }
 0x169   :  { %1980 = vmatpush.bf16.msrb.mxu2 %v2740_v19  ;;  %v2828_v19 = vor.u32 %v3450_v11, %v2825_v12  ;;  %v3405_v11 = vld [vmem:[%s5282_s5 + $0x1b8] sm:$0xf0]  ;;  %v3307_v12 = vld [vmem:[%s5282_s5 + $0x6e0] sm:$0xf]  ;;  %v3552_v60 = vld [vmem:[%s5282_s5 + $0x650] sm:$0xf0] }
 0x16a   :  { %1993 = vmatpush.bf16.msrb.mxu3 %v2964_v23  ;;  %v3052_v23 = vor.u32 %v3506_v14, %v3049_v15  ;;  %v3573_v14 = vld [vmem:[%s5282_s5 + $0x6f8] sm:$0xf0]  ;;  %v3415_v15 = vld [vmem:[%s5282_s5 + $0x20c] sm:$0xf] }
 0x16b   :  { %1969 = vmatpush.bf16.msrb.mxu1 %v2460_v27  ;;  %v2548_v27 = vor.u32 %v3380_v17, %v2545_v18  ;;  %v3471_v18 = vld [vmem:[%s5282_s5 + $0x3cc] sm:$0xf]  ;;  %v3308_v25 = vor.u32 %v3573_v14, %v3307_v12  ;;  %v3440_v14 = vld [vmem:[%s5282_s5 + $0x2d0] sm:$0xf0] }
 0x16c   :  { %2008 = vmatpush.bf16.msra.mxu0 %v3132_v31  ;;  %v3373_v31 = vld [vmem:[%s5282_s5 + $0xbc] sm:$0xf] }
 0x16d   :  { %1981 = vmatpush.bf16.msrb.mxu2 %v2712_v35  ;;  %v3189_v35 = vld [vmem:[%s5282_s5 + $0x614] sm:$0xf0] }
 0x16e   :  { %1994 = vmatpush.bf16.msrb.mxu3 %v2936_v39  ;;  %v2520_v39 = vor.u32 %v3373_v31, %v2517_v32  ;;  %v3192_v42 = vor.u32 %v3541_v34, %v3189_v35  ;;  %v3408_v31 = vld [vmem:[%s5282_s5 + $0x1d4] sm:$0xf]  ;;  %v2657_v32 = vld [vmem:[%s5282_s5 + $0x1ec] sm:$0xf0]  ;;  %v2859_v35 = vld [vmem:[%s5282_s5 + $0x360] sm:$0xf] }
 0x16f   :  { %1970 = vmatpush.bf16.msrb.mxu1 %v2432_v43  ;;  %v3366_v43 = vld [vmem:[%s5282_s5 + $0x84] sm:$0xf]  ;;  %v2881_v34 = vld [vmem:[%s5282_s5 + $0x3ac] sm:$0xf0]  ;;  %v2660_v41 = vor.u32 %v3408_v31, %v2657_v32 }
 0x170   :  { %2009 = vmatpush.bf16.msra.mxu0 %v3104_v46  ;;  %v3534_v46 = vld [vmem:[%s5282_s5 + $0x5c4] sm:$0xf]  ;;  %v2492_v51 = vor.u32 %v3366_v43, %v2489_v44  ;;  %v3391_v43 = vld [vmem:[%s5282_s5 + $0x148] sm:$0xf0] }
 0x171   :  { %1982 = vmatpush.bf16.msrb.mxu2 %v2684_v50  ;;  %v2741_v50 = vld [vmem:[%s5282_s5 + $0x294] sm:$0xf0] }
 0x172   :  { %1995 = vmatpush.bf16.msrb.mxu3 %v2908_v54  ;;  %1971 = vmatmul.bf16.vlgmr.msrb.gmra.mxu1 %v4275_v58 }
 0x173   :  { %2015 = vmatpush.bf16.msra.mxu1 %v2632_v47  ;;  %2010 = vmatmul.bf16.vlgmr.msra.gmra.mxu0 %v4283_v62  ;;  %v3161_v47 = vld [vmem:[%s5282_s5 + $0x5dc] sm:$0xf0] }
 0x174   :  { %2054 = vmatpush.bf16.msrb.mxu0 %v3304_v49  ;;  %v3429_v49 = vld [vmem:[%s5282_s5 + $0x27c] sm:$0xf]  ;;  %v3164_v54 = vor.u32 %v3534_v46, %v3161_v47  ;;  %v3251_v46 = vld [vmem:[%s5282_s5 + $0x670] sm:$0xf]  ;;  %v3559_v47 = vld [vmem:[%s5282_s5 + $0x688] sm:$0xf0] }
 0x175   :  { %1983 = vmatpush.bf16.msrb.mxu2 %v2656_v3  ;;  %v2744_v57 = vor.u32 %v3429_v49, %v2741_v50  ;;  %v2937_v3 = vld [vmem:[%s5282_s5 + $0x41c] sm:$0xf0]  ;;  %v2831_v49 = vld [vmem:[%s5282_s5 + $0x328] sm:$0xf]  ;;  %v3454_v50 = vld [vmem:[%s5282_s5 + $0x340] sm:$0xf0] }
 0x176   :  { %1996 = vmatpush.bf16.msrb.mxu3 %v2880_v6  ;;  %v2433_v6 = vld [vmem:[%s5282_s5 + $0x2c] sm:$0xf0] }
 0x177   :  { %2016 = vmatpush.bf16.msra.mxu1 %v2604_v63  ;;  %v3422_v63 = vld [vmem:[%s5282_s5 + $0x244] sm:$0xf]  ;;  %v2436_v17 = vor.u32 %v3352_v4, %v2433_v6  ;;  %v3503_v4 = vld [vmem:[%s5282_s5 + $0x4c8] sm:$0xf0]  ;;  %v3224_v6 = vor.u32 %v3552_v60, %v3223_v59 }
 0x178   :  { %2055 = vmatpush.bf16.msrb.mxu0 %v3276_v2  ;;  %1984 = vmatmul.bf16.vlgmr.msrb.gmra.mxu2 %v4317_v20  ;;  %v3478_v2 = vld [vmem:[%s5282_s5 + $0x404] sm:$0xf]  ;;  %v2716_v9 = vor.u32 %v3422_v63, %v2713_v0  ;;  %v2803_v63 = vld [vmem:[%s5282_s5 + $0x2f0] sm:$0xf]  ;;  %v3447_v0 = vld [vmem:[%s5282_s5 + $0x308] sm:$0xf0] }
 0x179   :  { %2028 = vmatpush.bf16.msra.mxu2 %v2856_v7  ;;  %1997 = vmatmul.bf16.vlgmr.msrb.gmra.mxu3 %v4325_v24  ;;  %v3520_v7 = vld [vmem:[%s5282_s5 + $0x554] sm:$0xf] }
 0x17a   :  { %2041 = vmatpush.bf16.msra.mxu3 %v3080_v10  ;;  %v2635_v10 = vld [vmem:[%s5282_s5 + $0x1a0] sm:$0xf]  ;;  %v3108_v21 = vor.u32 %v3520_v7, %v3105_v8  ;;  %v3377_v8 = vld [vmem:[%s5282_s5 + $0xd8] sm:$0xf0] }
 0x17b   :  { %2017 = vmatpush.bf16.msra.mxu1 %v2576_v13  ;;  %v2940_v13 = vor.u32 %v3478_v2, %v2937_v3  ;;  %v2636_v22 = vor.u32 %v3405_v11, %v2635_v10  ;;  %v2552_v2 = vor.u32 %v3384_v56, %v2551_v55  ;;  %v3027_v3 = vld [vmem:[%s5282_s5 + $0x4b0] sm:$0xf]  ;;  %v2523_v7 = vld [vmem:[%s5282_s5 + $0xc0] sm:$0xf]  ;;  %v3545_v11 = vld [vmem:[%s5282_s5 + $0x618] sm:$0xf0] }
 0x17c   :  { %2056 = vmatpush.bf16.msrb.mxu0 %v3248_v16  ;;  %v2685_v16 = vld [vmem:[%s5282_s5 + $0x224] sm:$0xf0]  ;;  %v3195_v10 = vld [vmem:[%s5282_s5 + $0x600] sm:$0xf]  ;;  %v3028_v12 = vor.u32 %v3503_v4, %v3027_v3  ;;  %v3111_v56 = vld [vmem:[%s5282_s5 + $0x558] sm:$0xf] }
 0x17d   :  { %2029 = vmatpush.bf16.msra.mxu2 %v2828_v19  ;;  %v2909_v19 = vld [vmem:[%s5282_s5 + $0x3e4] sm:$0xf0]  ;;  %v2688_v26 = vor.u32 %v3415_v15, %v2685_v16  ;;  %v5170_v15 = vld [vmem:[%s5283_s6] sm:$0x7f]  ;;  %v2524_v16 = vor.u32 %v3377_v8, %v2523_v7  ;;  %v3475_v3 = vld [vmem:[%s5282_s5 + $0x3e8] sm:$0xf0] }
 0x17e   :  { %2042 = vmatpush.bf16.msra.mxu3 %v3052_v23  ;;  %v2607_v23 = vld [vmem:[%s5282_s5 + $0x168] sm:$0xf] }
 0x17f   :  { %2018 = vmatpush.bf16.msra.mxu1 %v2548_v27  ;;  %v3398_v27 = vld [vmem:[%s5282_s5 + $0x180] sm:$0xf0] }
 0x180   :  { %2057 = vmatpush.bf16.msrb.mxu0 %v3220_v30  ;;  %v2912_v30 = vor.u32 %v3471_v18, %v2909_v19  ;;  %v2608_v37 = vor.u32 %v3398_v27, %v2607_v23  ;;  %v3496_v18 = vld [vmem:[%s5282_s5 + $0x490] sm:$0xf0]  ;;  %v3196_v19 = vor.u32 %v3545_v11, %v3195_v10  ;;  %v589_v27 = vperm.slane %v5170_v15, 0  ;;  %v2663_v11 = vld [vmem:[%s5282_s5 + $0x1d8] sm:$0xf] }
 0x181   :  { %2030 = vmatpush.bf16.msra.mxu2 %v2800_v33  ;;  %v3464_v33 = vld [vmem:[%s5282_s5 + $0x394] sm:$0xf] }
 0x182   :  { %2043 = vmatpush.bf16.msra.mxu3 %v3024_v36  ;;  %v3461_v36 = vld [vmem:[%s5282_s5 + $0x378] sm:$0xf0]  ;;  %v2884_v44 = vor.u32 %v3464_v33, %v2881_v34  ;;  %v2971_v33 = vld [vmem:[%s5282_s5 + $0x440] sm:$0xf] }
 0x183   :  { %2019 = vmatpush.bf16.msra.mxu1 %v2520_v39  ;;  %v3517_v39 = vld [vmem:[%s5282_s5 + $0x538] sm:$0xf0] }
 0x184   :  { %2058 = vmatpush.bf16.msrb.mxu0 %v3192_v42  ;;  %v2579_v42 = vld [vmem:[%s5282_s5 + $0x130] sm:$0xf]  ;;  %v3489_v34 = vld [vmem:[%s5282_s5 + $0x458] sm:$0xf0] }
 0x185   :  { %2031 = vmatpush.bf16.msra.mxu2 %v2772_v45  ;;  %v2860_v45 = vor.u32 %v3461_v36, %v2859_v35 }
 0x186   :  { %2044 = vmatpush.bf16.msra.mxu3 %v2996_v48  ;;  %v3084_v48 = vor.u32 %v3517_v39, %v3083_v38  ;;  %v3363_v38 = vld [vmem:[%s5282_s5 + $0x68] sm:$0xf0] }
 0x187   :  { %2020 = vmatpush.bf16.msra.mxu1 %v2492_v51  ;;  %v2580_v51 = vor.u32 %v3391_v43, %v2579_v42  ;;  %v2972_v43 = vor.u32 %v3489_v34, %v2971_v33 }
 0x188   :  { %2059 = vmatpush.bf16.msrb.mxu0 %v3164_v54  ;;  %v3252_v54 = vor.u32 %v3559_v47, %v3251_v46 }
 0x189   :  { %2032 = vmatpush.bf16.msra.mxu2 %v2744_v57  ;;  %v2832_v57 = vor.u32 %v3454_v50, %v2831_v49  ;;  %v3482_v49 = vld [vmem:[%s5282_s5 + $0x420] sm:$0xf0] }
 0x18a   :  { %2045 = vmatpush.bf16.msra.mxu3 %v2968_v61  ;;  %v3056_v61 = vor.u32 %v3510_v53, %v3055_v52  ;;  %v2439_v53 = vld [vmem:[%s5282_s5 + $0x18] sm:$0xf] }
 0x18b   :  { %2021 = vmatpush.bf16.msra.mxu1 %v2464_v1 }
 0x18c   :  { %2060 = vmatpush.bf16.msrb.mxu0 %v3136_v5 }
 0x18d   :  { %2033 = vmatpush.bf16.msra.mxu2 %v2716_v9  ;;  %v2804_v9 = vor.u32 %v3447_v0, %v2803_v63  ;;  %v3419_v63 = vld [vmem:[%s5282_s5 + $0x228] sm:$0xf0] }
 0x18e   :  { %2046 = vmatpush.bf16.msra.mxu3 %v2940_v13  ;;  %v2775_v13 = vld [vmem:[%s5282_s5 + $0x2b8] sm:$0xf] }
 0x18f   :  { %2022 = vmatpush.bf16.msra.mxu1 %v2436_v17  ;;  %v1764_v1 = vpop.f32.mrf.mxu1  ;;  %v2999_v17 = vld [vmem:[%s5282_s5 + $0x478] sm:$0xf]  ;;  %v2776_v23 = vor.u32 %v3440_v14, %v2775_v13  ;;  %v3468_v14 = vld [vmem:[%s5282_s5 + $0x3b0] sm:$0xf0] }
 0x190   :  { %2061 = vmatpush.bf16.msrb.mxu0 %v3108_v21  ;;  %v5147_v5 = vpop.f32.mrf.mxu0  ;;  %v2495_v21 = vld [vmem:[%s5282_s5 + $0x88] sm:$0xf]  ;;  %v3000_v28 = vor.u32 %v3496_v18, %v2999_v17  ;;  %v1765_v42 = vadd.f32 %v1764_v1, %v589_v27  ;;  %v590_v18 = vperm.slane %v5170_v15, 1 }
 0x191   :  { %2034 = vmatpush.bf16.msra.mxu2 %v2688_v26  ;;  %v3538_v26 = vld [vmem:[%s5282_s5 + $0x5e0] sm:$0xf0] }
 0x192   :  { %2047 = vmatpush.bf16.msra.mxu3 %v2912_v30  ;;  %2023 = vmatmul.bf16.vlgmr.msra.gmra.mxu1 %v4275_v58  ;;  %v3433_v30 = vld [vmem:[%s5282_s5 + $0x298] sm:$0xf0] }
 0x193   :  { %2067 = vmatpush.bf16.msrb.mxu1 %v2636_v22  ;;  %2062 = vmatmul.bf16.vlgmr.msrb.gmra.mxu0 %v4283_v62  ;;  %v3370_v22 = vld [vmem:[%s5282_s5 + $0xa0] sm:$0xf0]  ;;  %v2748_v39 = vor.u32 %v3433_v30, %v2747_v29 }
 0x194   :  { %2106 = vmatpush.bf16.msra.mxu0 %v3308_v25  ;;  %v3167_v25 = vld [vmem:[%s5282_s5 + $0x5c8] sm:$0xf]  ;;  %v2496_v32 = vor.u32 %v3370_v22, %v2495_v21 }
 0x195   :  { %2035 = vmatpush.bf16.msra.mxu2 %v2660_v41  ;;  %v3168_v36 = vor.u32 %v3538_v26, %v3167_v25  ;;  %v3531_v41 = vld [vmem:[%s5282_s5 + $0x5a8] sm:$0xf0] }
 0x196   :  { %2048 = vmatpush.bf16.msra.mxu3 %v2884_v44  ;;  %v2719_v44 = vld [vmem:[%s5282_s5 + $0x248] sm:$0xf] }
 0x197   :  { %2068 = vmatpush.bf16.msrb.mxu1 %v2608_v37  ;;  %v1766_v31 = vpop.f32.mrf.mxu1  ;;  %v2467_v37 = vld [vmem:[%s5282_s5 + $0x50] sm:$0xf] }
 0x198   :  { %2107 = vmatpush.bf16.msra.mxu0 %v3280_v40  ;;  %2036 = vmatmul.bf16.vlgmr.msra.gmra.mxu2 %v4317_v20  ;;  %v1805_v35 = vpop.f32.mrf.mxu0  ;;  %v3139_v40 = vld [vmem:[%s5282_s5 + $0x590] sm:$0xf]  ;;  %v2468_v47 = vor.u32 %v3363_v38, %v2467_v37  ;;  %v591_v38 = vperm.slane %v5170_v15, 2 }
 0x199   :  { %2080 = vmatpush.bf16.msrb.mxu2 %v2860_v45  ;;  %2049 = vmatmul.bf16.vlgmr.msra.gmra.mxu3 %v4325_v24  ;;  %v3426_v45 = vld [vmem:[%s5282_s5 + $0x260] sm:$0xf0]  ;;  %v3140_v52 = vor.u32 %v3531_v41, %v3139_v40 }
 0x19a   :  { %2093 = vmatpush.bf16.msrb.mxu3 %v3084_v48  ;;  %v2943_v48 = vld [vmem:[%s5282_s5 + $0x408] sm:$0xf]  ;;  %v2720_v55 = vor.u32 %v3426_v45, %v2719_v44 }
 0x19b   :  { %2069 = vmatpush.bf16.msrb.mxu1 %v2580_v51  ;;  %v1777_v46 = vpop.f32.mrf.mxu2  ;;  %v2944_v60 = vor.u32 %v3482_v49, %v2943_v48 }
 0x19c   :  { %2108 = vmatpush.bf16.msra.mxu0 %v3252_v54  ;;  %v1778_v50 = vadd.f32 %v1777_v46, %v1765_v42  ;;  %v1790_v51 = vpop.f32.mrf.mxu3  ;;  %v3356_v54 = vld [vmem:[%s5282_s5 + $0x30] sm:$0xf0] }
 0x19d   :  { %2081 = vmatpush.bf16.msrb.mxu2 %v2832_v57  ;;  %v3524_v57 = vld [vmem:[%s5282_s5 + $0x570] sm:$0xf0]  ;;  %v2440_v1 = vor.u32 %v3356_v54, %v2439_v53 }
 0x19e   :  { %2094 = vmatpush.bf16.msrb.mxu3 %v3056_v61  ;;  %v1791_v59 = vadd.f32 %v1790_v51, %v1778_v50  ;;  %v2691_v61 = vld [vmem:[%s5282_s5 + $0x210] sm:$0xf]  ;;  %v3112_v7 = vor.u32 %v3524_v57, %v3111_v56 }
 0x19f   :  { %2070 = vmatpush.bf16.msrb.mxu1 %v2552_v2  ;;  %v1816_v0 = vpop.f32.mrf.mxu1  ;;  %v2915_v2 = vld [vmem:[%s5282_s5 + $0x3d0] sm:$0xf]  ;;  %v2692_v8 = vor.u32 %v3419_v63, %v2691_v61 }
 0x1a0   :  { %2109 = vmatpush.bf16.msra.mxu0 %v3224_v6  ;;  %v1804_v4 = vadd.f32 %v5147_v5, %v1791_v59  ;;  %v1855_v6 = vpop.f32.mrf.mxu0  ;;  %v2916_v10 = vor.u32 %v3475_v3, %v2915_v2  ;;  %v2887_v5 = vld [vmem:[%s5282_s5 + $0x398] sm:$0xf]  ;;  %v1817_v25 = vadd.f32 %v1816_v0, %v590_v18 }
 0x1a1   :  { %2082 = vmatpush.bf16.msrb.mxu2 %v2804_v9 }
 0x1a2   :  { %2095 = vmatpush.bf16.msrb.mxu3 %v3028_v12  ;;  %v3309_v9 = vmul.f32 -1.442695, %v1804_v4  ;;  %v3412_v12 = vld [vmem:[%s5282_s5 + $0x1f0] sm:$0xf0]  ;;  %s3630_s5 = smov [#allocation2]  }
 0x1a3   :  { %2071 = vmatpush.bf16.msrb.mxu1 %v2524_v16  ;;  %v1779_v13 = vpop.f32.mrf.mxu2  ;;  %v2664_v17 = vor.u32 %v3412_v12, %v2663_v11  ;;  %v592_v11 = vperm.slane %v5170_v15, 3  ;;  %s2265_s23 = sshll.u32 %s3630_s5, 4  ;;  %s2266_s23 = int_to_ptr.vmem [resolvable:$true] %s2265_s23 }
 0x1a4   :  { %2110 = vmatpush.bf16.msra.mxu0 %v3196_v19  ;;  %3576 = vpow2.f32 %v3309_v9  ;;  %v1792_v16 = vpop.f32.mrf.mxu3  ;;  %v2888_v19 = vor.u32 %v3468_v14, %v2887_v5 }
 0x1a5   :  { %2083 = vmatpush.bf16.msrb.mxu2 %v2776_v23 }
 0x1a6   :  { %2096 = vmatpush.bf16.msrb.mxu3 %v3000_v28 }
 0x1a7   :  { %2072 = vmatpush.bf16.msrb.mxu1 %v2496_v32  ;;  %v1818_v21 = vpop.f32.mrf.mxu1 }
 0x1a8   :  { %2111 = vmatpush.bf16.msra.mxu0 %v3168_v36  ;;  %v1857_v22 = vpop.f32.mrf.mxu0 }
 0x1a9   :  { %2084 = vmatpush.bf16.msrb.mxu2 %v2748_v39 }
 0x1aa   :  { %2097 = vmatpush.bf16.msrb.mxu3 %v2972_v43  ;;  %v3577_v23 = vpop.eup %3576 }
 0x1ab   :  { %2073 = vmatpush.bf16.msrb.mxu1 %v2468_v47  ;;  %v2140_v26 = vadd.f32 1.0, %v3577_v23  ;;  %v1829_v27 = vpop.f32.mrf.mxu2 }
 0x1ac   :  { %2112 = vmatpush.bf16.msra.mxu0 %v3140_v52  ;;  %v1830_v28 = vadd.f32 %v1829_v27, %v1817_v25  ;;  %v1842_v29 = vpop.f32.mrf.mxu3 }
 0x1ad   :  { %2085 = vmatpush.bf16.msrb.mxu2 %v2720_v55  ;;  %3578 = vrcp.f32 %v2140_v26  ;;  %v2158_v39 = vand.u32 2147483648, %v2140_v26  ;;  %vm2152_vm2 = vweird.f32 %v2140_v26 }
 0x1ae   :  { %2098 = vmatpush.bf16.msrb.mxu3 %v2944_v60  ;;  %v1843_v30 = vadd.f32 %v1842_v29, %v1830_v28 }
 0x1af   :  { %2074 = vmatpush.bf16.msrb.mxu1 %v2440_v1  ;;  %v2159_v45 = vor.u32 1.1754944e-38, %v2158_v39 }
 0x1b0   :  { %2113 = vmatpush.bf16.msra.mxu0 %v3112_v7  ;;  %v1856_v31 = vadd.f32 %v1855_v6, %v1843_v30  ;;  %v1907_v32 = vpop.f32.mrf.mxu0 }
 0x1b1   :  { %2086 = vmatpush.bf16.msrb.mxu2 %v2692_v8 }
 0x1b2   :  { %2099 = vmatpush.bf16.msrb.mxu3 %v2916_v10  ;;  %2075 = vmatmul.bf16.vlgmr.msrb.gmra.mxu1 %v4275_v58  ;;  %v1868_v58 = vpop.f32.mrf.mxu1 }
 0x1b3   :  { %2114 = vmatmul.bf16.vlgmr.msra.gmra.mxu0 %v4283_v62  ;;  %v3310_v62 = vmul.f32 -1.442695, %v1856_v31  ;;  %v3579_v33 = vpop.eup %3578  ;;  %v1831_v34 = vpop.f32.mrf.mxu2  ;;  %v1869_v44 = vadd.f32 %v1868_v58, %v591_v38 }
 0x1b4   :  { %v2148_v35 = vmul.f32 %v3579_v33, %v2140_v26  ;;  %v1844_v36 = vpop.f32.mrf.mxu3  ;;  %vm2153_vm1 = vweird.f32 %v3579_v33 }
 0x1b5   :  { %2087 = vmatpush.bf16.msrb.mxu2 %v2664_v17  ;;  %3580 = vpow2.f32 %v3310_v62  ;;  %vm2154_vm3 = vmor %vm2152_vm2, %vm2153_vm1 }
 0x1b6   :  { %2100 = vmatpush.bf16.msrb.mxu3 %v2888_v19  ;;  %v2149_v37 = vsub.f32 1.0, %v2148_v35 }
 0x1b8   :  { %2088 = vmatmul.bf16.vlgmr.msrb.gmra.mxu2 %v4317_v20  ;;  %v2150_v41 = vmul.f32 %v3579_v33, %v2149_v37  ;;  %v2156_v20 = vand.u32 2147483647, %v2140_v26  ;;  %v1909_v42 = vpop.f32.mrf.mxu0  ;;  %v593_v37 = vperm.slane %v5170_v15, 4 }
 0x1b9   :  { %2101 = vmatmul.bf16.vlgmr.msrb.gmra.mxu3 %v4325_v24 }
 0x1ba   :  { %v1870_v40 = vpop.f32.mrf.mxu1  ;;  %v2151_v43 = vadd.f32 %v3579_v33, %v2150_v41  ;;  %vm2157_vm4 = vcmp.eq.f32.partialorder %v2156_v20, 8.507059e+37 }
 0x1bb   :  { %v3581_v24 = vpop.eup %3580  ;;  %v1881_v47 = vpop.f32.mrf.mxu2 }
 0x1bc   :  { %v2141_v46 = vadd.f32 1.0, %v3581_v24  ;;  %v2155_v48 = vsel %vm2154_vm3, %v3579_v33, %v2151_v43  ;;  %v1882_v49 = vadd.f32 %v1881_v47, %v1869_v44  ;;  %v1894_v50 = vpop.f32.mrf.mxu3 }
 0x1bd   :  { %v2160_v51 = vsel %vm2157_vm4, %v2159_v45, %v2155_v48 }
 0x1be   :  { %3582 = vrcp.f32 %v2141_v46  ;;  %2252 = vst [vmem:[#allocation2] sm:$0xff] %v2160_v51  ;;  %v1895_v52 = vadd.f32 %v1894_v50, %v1882_v49  ;;  %v2173_v61 = vand.u32 2147483648, %v2141_v46  ;;  %v2171_v0 = vand.u32 2147483647, %v2141_v46 }
 0x1bf   :  { %vm2167_vm6 = vweird.f32 %v2141_v46 }
 0x1c0   :  { %v1908_v53 = vadd.f32 %v1907_v32, %v1895_v52  ;;  %v2174_v3 = vor.u32 1.1754944e-38, %v2173_v61  ;;  %vm2172_vm8 = vcmp.eq.f32.partialorder %v2171_v0, 8.507059e+37 }
 0x1c2   :  { %v3311_v54 = vmul.f32 -1.442695, %v1908_v53 }
 0x1c3   :  { %v1883_v56 = vpop.f32.mrf.mxu2 }
 0x1c4   :  { %v3583_v55 = vpop.eup %3582  ;;  %3584 = vpow2.f32 %v3311_v54  ;;  %v1896_v59 = vpop.f32.mrf.mxu3 }
 0x1c5   :  { %v2163_v57 = vmul.f32 %v3583_v55, %v2141_v46  ;;  %vm2168_vm5 = vweird.f32 %v3583_v55 }
 0x1c6   :  { %vm2169_vm7 = vmor %vm2167_vm6, %vm2168_vm5 }
 0x1c7   :  { %v2164_v60 = vsub.f32 1.0, %v2163_v57 }
 0x1c9   :  { %v2165_v63 = vmul.f32 %v3583_v55, %v2164_v60 }
 0x1ca   :  { %v3585_v1 = vpop.eup %3584 }
 0x1cb   :  { %v2166_v2 = vadd.f32 %v3583_v55, %v2165_v63  ;;  %v2142_v4 = vadd.f32 1.0, %v3585_v1  ;;  %v594_v63 = vperm.slane %v5170_v15, 5 }
 0x1cd   :  { %v2170_v6 = vsel %vm2169_vm7, %v3583_v55, %v2166_v2  ;;  %3586 = vrcp.f32 %v2142_v4  ;;  %v2188_v16 = vand.u32 2147483648, %v2142_v4  ;;  %v2186_v19 = vand.u32 2147483647, %v2142_v4 }
 0x1ce   :  { %v2175_v8 = vsel %vm2172_vm8, %v2174_v3, %v2170_v6  ;;  %vm2182_vm10 = vweird.f32 %v2142_v4 }
 0x1cf   :  { %v1920_v7 = vpop.f32.mrf.mxu1  ;;  %2253 = vst [vmem:[#allocation2 + $0x8] sm:$0xff] %v2175_v8  ;;  %v2189_v26 = vor.u32 1.1754944e-38, %v2188_v16  ;;  %vm2187_vm12 = vcmp.eq.f32.partialorder %v2186_v19, 8.507059e+37 }
 0x1d0   :  { %v1959_v9 = vpop.f32.mrf.mxu0  ;;  %v1921_v17 = vadd.f32 %v1920_v7, %v592_v11 }
 0x1d3   :  { %v3587_v10 = vpop.eup %3586 }
 0x1d4   :  { %v2178_v12 = vmul.f32 %v3587_v10, %v2142_v4  ;;  %vm2183_vm9 = vweird.f32 %v3587_v10 }
 0x1d5   :  { %vm2184_vm11 = vmor %vm2182_vm10, %vm2183_vm9 }
 0x1d6   :  { %v2179_v14 = vsub.f32 1.0, %v2178_v12 }
 0x1d7   :  { %v1922_v13 = vpop.f32.mrf.mxu1 }
 0x1d8   :  { %v1961_v5 = vpop.f32.mrf.mxu0  ;;  %v2180_v18 = vmul.f32 %v3587_v10, %v2179_v14 }
 0x1da   :  { %v2181_v25 = vadd.f32 %v3587_v10, %v2180_v18 }
 0x1db   :  { %v1933_v21 = vpop.f32.mrf.mxu2 }
 0x1dc   :  { %v1934_v22 = vadd.f32 %v1933_v21, %v1921_v17  ;;  %v1946_v23 = vpop.f32.mrf.mxu3  ;;  %v2185_v28 = vsel %vm2184_vm11, %v3587_v10, %v2181_v25 }
 0x1dd   :  { %v2190_v29 = vsel %vm2187_vm12, %v2189_v26, %v2185_v28  ;;  %v595_v28 = vperm.slane %v5170_v15, 6  ;;  %vm2258_vm12 = vcmask 130048  }
 0x1de   :  { %v1947_v27 = vadd.f32 %v1946_v23, %v1934_v22  ;;  %2254 = vst [vmem:[#allocation2 + $0x10] sm:$0xff] %v2190_v29 }
 0x1e0   :  { %v1960_v30 = vadd.f32 %v1959_v9, %v1947_v27 }
 0x1e2   :  { %v3312_v58 = vmul.f32 -1.442695, %v1960_v30 }
 0x1e3   :  { %v1935_v31 = vpop.f32.mrf.mxu2 }
 0x1e4   :  { %3588 = vpow2.f32 %v3312_v58  ;;  %v1948_v32 = vpop.f32.mrf.mxu3 }
 0x1ea   :  { %v3589_v62 = vpop.eup %3588 }
 0x1eb   :  { %v2143_v33 = vadd.f32 1.0, %v3589_v62 }
 0x1ed   :  { %3590 = vrcp.f32 %v2143_v33  ;;  %v2203_v20 = vand.u32 2147483648, %v2143_v33  ;;  %v2201_v43 = vand.u32 2147483647, %v2143_v33  ;;  %vm2197_vm14 = vweird.f32 %v2143_v33 }
 0x1ef   :  { %v1972_v34 = vpop.f32.mrf.mxu1  ;;  %v2204_v48 = vor.u32 1.1754944e-38, %v2203_v20  ;;  %vm2202_vm0 = vcmp.eq.f32.partialorder %v2201_v43, 8.507059e+37 }
 0x1f0   :  { %v2011_v35 = vpop.f32.mrf.mxu0  ;;  %v1973_v42 = vadd.f32 %v1972_v34, %v593_v37 }
 0x1f3   :  { %v3591_v36 = vpop.eup %3590 }
 0x1f4   :  { %v2193_v38 = vmul.f32 %v3591_v36, %v2143_v33  ;;  %vm2198_vm13 = vweird.f32 %v3591_v36 }
 0x1f5   :  { %vm2199_vm15 = vmor %vm2197_vm14, %vm2198_vm13 }
 0x1f6   :  { %v2194_v41 = vsub.f32 1.0, %v2193_v38 }
 0x1f7   :  { %v1974_v39 = vpop.f32.mrf.mxu1 }
 0x1f8   :  { %v2013_v40 = vpop.f32.mrf.mxu0  ;;  %v2195_v24 = vmul.f32 %v3591_v36, %v2194_v41 }
 0x1fa   :  { %v2196_v47 = vadd.f32 %v3591_v36, %v2195_v24 }
 0x1fb   :  { %v1985_v44 = vpop.f32.mrf.mxu2 }
 0x1fc   :  { %v1986_v45 = vadd.f32 %v1985_v44, %v1973_v42  ;;  %v1998_v46 = vpop.f32.mrf.mxu3  ;;  %v2200_v50 = vsel %vm2199_vm15, %v3591_v36, %v2196_v47 }
 0x1fd   :  { %v2205_v51 = vsel %vm2202_vm0, %v2204_v48, %v2200_v50 }
 0x1fe   :  { %v1999_v49 = vadd.f32 %v1998_v46, %v1986_v45  ;;  %2255 = vst [vmem:[#allocation2 + $0x18] sm:$0xff] %v2205_v51 }
 0x200   :  { %v2012_v52 = vadd.f32 %v2011_v35, %v1999_v49 }
 0x202   :  { %v3313_v53 = vmul.f32 -1.442695, %v2012_v52 }
 0x203   :  { %v1987_v54 = vpop.f32.mrf.mxu2 }
 0x204   :  { %3592 = vpow2.f32 %v3313_v53  ;;  %v2000_v55 = vpop.f32.mrf.mxu3 }
 0x20a   :  { %v3593_v56 = vpop.eup %3592 }
 0x20b   :  { %v2144_v57 = vadd.f32 1.0, %v3593_v56 }
 0x20d   :  { %3594 = vrcp.f32 %v2144_v57  ;;  %v2218_v4 = vand.u32 2147483648, %v2144_v57  ;;  %v2216_v8 = vand.u32 2147483647, %v2144_v57  ;;  %vm2212_vm2 = vweird.f32 %v2144_v57 }
 0x20f   :  { %v2024_v59 = vpop.f32.mrf.mxu1  ;;  %v2219_v13 = vor.u32 1.1754944e-38, %v2218_v4  ;;  %vm2217_vm4 = vcmp.eq.f32.partialorder %v2216_v8, 8.507059e+37 }
 0x210   :  { %v2063_v60 = vpop.f32.mrf.mxu0  ;;  %v2025_v6 = vadd.f32 %v2024_v59, %v594_v63 }
 0x213   :  { %v3595_v61 = vpop.eup %3594 }
 0x214   :  { %v2208_v0 = vmul.f32 %v3595_v61, %v2144_v57  ;;  %vm2213_vm1 = vweird.f32 %v3595_v61 }
 0x215   :  { %vm2214_vm3 = vmor %vm2212_vm2, %vm2213_vm1 }
 0x216   :  { %v2209_v3 = vsub.f32 1.0, %v2208_v0 }
 0x217   :  { %v2026_v1 = vpop.f32.mrf.mxu1 }
 0x218   :  { %v2065_v2 = vpop.f32.mrf.mxu0  ;;  %v2210_v7 = vmul.f32 %v3595_v61, %v2209_v3 }
 0x21a   :  { %v2211_v12 = vadd.f32 %v3595_v61, %v2210_v7 }
 0x21b   :  { %v2037_v9 = vpop.f32.mrf.mxu2 }
 0x21c   :  { %v2038_v10 = vadd.f32 %v2037_v9, %v2025_v6  ;;  %v2050_v11 = vpop.f32.mrf.mxu3  ;;  %v2215_v14 = vsel %vm2214_vm3, %v3595_v61, %v2211_v12 }
 0x21d   :  { %v2220_v16 = vsel %vm2217_vm4, %v2219_v13, %v2215_v14 }
 0x21e   :  { %v2051_v5 = vadd.f32 %v2050_v11, %v2038_v10  ;;  %2256 = vst [vmem:[#allocation2 + $0x20] sm:$0xff] %v2220_v16 }
 0x220   :  { %v2064_v17 = vadd.f32 %v2063_v60, %v2051_v5 }
 0x222   :  { %v3314_v18 = vmul.f32 -1.442695, %v2064_v17 }
 0x223   :  { %v2039_v19 = vpop.f32.mrf.mxu2 }
 0x224   :  { %3596 = vpow2.f32 %v3314_v18  ;;  %v2052_v21 = vpop.f32.mrf.mxu3 }
 0x22a   :  { %v3597_v22 = vpop.eup %3596 }
 0x22b   :  { %v2145_v23 = vadd.f32 1.0, %v3597_v22 }
 0x22d   :  { %3598 = vrcp.f32 %v2145_v23  ;;  %v2233_v32 = vand.u32 2147483648, %v2145_v23  ;;  %v2231_v34 = vand.u32 2147483647, %v2145_v23  ;;  %vm2227_vm6 = vweird.f32 %v2145_v23 }
 0x22f   :  { %v2076_v25 = vpop.f32.mrf.mxu1  ;;  %v2234_v39 = vor.u32 1.1754944e-38, %v2233_v32  ;;  %vm2232_vm8 = vcmp.eq.f32.partialorder %v2231_v34, 8.507059e+37 }
 0x230   :  { %v2115_v26 = vpop.f32.mrf.mxu0  ;;  %v2077_v62 = vadd.f32 %v2076_v25, %v595_v28 }
 0x233   :  { %v3599_v27 = vpop.eup %3598 }
 0x234   :  { %v2223_v29 = vmul.f32 %v3599_v27, %v2145_v23  ;;  %vm2228_vm5 = vweird.f32 %v3599_v27 }
 0x235   :  { %vm2229_vm7 = vmor %vm2227_vm6, %vm2228_vm5 }
 0x236   :  { %v2224_v31 = vsub.f32 1.0, %v2223_v29 }
 0x237   :  { %v2078_v30 = vpop.f32.mrf.mxu1 }
 0x238   :  { %v2117_v58 = vpop.f32.mrf.mxu0  ;;  %v2225_v33 = vmul.f32 %v3599_v27, %v2224_v31 }
 0x23a   :  { %v2226_v38 = vadd.f32 %v3599_v27, %v2225_v33 }
 0x23b   :  { %v2089_v35 = vpop.f32.mrf.mxu2 }
 0x23c   :  { %v2090_v36 = vadd.f32 %v2089_v35, %v2077_v62  ;;  %v2102_v37 = vpop.f32.mrf.mxu3  ;;  %v2230_v41 = vsel %vm2229_vm7, %v3599_v27, %v2226_v38 }
 0x23d   :  { %v2235_v15 = vsel %vm2232_vm8, %v2234_v39, %v2230_v41 }
 0x23e   :  { %v2103_v40 = vadd.f32 %v2102_v37, %v2090_v36  ;;  %2257 = vst [vmem:[#allocation2 + $0x28] sm:$0xff] %v2235_v15 }
 0x240   :  { %v2116_v20 = vadd.f32 %v2115_v26, %v2103_v40 }
 0x242   :  { %v3315_v42 = vmul.f32 -1.442695, %v2116_v20 }
 0x243   :  { %v2091_v24 = vpop.f32.mrf.mxu2 }
 0x244   :  { %3600 = vpow2.f32 %v3315_v42  ;;  %v2104_v43 = vpop.f32.mrf.mxu3 }
 0x24a   :  { %v3601_v44 = vpop.eup %3600 }
 0x24b   :  { %v2146_v45 = vadd.f32 1.0, %v3601_v44 }
 0x24d   :  { %3602 = vrcp.f32 %v2146_v45  ;;  %v2248_v49 = vand.u32 2147483648, %v2146_v45  ;;  %v2246_v51 = vand.u32 2147483647, %v2146_v45  ;;  %vm2242_vm10 = vweird.f32 %v2146_v45 }
 0x24f   :  { %v2249_v53 = vor.u32 1.1754944e-38, %v2248_v49  ;;  %vm2247_vm13 = vcmp.eq.f32.partialorder %v2246_v51, 8.507059e+37 }
 0x253   :  { %v3603_v46 = vpop.eup %3602 }
 0x254   :  { %v2238_v47 = vmul.f32 %v3603_v46, %v2146_v45  ;;  %vm2243_vm9 = vweird.f32 %v3603_v46 }
 0x255   :  { %vm2244_vm11 = vmor %vm2242_vm10, %vm2243_vm9 }
 0x256   :  { %v2239_v48 = vsub.f32 1.0, %v2238_v47 }
 0x258   :  { %v2240_v50 = vmul.f32 %v3603_v46, %v2239_v48 }
 0x25a   :  { %v2241_v52 = vadd.f32 %v3603_v46, %v2240_v50 }
 0x25c   :  { %v2245_v54 = vsel %vm2244_vm11, %v3603_v46, %v2241_v52 }
 0x25d   :  { %v2250_v55 = vsel %vm2247_vm13, %v2249_v53, %v2245_v54 }
 0x25e   :  { %2259 = vst.msk [vmem:[#allocation2 + $0x30] sm:$0xff] %vm2258_vm12, %v2250_v55 }
 0x25f   :  { %2270 = dma.vmem_to_hbm [thread:$0]  %s2266_s23, 896, %s2268_s26, [#allocation3]  }
 0x260   :  { %3628 = dma.done.wait [#allocation3], 896  }
 0x261   :  { %3629 = vsyncadd [#allocation3], 4294966400 }
 0x262   :  { %2275 = vsyncpa [#allocation3], 1 }

// kernel: tpu_custom_call.1
= control target key start
LH: loop header
LB: loop body
LE: loop exit
PB: predicated region body
PF: predicated region fallthrough
CT: control target
= control target key end

     0   :  { %vm50_vm0 = vcmask 261120   ;;  %s5277_s0 = inlined_call_operand.vmem [shape: f32[8,32], index: 0, kind: input, shape index: {}]   ;;  %s5278_s1 = inlined_call_operand.vmem [shape: bf16[32,128], index: 1, kind: input, shape index: {}]   ;;  %s5279_s2 = inlined_call_operand.vmem [shape: f32[1,128], index: 2, kind: input, shape index: {}]   ;;  %s5280_s3 = inlined_call_operand.vmem [shape: bf16[128,512], index: 3, kind: input, shape index: {}]   ;;  %s5281_s4 = inlined_call_operand.vmem [shape: f32[1,512], index: 4, kind: input, shape index: {}]   ;;  %s5282_s5 = inlined_call_operand.vmem [shape: bf16[512,784], index: 5, kind: input, shape index: {}]   ;;  %s5283_s6 = inlined_call_operand.vmem [shape: f32[1,784], index: 6, kind: input, shape index: {}]   ;;  %s5284_s7 = inlined_call_operand.hbm [shape: f32[8,784], index: 7, kind: output, shape index: {}]  }
   0x1   :  { %v3317_v0 = vld [vmem:[%s5278_s1 + $0x8] sm:$0xff]  ;;  %v3316_v1 = vld [vmem:[%s5278_s1] sm:$0xff]  ;;  %v3348_v4 = vld [vmem:[%s5280_s3 + $0xec] sm:$0xf0] }
   0x2   :  { %v28_v2 = vld [vmem:[%s5277_s0] sm:$0xff]  ;;  %60 = vmatpush.bf16.msra.mxu0 %v3317_v0  ;;  %v2401_v7 = vld [vmem:[%s5280_s3 + $0xf0] sm:$0xf0]  ;;  %v2407_v8 = vld [vmem:[%s5280_s3 + $0xe8] sm:$0xf] }
   0x3   :  { %v2399_v3 = vld [vmem:[%s5280_s3 + $0xe0] sm:$0xf]  ;;  %v3346_v5 = vld [vmem:[%s5280_s3 + $0xe4] sm:$0xf]  ;;  %v3349_v9 = vld [vmem:[%s5280_s3 + $0xf4] sm:$0xf0]  ;;  %v29_v19 = vpack.c.bf16 %v28_v2, %v28_v2 }
   0x4   :  { %v2400_v6 = vor.u32 %v3348_v4, %v2399_v3  ;;  %v2404_v10 = vor.u32 %v3346_v5, %v2401_v7  ;;  %v2408_v11 = vor.u32 %v3349_v9, %v2407_v8  ;;  %v3347_v12 = vld [vmem:[%s5280_s3 + $0xec] sm:$0xf]  ;;  %v2409_v13 = vld [vmem:[%s5280_s3 + $0xf8] sm:$0xf0]  ;;  %v2383_v14 = vld [vmem:[%s5280_s3 + $0xc0] sm:$0xf] }
   0x5   :  { %v2412_v15 = vor.u32 %v3347_v12, %v2409_v13  ;;  %v3344_v16 = vld [vmem:[%s5280_s3 + $0xcc] sm:$0xf0]  ;;  %v3342_v17 = vld [vmem:[%s5280_s3 + $0xc4] sm:$0xf]  ;;  %v2385_v18 = vld [vmem:[%s5280_s3 + $0xd0] sm:$0xf0] }
   0x6   :  { %271 = vmatpush.bf16.msra.mxu1 %v2400_v6  ;;  %284 = vmatpush.bf16.msra.mxu2 %v2404_v10  ;;  %v2384_v20 = vor.u32 %v3344_v16, %v2383_v14  ;;  %v2388_v21 = vor.u32 %v3342_v17, %v2385_v18  ;;  %v2391_v22 = vld [vmem:[%s5280_s3 + $0xc8] sm:$0xf]  ;;  %v3345_v23 = vld [vmem:[%s5280_s3 + $0xd4] sm:$0xf0]  ;;  %v3343_v24 = vld [vmem:[%s5280_s3 + $0xcc] sm:$0xf] }
   0x7   :  { %297 = vmatpush.bf16.msra.mxu3 %v2408_v11  ;;  %61 = vmatpush.bf16.msra.mxu0 %v3316_v1  ;;  %v2392_v25 = vor.u32 %v3345_v23, %v2391_v22  ;;  %v2393_v26 = vld [vmem:[%s5280_s3 + $0xd8] sm:$0xf0]  ;;  %v2367_v27 = vld [vmem:[%s5280_s3 + $0xa0] sm:$0xf]  ;;  %v3340_v28 = vld [vmem:[%s5280_s3 + $0xac] sm:$0xf0] }
   0x8   :  { %v2396_v29 = vor.u32 %v3343_v24, %v2393_v26  ;;  %v3338_v30 = vld [vmem:[%s5280_s3 + $0xa4] sm:$0xf]  ;;  %v2369_v31 = vld [vmem:[%s5280_s3 + $0xb0] sm:$0xf0]  ;;  %v2375_v32 = vld [vmem:[%s5280_s3 + $0xa8] sm:$0xf]  ;;  %v2368_v33 = vor.u32 %v3340_v28, %v2367_v27 }
   0x9   :  { %v3341_v34 = vld [vmem:[%s5280_s3 + $0xb4] sm:$0xf0]  ;;  %v3339_v35 = vld [vmem:[%s5280_s3 + $0xac] sm:$0xf]  ;;  %v2377_v36 = vld [vmem:[%s5280_s3 + $0xb8] sm:$0xf0]  ;;  %v2372_v37 = vor.u32 %v3338_v30, %v2369_v31 }
   0xa   :  { %272 = vmatpush.bf16.msra.mxu1 %v2384_v20  ;;  %2284 = vmatmul.msk.bf16.vlgmr.msra.gmra.mxu0 %vm50_vm0, %v29_v19  ;;  %v2351_v38 = vld [vmem:[%s5280_s3 + $0x80] sm:$0xf]  ;;  %v3336_v39 = vld [vmem:[%s5280_s3 + $0x8c] sm:$0xf0]  ;;  %v2376_v40 = vor.u32 %v3341_v34, %v2375_v32  ;;  %v3334_v41 = vld [vmem:[%s5280_s3 + $0x84] sm:$0xf]  ;;  %v2380_v43 = vor.u32 %v3339_v35, %v2377_v36 }
   0xb   :  { %310 = vmatpush.bf16.msrb.mxu0 %v2412_v15  ;;  %285 = vmatpush.bf16.msra.mxu2 %v2388_v21  ;;  %v2353_v42 = vld [vmem:[%s5280_s3 + $0x90] sm:$0xf0]  ;;  %v2359_v44 = vld [vmem:[%s5280_s3 + $0x88] sm:$0xf]  ;;  %v3337_v45 = vld [vmem:[%s5280_s3 + $0x94] sm:$0xf0]  ;;  %v2352_v46 = vor.u32 %v3336_v39, %v2351_v38 }
   0xc   :  { %298 = vmatpush.bf16.msra.mxu3 %v2392_v25  ;;  %v3335_v47 = vld [vmem:[%s5280_s3 + $0x8c] sm:$0xf]  ;;  %v2361_v48 = vld [vmem:[%s5280_s3 + $0x98] sm:$0xf0]  ;;  %v2356_v49 = vor.u32 %v3334_v41, %v2353_v42  ;;  %v2335_v50 = vld [vmem:[%s5280_s3 + $0x60] sm:$0xf]  ;;  %v2360_v52 = vor.u32 %v3337_v45, %v2359_v44 }
   0xd   :  { %v3332_v51 = vld [vmem:[%s5280_s3 + $0x6c] sm:$0xf0]  ;;  %v3330_v53 = vld [vmem:[%s5280_s3 + $0x64] sm:$0xf]  ;;  %v2337_v54 = vld [vmem:[%s5280_s3 + $0x70] sm:$0xf0]  ;;  %v2364_v55 = vor.u32 %v3335_v47, %v2361_v48 }
   0xe   :  { %273 = vmatpush.bf16.msra.mxu1 %v2368_v33  ;;  %v2343_v56 = vld [vmem:[%s5280_s3 + $0x68] sm:$0xf]  ;;  %v3333_v57 = vld [vmem:[%s5280_s3 + $0x74] sm:$0xf0]  ;;  %v2336_v58 = vor.u32 %v3332_v51, %v2335_v50  ;;  %v3331_v59 = vld [vmem:[%s5280_s3 + $0x6c] sm:$0xf]  ;;  %v2340_v62 = vor.u32 %v3330_v53, %v2337_v54 }
   0xf   :  { %311 = vmatpush.bf16.msrb.mxu0 %v2396_v29  ;;  %286 = vmatpush.bf16.msra.mxu2 %v2372_v37  ;;  %v2345_v60 = vld [vmem:[%s5280_s3 + $0x78] sm:$0xf0]  ;;  %v2319_v61 = vld [vmem:[%s5280_s3 + $0x40] sm:$0xf]  ;;  %v3328_v63 = vld [vmem:[%s5280_s3 + $0x4c] sm:$0xf0] }
  0x10   :  { %299 = vmatpush.bf16.msra.mxu3 %v2376_v40 }
  0x12   :  { %274 = vmatpush.bf16.msra.mxu1 %v2352_v46 }
  0x13   :  { %312 = vmatpush.bf16.msrb.mxu0 %v2380_v43  ;;  %287 = vmatpush.bf16.msra.mxu2 %v2356_v49 }
  0x14   :  { %12 = vsyncpa [#allocation3], 0  ;;  %300 = vmatpush.bf16.msra.mxu3 %v2360_v52  ;;  %v2344_v0 = vor.u32 %v3333_v57, %v2343_v56  ;;  %v3326_v1 = vld [vmem:[%s5280_s3 + $0x44] sm:$0xf]  ;;  %v2321_v2 = vld [vmem:[%s5280_s3 + $0x50] sm:$0xf0]  ;;  %v2348_v3 = vor.u32 %v3331_v59, %v2345_v60  ;;  %v2320_v6 = vor.u32 %v3328_v63, %v2319_v61 }
  0x15   :  { %v2327_v4 = vld [vmem:[%s5280_s3 + $0x48] sm:$0xf]  ;;  %v3329_v5 = vld [vmem:[%s5280_s3 + $0x54] sm:$0xf0]  ;;  %v3327_v7 = vld [vmem:[%s5280_s3 + $0x4c] sm:$0xf]  ;;  %v2324_v9 = vor.u32 %v3326_v1, %v2321_v2 }
  0x16   :  { %275 = vmatpush.bf16.msra.mxu1 %v2336_v58  ;;  %v2329_v8 = vld [vmem:[%s5280_s3 + $0x58] sm:$0xf0]  ;;  %v2328_v10 = vor.u32 %v3329_v5, %v2327_v4  ;;  %v2303_v12 = vld [vmem:[%s5280_s3 + $0x20] sm:$0xf]  ;;  %v3324_v13 = vld [vmem:[%s5280_s3 + $0x2c] sm:$0xf0] }
  0x17   :  { %313 = vmatpush.bf16.msrb.mxu0 %v2364_v55  ;;  %288 = vmatpush.bf16.msra.mxu2 %v2340_v62  ;;  %v2332_v11 = vor.u32 %v3327_v7, %v2329_v8  ;;  %v3322_v14 = vld [vmem:[%s5280_s3 + $0x24] sm:$0xf]  ;;  %v2304_v15 = vor.u32 %v3324_v13, %v2303_v12  ;;  %v2305_v16 = vld [vmem:[%s5280_s3 + $0x30] sm:$0xf0]  ;;  %v2311_v17 = vld [vmem:[%s5280_s3 + $0x28] sm:$0xf] }
  0x18   :  { %301 = vmatpush.bf16.msra.mxu3 %v2344_v0  ;;  %v3325_v18 = vld [vmem:[%s5280_s3 + $0x34] sm:$0xf0]  ;;  %v2308_v19 = vor.u32 %v3322_v14, %v2305_v16  ;;  %v3323_v21 = vld [vmem:[%s5280_s3 + $0x2c] sm:$0xf]  ;;  %v2313_v22 = vld [vmem:[%s5280_s3 + $0x38] sm:$0xf0] }
  0x19   :  { %v2312_v20 = vor.u32 %v3325_v18, %v2311_v17  ;;  %v2316_v23 = vor.u32 %v3323_v21, %v2313_v22  ;;  %v2287_v24 = vld [vmem:[%s5280_s3] sm:$0xf]  ;;  %v3320_v25 = vld [vmem:[%s5280_s3 + $0xc] sm:$0xf0]  ;;  %v3318_v26 = vld [vmem:[%s5280_s3 + $0x4] sm:$0xf] }
  0x1a   :  { %276 = vmatpush.bf16.msra.mxu1 %v2320_v6  ;;  %v2288_v27 = vor.u32 %v3320_v25, %v2287_v24  ;;  %v2289_v28 = vld [vmem:[%s5280_s3 + $0x10] sm:$0xf0]  ;;  %v2295_v29 = vld [vmem:[%s5280_s3 + $0x8] sm:$0xf]  ;;  %v3321_v30 = vld [vmem:[%s5280_s3 + $0x14] sm:$0xf0] }
  0x1b   :  { %314 = vmatpush.bf16.msrb.mxu0 %v2348_v3  ;;  %289 = vmatpush.bf16.msra.mxu2 %v2324_v9  ;;  %v2292_v31 = vor.u32 %v3318_v26, %v2289_v28  ;;  %v2296_v32 = vor.u32 %v3321_v30, %v2295_v29  ;;  %v3319_v33 = vld [vmem:[%s5280_s3 + $0xc] sm:$0xf]  ;;  %v2297_v34 = vld [vmem:[%s5280_s3 + $0x18] sm:$0xf0]  ;;  %v2611_v36 = vld [vmem:[%s5282_s5 + $0x188] sm:$0xf] }
  0x1c   :  { %302 = vmatpush.bf16.msra.mxu3 %v2328_v10  ;;  %v2300_v35 = vor.u32 %v3319_v33, %v2297_v34  ;;  %v3402_v37 = vld [vmem:[%s5282_s5 + $0x1a0] sm:$0xf0]  ;;  %v3283_v38 = vld [vmem:[%s5282_s5 + $0x6c8] sm:$0xf]  ;;  %v2583_v41 = vld [vmem:[%s5282_s5 + $0x150] sm:$0xf] }
  0x1d   :  { %v2612_v39 = vor.u32 %v3402_v37, %v2611_v36  ;;  %v3570_v40 = vld [vmem:[%s5282_s5 + $0x6e0] sm:$0xf0]  ;;  %v3395_v42 = vld [vmem:[%s5282_s5 + $0x168] sm:$0xf0]  ;;  %v3255_v44 = vld [vmem:[%s5282_s5 + $0x690] sm:$0xf] }
  0x1e   :  { %277 = vmatpush.bf16.msra.mxu1 %v2304_v15  ;;  %v3284_v43 = vor.u32 %v3570_v40, %v3283_v38  ;;  %v3563_v45 = vld [vmem:[%s5282_s5 + $0x6a8] sm:$0xf0]  ;;  %v2835_v46 = vld [vmem:[%s5282_s5 + $0x348] sm:$0xf]  ;;  %v2584_v47 = vor.u32 %v3395_v42, %v2583_v41  ;;  %v3458_v48 = vld [vmem:[%s5282_s5 + $0x360] sm:$0xf0] }
  0x1f   :  { %315 = vmatpush.bf16.msrb.mxu0 %v2332_v11  ;;  %290 = vmatpush.bf16.msra.mxu2 %v2308_v19  ;;  %v3059_v49 = vld [vmem:[%s5282_s5 + $0x508] sm:$0xf]  ;;  %v3514_v50 = vld [vmem:[%s5282_s5 + $0x520] sm:$0xf0]  ;;  %v3256_v51 = vor.u32 %v3563_v45, %v3255_v44  ;;  %v2836_v52 = vor.u32 %v3458_v48, %v2835_v46  ;;  %v2555_v54 = vld [vmem:[%s5282_s5 + $0x118] sm:$0xf] }
  0x20   :  { %303 = vmatpush.bf16.msra.mxu3 %v2312_v20  ;;  %v3060_v53 = vor.u32 %v3514_v50, %v3059_v49  ;;  %v3388_v55 = vld [vmem:[%s5282_s5 + $0x130] sm:$0xf0]  ;;  %v3227_v56 = vld [vmem:[%s5282_s5 + $0x658] sm:$0xf]  ;;  %v2807_v58 = vld [vmem:[%s5282_s5 + $0x310] sm:$0xf] }
  0x21   :  { %v3556_v57 = vld [vmem:[%s5282_s5 + $0x670] sm:$0xf0]  ;;  %v3451_v59 = vld [vmem:[%s5282_s5 + $0x328] sm:$0xf0]  ;;  %v3031_v61 = vld [vmem:[%s5282_s5 + $0x4d0] sm:$0xf]  ;;  %v2556_v63 = vor.u32 %v3388_v55, %v2555_v54 }
  0x22   :  { %278 = vmatpush.bf16.msra.mxu1 %v2288_v27  ;;  %v2808_v60 = vor.u32 %v3451_v59, %v2807_v58  ;;  %v3507_v62 = vld [vmem:[%s5282_s5 + $0x4e8] sm:$0xf0]  ;;  %v2527_v1 = vld [vmem:[%s5282_s5 + $0xe0] sm:$0xf]  ;;  %v3381_v2 = vld [vmem:[%s5282_s5 + $0xf8] sm:$0xf0]  ;;  %v3228_v3 = vor.u32 %v3556_v57, %v3227_v56 }
  0x23   :  { %316 = vmatpush.bf16.msrb.mxu0 %v2316_v23  ;;  %291 = vmatpush.bf16.msra.mxu2 %v2292_v31  ;;  %v3032_v0 = vor.u32 %v3507_v62, %v3031_v61  ;;  %v2779_v4 = vld [vmem:[%s5282_s5 + $0x2d8] sm:$0xf]  ;;  %v3444_v5 = vld [vmem:[%s5282_s5 + $0x2f0] sm:$0xf0]  ;;  %v3199_v7 = vld [vmem:[%s5282_s5 + $0x620] sm:$0xf]  ;;  %v2528_v13 = vor.u32 %v3381_v2, %v2527_v1 }
  0x24   :  { %304 = vmatpush.bf16.msra.mxu3 %v2296_v32  ;;  %v3003_v6 = vld [vmem:[%s5282_s5 + $0x498] sm:$0xf]  ;;  %v3549_v8 = vld [vmem:[%s5282_s5 + $0x638] sm:$0xf0]  ;;  %v3500_v9 = vld [vmem:[%s5282_s5 + $0x4b0] sm:$0xf0]  ;;  %v2780_v10 = vor.u32 %v3444_v5, %v2779_v4 }
  0x25   :  { %v3004_v11 = vor.u32 %v3500_v9, %v3003_v6  ;;  %v2751_v12 = vld [vmem:[%s5282_s5 + $0x2a0] sm:$0xf]  ;;  %v3437_v14 = vld [vmem:[%s5282_s5 + $0x2b8] sm:$0xf0]  ;;  %v3200_v17 = vor.u32 %v3549_v8, %v3199_v7  ;;  %v2499_v18 = vld [vmem:[%s5282_s5 + $0xa8] sm:$0xf] }
  0x26   :  { %1755 = vmatpush.bf16.msrb.mxu1 %v2612_v39  ;;  %v2975_v15 = vld [vmem:[%s5282_s5 + $0x460] sm:$0xf]  ;;  %v3493_v16 = vld [vmem:[%s5282_s5 + $0x478] sm:$0xf0]  ;;  %v3374_v19 = vld [vmem:[%s5282_s5 + $0xc0] sm:$0xf0]  ;;  %v2752_v22 = vor.u32 %v3437_v14, %v2751_v12 }
  0x27   :  { %317 = vmatpush.bf16.msrb.mxu0 %v2300_v35  ;;  %1768 = vmatpush.bf16.msrb.mxu2 %v2836_v52  ;;  %v3171_v20 = vld [vmem:[%s5282_s5 + $0x5e8] sm:$0xf]  ;;  %v3542_v21 = vld [vmem:[%s5282_s5 + $0x600] sm:$0xf0]  ;;  %v2976_v23 = vor.u32 %v3493_v16, %v2975_v15  ;;  %v2500_v25 = vor.u32 %v3374_v19, %v2499_v18  ;;  %v2471_v30 = vld [vmem:[%s5282_s5 + $0x70] sm:$0xf] }
  0x28   :  { %1781 = vmatpush.bf16.msrb.mxu3 %v3060_v53  ;;  %v2723_v24 = vld [vmem:[%s5282_s5 + $0x268] sm:$0xf]  ;;  %v3430_v26 = vld [vmem:[%s5282_s5 + $0x280] sm:$0xf0]  ;;  %v3172_v29 = vor.u32 %v3542_v21, %v3171_v20  ;;  %v3367_v31 = vld [vmem:[%s5282_s5 + $0x88] sm:$0xf0] }
  0x29   :  { %v2947_v27 = vld [vmem:[%s5282_s5 + $0x428] sm:$0xf]  ;;  %v3486_v28 = vld [vmem:[%s5282_s5 + $0x440] sm:$0xf0]  ;;  %v3143_v32 = vld [vmem:[%s5282_s5 + $0x5b0] sm:$0xf]  ;;  %v2724_v34 = vor.u32 %v3430_v26, %v2723_v24  ;;  %v2472_v37 = vor.u32 %v3367_v31, %v2471_v30 }
  0x2a   :  { %1756 = vmatpush.bf16.msrb.mxu1 %v2584_v47  ;;  %v3535_v33 = vld [vmem:[%s5282_s5 + $0x5c8] sm:$0xf0]  ;;  %v2948_v35 = vor.u32 %v3486_v28, %v2947_v27  ;;  %v2695_v36 = vld [vmem:[%s5282_s5 + $0x230] sm:$0xf]  ;;  %v2443_v42 = vld [vmem:[%s5282_s5 + $0x38] sm:$0xf] }
  0x2b   :  { %1794 = vmatpush.bf16.msra.mxu0 %v3284_v43  ;;  %1769 = vmatpush.bf16.msrb.mxu2 %v2808_v60  ;;  %v3423_v38 = vld [vmem:[%s5282_s5 + $0x248] sm:$0xf0]  ;;  %v2919_v39 = vld [vmem:[%s5282_s5 + $0x3f0] sm:$0xf]  ;;  %v3144_v41 = vor.u32 %v3535_v33, %v3143_v32  ;;  %v3360_v43 = vld [vmem:[%s5282_s5 + $0x50] sm:$0xf0] }
  0x2c   :  { %1782 = vmatpush.bf16.msrb.mxu3 %v3032_v0  ;;  %v3479_v40 = vld [vmem:[%s5282_s5 + $0x408] sm:$0xf0]  ;;  %v3575_v44 = vld [vmem:[%s5279_s2] ss:$0 sm:$0xff]  ;;  %v3115_v45 = vld [vmem:[%s5282_s5 + $0x578] sm:$0xf]  ;;  %v2696_v47 = vor.u32 %v3423_v38, %v2695_v36  ;;  %v2444_v50 = vor.u32 %v3360_v43, %v2443_v42 }
  0x2d   :  { %v3528_v46 = vld [vmem:[%s5282_s5 + $0x590] sm:$0xf0]  ;;  %v2920_v48 = vor.u32 %v3479_v40, %v2919_v39  ;;  %v2667_v49 = vld [vmem:[%s5282_s5 + $0x1f8] sm:$0xf]  ;;  %v2415_v56 = vld [vmem:[%s5282_s5] sm:$0xf] }
  0x2e   :  { %1757 = vmatpush.bf16.msrb.mxu1 %v2556_v63  ;;  %v2891_v52 = vld [vmem:[%s5282_s5 + $0x3b8] sm:$0xf]  ;;  %v3472_v53 = vld [vmem:[%s5282_s5 + $0x3d0] sm:$0xf0]  ;;  %v3116_v55 = vor.u32 %v3528_v46, %v3115_v45  ;;  %v3353_v57 = vld [vmem:[%s5282_s5 + $0x18] sm:$0xf0] }
  0x2f   :  { %1795 = vmatpush.bf16.msra.mxu0 %v3256_v51  ;;  %1770 = vmatpush.bf16.msrb.mxu2 %v2780_v10  ;;  %v3416_v51 = vld [vmem:[%s5282_s5 + $0x210] sm:$0xf0]  ;;  %v3087_v59 = vld [vmem:[%s5282_s5 + $0x540] sm:$0xf]  ;;  %v3521_v60 = vld [vmem:[%s5282_s5 + $0x558] sm:$0xf0]  ;;  %v2892_v2 = vor.u32 %v3472_v53, %v2891_v52  ;;  %v2416_v10 = vor.u32 %v3353_v57, %v2415_v56 }
  0x30   :  { %1783 = vmatpush.bf16.msrb.mxu3 %v3004_v11  ;;  %v3399_v61 = vld [vmem:[%s5282_s5 + $0x18c] sm:$0xf]  ;;  %v2613_v62 = vld [vmem:[%s5282_s5 + $0x1a4] sm:$0xf0]  ;;  %v2668_v1 = vor.u32 %v3416_v51, %v2667_v49  ;;  %v2639_v4 = vld [vmem:[%s5282_s5 + $0x1c0] sm:$0xf]  ;;  %v3088_v11 = vor.u32 %v3521_v60, %v3087_v59 }
  0x31   :  { %v3567_v63 = vld [vmem:[%s5282_s5 + $0x6cc] sm:$0xf]  ;;  %v3285_v0 = vld [vmem:[%s5282_s5 + $0x6e4] sm:$0xf0]  ;;  %v3409_v5 = vld [vmem:[%s5282_s5 + $0x1d8] sm:$0xf0]  ;;  %v2616_v15 = vor.u32 %v3399_v61, %v2613_v62 }
  0x32   :  { %1758 = vmatpush.bf16.msrb.mxu1 %v2528_v13  ;;  %v2863_v6 = vld [vmem:[%s5282_s5 + $0x380] sm:$0xf]  ;;  %v3465_v7 = vld [vmem:[%s5282_s5 + $0x398] sm:$0xf0]  ;;  %v3455_v8 = vld [vmem:[%s5282_s5 + $0x34c] sm:$0xf]  ;;  %v3288_v16 = vor.u32 %v3567_v63, %v3285_v0  ;;  %v2640_v21 = vor.u32 %v3409_v5, %v2639_v4 }
  0x33   :  { %1796 = vmatpush.bf16.msra.mxu0 %v3228_v3  ;;  %1771 = vmatpush.bf16.msrb.mxu2 %v2752_v22  ;;  %v2837_v12 = vld [vmem:[%s5282_s5 + $0x364] sm:$0xf0]  ;;  %v3511_v13 = vld [vmem:[%s5282_s5 + $0x50c] sm:$0xf]  ;;  %v2585_v18 = vld [vmem:[%s5282_s5 + $0x16c] sm:$0xf0]  ;;  %v2864_v22 = vor.u32 %v3465_v7, %v2863_v6 }
  0x34   :  { %1784 = vmatpush.bf16.msrb.mxu3 %v2976_v23  ;;  %v3061_v14 = vld [vmem:[%s5282_s5 + $0x524] sm:$0xf0]  ;;  %v3560_v19 = vld [vmem:[%s5282_s5 + $0x694] sm:$0xf]  ;;  %v3257_v20 = vld [vmem:[%s5282_s5 + $0x6ac] sm:$0xf0]  ;;  %v2840_v24 = vor.u32 %v3455_v8, %v2837_v12 }
  0x35   :  { %v3448_v26 = vld [vmem:[%s5282_s5 + $0x314] sm:$0xf]  ;;  %v2809_v27 = vld [vmem:[%s5282_s5 + $0x32c] sm:$0xf0]  ;;  %v3260_v31 = vor.u32 %v3560_v19, %v3257_v20  ;;  %v3385_v32 = vld [vmem:[%s5282_s5 + $0x11c] sm:$0xf] }
  0x36   :  { %1759 = vmatpush.bf16.msrb.mxu1 %v2500_v25  ;;  %v3064_v25 = vor.u32 %v3511_v13, %v3061_v14  ;;  %v3504_v28 = vld [vmem:[%s5282_s5 + $0x4d4] sm:$0xf]  ;;  %v2557_v33 = vld [vmem:[%s5282_s5 + $0x134] sm:$0xf0]  ;;  %v2812_v36 = vor.u32 %v3448_v26, %v2809_v27  ;;  %v3441_v38 = vld [vmem:[%s5282_s5 + $0x2dc] sm:$0xf] }
  0x37   :  { %1797 = vmatpush.bf16.msra.mxu0 %v3200_v17  ;;  %1772 = vmatpush.bf16.msrb.mxu2 %v2724_v34  ;;  %v3392_v17 = vld [vmem:[%s5282_s5 + $0x154] sm:$0xf]  ;;  %v3553_v34 = vld [vmem:[%s5282_s5 + $0x65c] sm:$0xf]  ;;  %v2781_v39 = vld [vmem:[%s5282_s5 + $0x2f4] sm:$0xf0]  ;;  %v2560_v42 = vor.u32 %v3385_v32, %v2557_v33 }
  0x38   :  { %1785 = vmatpush.bf16.msrb.mxu3 %v2948_v35  ;;  %v2588_v30 = vor.u32 %v3392_v17, %v2585_v18  ;;  %v3229_v35 = vld [vmem:[%s5282_s5 + $0x674] sm:$0xf0]  ;;  %v3497_v40 = vld [vmem:[%s5282_s5 + $0x49c] sm:$0xf]  ;;  %v2529_v45 = vld [vmem:[%s5282_s5 + $0xfc] sm:$0xf0] }
  0x39   :  { %v3232_v43 = vor.u32 %v3553_v34, %v3229_v35  ;;  %v3546_v46 = vld [vmem:[%s5282_s5 + $0x624] sm:$0xf]  ;;  %v2753_v51 = vld [vmem:[%s5282_s5 + $0x2bc] sm:$0xf0]  ;;  %v3371_v56 = vld [vmem:[%s5282_s5 + $0xac] sm:$0xf] }
  0x3a   :  { %1760 = vmatpush.bf16.msrb.mxu1 %v2472_v37  ;;  %v3490_v52 = vld [vmem:[%s5282_s5 + $0x464] sm:$0xf]  ;;  %v2977_v53 = vld [vmem:[%s5282_s5 + $0x47c] sm:$0xf0]  ;;  %v2501_v57 = vld [vmem:[%s5282_s5 + $0xc4] sm:$0xf0] }
  0x3b   :  { %1798 = vmatpush.bf16.msra.mxu0 %v3172_v29  ;;  %1773 = vmatpush.bf16.msrb.mxu2 %v2696_v47  ;;  %v3033_v29 = vld [vmem:[%s5282_s5 + $0x4ec] sm:$0xf0]  ;;  %v3201_v47 = vld [vmem:[%s5282_s5 + $0x63c] sm:$0xf0]  ;;  %v3173_v59 = vld [vmem:[%s5282_s5 + $0x604] sm:$0xf0]  ;;  %v2980_v61 = vor.u32 %v3490_v52, %v2977_v53  ;;  %v2504_v62 = vor.u32 %v3371_v56, %v2501_v57 }
  0x3c   :  { %1786 = vmatpush.bf16.msrb.mxu3 %v2920_v48  ;;  %v3036_v37 = vor.u32 %v3504_v28, %v3033_v29  ;;  %v2784_v48 = vor.u32 %v3441_v38, %v2781_v39  ;;  %v3364_v0 = vld [vmem:[%s5282_s5 + $0x74] sm:$0xf]  ;;  %v3427_v6 = vld [vmem:[%s5282_s5 + $0x26c] sm:$0xf]  ;;  %v2725_v7 = vld [vmem:[%s5282_s5 + $0x284] sm:$0xf0] }
  0x3d   :  { %v3483_v8 = vld [vmem:[%s5282_s5 + $0x42c] sm:$0xf]  ;;  %v3357_v12 = vld [vmem:[%s5282_s5 + $0x3c] sm:$0xf]  ;;  %v2445_v13 = vld [vmem:[%s5282_s5 + $0x54] sm:$0xf0] }
  0x3e   :  { %1761 = vmatpush.bf16.msrb.mxu1 %v2444_v50  ;;  %v3434_v50 = vld [vmem:[%s5282_s5 + $0x2a4] sm:$0xf]  ;;  %v2448_v14 = vor.u32 %v3357_v12, %v2445_v13  ;;  %v3420_v18 = vld [vmem:[%s5282_s5 + $0x234] sm:$0xf]  ;;  %v2697_v19 = vld [vmem:[%s5282_s5 + $0x24c] sm:$0xf0] }
  0x3f   :  { %1799 = vmatpush.bf16.msra.mxu0 %v3144_v41  ;;  %1774 = vmatpush.bf16.msrb.mxu2 %v2668_v1  ;;  %v3005_v41 = vld [vmem:[%s5282_s5 + $0x4b4] sm:$0xf0]  ;;  %v2756_v60 = vor.u32 %v3434_v50, %v2753_v51  ;;  %v2473_v1 = vld [vmem:[%s5282_s5 + $0x8c] sm:$0xf0]  ;;  %v3476_v20 = vld [vmem:[%s5282_s5 + $0x3f4] sm:$0xf] }
  0x40   :  { %1787 = vmatpush.bf16.msrb.mxu3 %v2892_v2  ;;  %v3008_v49 = vor.u32 %v3497_v40, %v3005_v41  ;;  %v3532_v2 = vld [vmem:[%s5282_s5 + $0x5b4] sm:$0xf]  ;;  %v2476_v4 = vor.u32 %v3364_v0, %v2473_v1  ;;  %v3518_v26 = vld [vmem:[%s5282_s5 + $0x544] sm:$0xf]  ;;  %v3089_v28 = vld [vmem:[%s5282_s5 + $0x55c] sm:$0xf0] }
  0x41   :  { %v3092_v29 = vor.u32 %v3518_v26, %v3089_v28  ;;  %v3469_v32 = vld [vmem:[%s5282_s5 + $0x3bc] sm:$0xf]  ;;  %v2893_v34 = vld [vmem:[%s5282_s5 + $0x3d4] sm:$0xf0]  ;;  %v3462_v39 = vld [vmem:[%s5282_s5 + $0x384] sm:$0xf] }
  0x42   :  { %1762 = vmatpush.bf16.msrb.mxu1 %v2416_v10  ;;  %v2949_v10 = vld [vmem:[%s5282_s5 + $0x444] sm:$0xf0]  ;;  %v2896_v35 = vor.u32 %v3469_v32, %v2893_v34  ;;  %v2865_v40 = vld [vmem:[%s5282_s5 + $0x39c] sm:$0xf0]  ;;  %v3291_v51 = vld [vmem:[%s5282_s5 + $0x6d0] sm:$0xf] }
  0x43   :  { %1800 = vmatpush.bf16.msra.mxu0 %v3116_v55  ;;  %1775 = vmatpush.bf16.msrb.mxu2 %v2640_v21  ;;  %v3204_v55 = vor.u32 %v3546_v46, %v3201_v47  ;;  %v2700_v21 = vor.u32 %v3420_v18, %v2697_v19  ;;  %v2868_v41 = vor.u32 %v3462_v39, %v2865_v40  ;;  %v3571_v52 = vld [vmem:[%s5282_s5 + $0x6e8] sm:$0xf0]  ;;  %v3263_v0 = vld [vmem:[%s5282_s5 + $0x698] sm:$0xf]  ;;  %v3564_v1 = vld [vmem:[%s5282_s5 + $0x6b0] sm:$0xf0] }
  0x44   :  { %1788 = vmatpush.bf16.msrb.mxu3 %v2864_v22  ;;  %v2921_v22 = vld [vmem:[%s5282_s5 + $0x40c] sm:$0xf0]  ;;  %v3264_v13 = vor.u32 %v3564_v1, %v3263_v0  ;;  %v3235_v18 = vld [vmem:[%s5282_s5 + $0x660] sm:$0xf]  ;;  %v3557_v19 = vld [vmem:[%s5282_s5 + $0x678] sm:$0xf0] }
  0x45   :  { %v3039_v26 = vld [vmem:[%s5282_s5 + $0x4d8] sm:$0xf]  ;;  %v3236_v28 = vor.u32 %v3557_v19, %v3235_v18  ;;  %v3550_v34 = vld [vmem:[%s5282_s5 + $0x640] sm:$0xf0]  ;;  %v3011_v40 = vld [vmem:[%s5282_s5 + $0x4a0] sm:$0xf] }
  0x46   :  { %v3431_v0 = vld [vmem:[%s5282_s5 + $0x288] sm:$0xf0]  ;;  %v3354_v18 = vld [vmem:[%s5282_s5 + $0x20] sm:$0xf0]  ;;  %v3095_v19 = vld [vmem:[%s5282_s5 + $0x548] sm:$0xf] }
  0x47   :  { %1801 = vmatpush.bf16.msra.mxu0 %v3088_v11  ;;  %v2952_v11 = vor.u32 %v3483_v8, %v2949_v10  ;;  %v3515_v10 = vld [vmem:[%s5282_s5 + $0x528] sm:$0xf0]  ;;  %s2267_s26 = sshll.u32 %s5284_s7, 4  ;;  %s2268_s26 = int_to_ptr.hbm [resolvable:$true] %s2267_s26 }
  0x87   :  { %v63_v54 = vpop.f32.mrf.mxu0 }
  0x88   :  { %v64_v58 = vadd.f32 %v3575_v44, %v63_v54  ;;  %v3378_v44 = vld [vmem:[%s5282_s5 + $0xe4] sm:$0xf] }
  0x89   :  { %v2532_v54 = vor.u32 %v3378_v44, %v2529_v45 }
  0x8a   :  { %v67_v3 = vmax.f32 %v64_v58, 0.0  ;;  %v3539_v58 = vld [vmem:[%s5282_s5 + $0x5ec] sm:$0xf] }
  0x8b   :  { %v3176_v63 = vor.u32 %v3539_v58, %v3173_v59  ;;  %v3292_v59 = vor.u32 %v3571_v52, %v3291_v51  ;;  %v2983_v52 = vld [vmem:[%s5282_s5 + $0x468] sm:$0xf] }
  0x8c   :  { %v68_v9 = vpack.c.bf16 %v67_v3, %v67_v3  ;;  %v3145_v3 = vld [vmem:[%s5282_s5 + $0x5cc] sm:$0xf0] }
  0x8d   :  { %v3148_v5 = vor.u32 %v3532_v2, %v3145_v3 }
  0x8e   :  { %279 = vmatmul.bf16.vlgmr.msra.gmra.mxu1 %v68_v9  ;;  %292 = vmatmul.bf16.vlgmr.msra.gmra.mxu2 %v68_v9 }
  0x8f   :  { %305 = vmatmul.bf16.vlgmr.msra.gmra.mxu3 %v68_v9  ;;  %318 = vmatmul.bf16.vlgmr.msrb.gmra.mxu0 %v68_v9  ;;  %v65_v23 = vpop.f32.mrf.mxu0  ;;  %v2728_v9 = vor.u32 %v3427_v6, %v2725_v7 }
  0x90   :  { %1807 = vmatpush.bf16.msra.mxu1 %v2616_v15  ;;  %1846 = vmatpush.bf16.msrb.mxu0 %v3288_v16  ;;  %v3525_v15 = vld [vmem:[%s5282_s5 + $0x57c] sm:$0xf]  ;;  %v3117_v16 = vld [vmem:[%s5282_s5 + $0x594] sm:$0xf0]  ;;  %v2924_v23 = vor.u32 %v3476_v20, %v2921_v22 }
  0x91   :  { %1820 = vmatpush.bf16.msra.mxu2 %v2840_v24  ;;  %1833 = vmatpush.bf16.msra.mxu3 %v3064_v25  ;;  %v3120_v17 = vor.u32 %v3525_v15, %v3117_v16  ;;  %v3350_v24 = vld [vmem:[%s5282_s5 + $0x4] sm:$0xf]  ;;  %v2417_v25 = vld [vmem:[%s5282_s5 + $0x1c] sm:$0xf0]  ;;  %v3389_v15 = vld [vmem:[%s5282_s5 + $0x138] sm:$0xf0] }
  0x92   :  { %v2420_v27 = vor.u32 %v3350_v24, %v2417_v25  ;;  %v2815_v22 = vld [vmem:[%s5282_s5 + $0x318] sm:$0xf] }
  0x94   :  { %1808 = vmatpush.bf16.msra.mxu1 %v2588_v30  ;;  %1847 = vmatpush.bf16.msrb.mxu0 %v3260_v31  ;;  %v3413_v30 = vld [vmem:[%s5282_s5 + $0x1fc] sm:$0xf]  ;;  %v2669_v31 = vld [vmem:[%s5282_s5 + $0x214] sm:$0xf0] }
  0x95   :  { %1821 = vmatpush.bf16.msra.mxu2 %v2812_v36  ;;  %1834 = vmatpush.bf16.msra.mxu3 %v3036_v37  ;;  %v2672_v33 = vor.u32 %v3413_v30, %v2669_v31  ;;  %v3406_v36 = vld [vmem:[%s5282_s5 + $0x1c4] sm:$0xf]  ;;  %v2641_v37 = vld [vmem:[%s5282_s5 + $0x1dc] sm:$0xf0] }
  0x96   :  { %v2644_v38 = vor.u32 %v3406_v36, %v2641_v37  ;;  %v3382_v30 = vld [vmem:[%s5282_s5 + $0x100] sm:$0xf0]  ;;  %v2787_v37 = vld [vmem:[%s5282_s5 + $0x2e0] sm:$0xf] }
  0x98   :  { %1809 = vmatpush.bf16.msra.mxu1 %v2560_v42  ;;  %1848 = vmatpush.bf16.msrb.mxu0 %v3232_v43  ;;  %v101_v42 = vld [vmem:[%s5281_s4] sm:$0xf] }
  0x99   :  { %1822 = vmatpush.bf16.msra.mxu2 %v2784_v48  ;;  %1835 = vmatpush.bf16.msra.mxu3 %v3008_v49  ;;  %v103_v43 = vperm.slane %v101_v42, 0  ;;  %v106_v44 = vperm.slane %v101_v42, 3  ;;  %v2619_v48 = vld [vmem:[%s5282_s5 + $0x190] sm:$0xf]  ;;  %v3403_v49 = vld [vmem:[%s5282_s5 + $0x1a8] sm:$0xf0] }
  0x9a   :  { %v105_v56 = vperm.slane %v101_v42, 2  ;;  %v2620_v57 = vor.u32 %v3403_v49, %v2619_v48  ;;  %v2759_v49 = vld [vmem:[%s5282_s5 + $0x2a8] sm:$0xf] }
  0x9c   :  { %1810 = vmatpush.bf16.msra.mxu1 %v2532_v54  ;;  %1849 = vmatpush.bf16.msrb.mxu0 %v3204_v55  ;;  %v104_v54 = vperm.slane %v101_v42, 1 }
  0x9d   :  { %1823 = vmatpush.bf16.msra.mxu2 %v2756_v60  ;;  %1836 = vmatpush.bf16.msra.mxu3 %v2980_v61  ;;  %v2591_v60 = vld [vmem:[%s5282_s5 + $0x158] sm:$0xf]  ;;  %v3396_v61 = vld [vmem:[%s5282_s5 + $0x170] sm:$0xf0] }
  0x9e   :  { %v2592_v8 = vor.u32 %v3396_v61, %v2591_v60  ;;  %v3536_v60 = vld [vmem:[%s5282_s5 + $0x5d0] sm:$0xf0] }
  0xa0   :  { %1811 = vmatpush.bf16.msra.mxu1 %v2504_v62  ;;  %1850 = vmatpush.bf16.msrb.mxu0 %v3176_v63 }
  0xa1   :  { %1824 = vmatpush.bf16.msra.mxu2 %v2728_v9  ;;  %1837 = vmatpush.bf16.msra.mxu3 %v2952_v11  ;;  %v3067_v9 = vld [vmem:[%s5282_s5 + $0x510] sm:$0xf] }
  0xa4   :  { %1812 = vmatpush.bf16.msra.mxu1 %v2476_v4  ;;  %1851 = vmatpush.bf16.msrb.mxu0 %v3148_v5  ;;  %v2843_v4 = vld [vmem:[%s5282_s5 + $0x350] sm:$0xf]  ;;  %v3459_v5 = vld [vmem:[%s5282_s5 + $0x368] sm:$0xf0] }
  0xa5   :  { %1825 = vmatpush.bf16.msra.mxu2 %v2700_v21  ;;  %1838 = vmatpush.bf16.msra.mxu3 %v2924_v23  ;;  %v3068_v21 = vor.u32 %v3515_v10, %v3067_v9  ;;  %v3452_v23 = vld [vmem:[%s5282_s5 + $0x330] sm:$0xf0]  ;;  %v3529_v9 = vld [vmem:[%s5282_s5 + $0x598] sm:$0xf0] }
  0xa6   :  { %v2816_v32 = vor.u32 %v3452_v23, %v2815_v22  ;;  %v3400_v23 = vld [vmem:[%s5282_s5 + $0x194] sm:$0xf] }
  0xa8   :  { %1813 = vmatpush.bf16.msra.mxu1 %v2448_v14  ;;  %1852 = vmatpush.bf16.msrb.mxu0 %v3120_v17  ;;  %v2563_v14 = vld [vmem:[%s5282_s5 + $0x120] sm:$0xf]  ;;  %v2844_v17 = vor.u32 %v3459_v5, %v2843_v4 }
  0xa9   :  { %1826 = vmatpush.bf16.msra.mxu2 %v2672_v33  ;;  %1839 = vmatpush.bf16.msra.mxu3 %v2896_v35  ;;  %v2564_v25 = vor.u32 %v3389_v15, %v2563_v14  ;;  %v3207_v33 = vld [vmem:[%s5282_s5 + $0x628] sm:$0xf]  ;;  %v2451_v5 = vld [vmem:[%s5282_s5 + $0x40] sm:$0xf]  ;;  %v2927_v14 = vld [vmem:[%s5282_s5 + $0x3f8] sm:$0xf] }
  0xaa   :  { %v3208_v42 = vor.u32 %v3550_v34, %v3207_v33  ;;  %v3480_v15 = vld [vmem:[%s5282_s5 + $0x410] sm:$0xf0]  ;;  %v3473_v33 = vld [vmem:[%s5282_s5 + $0x3d8] sm:$0xf0] }
  0xac   :  { %1814 = vmatpush.bf16.msra.mxu1 %v2420_v27  ;;  %1853 = vmatpush.bf16.msrb.mxu0 %v3092_v29  ;;  %v3508_v27 = vld [vmem:[%s5282_s5 + $0x4f0] sm:$0xf0]  ;;  %v2535_v29 = vld [vmem:[%s5282_s5 + $0xe8] sm:$0xf] }
  0xad   :  { %1827 = vmatpush.bf16.msra.mxu2 %v2644_v38  ;;  %1840 = vmatpush.bf16.msra.mxu3 %v2868_v41  ;;  %v3040_v36 = vor.u32 %v3508_v27, %v3039_v26  ;;  %v3445_v38 = vld [vmem:[%s5282_s5 + $0x2f8] sm:$0xf0]  ;;  %v2536_v39 = vor.u32 %v3382_v30, %v2535_v29  ;;  %v3568_v26 = vld [vmem:[%s5282_s5 + $0x6d4] sm:$0xf]  ;;  %v2928_v27 = vor.u32 %v3480_v15, %v2927_v14  ;;  %v2675_v29 = vld [vmem:[%s5282_s5 + $0x200] sm:$0xf] }
  0xae   :  { %v3501_v41 = vld [vmem:[%s5282_s5 + $0x4b8] sm:$0xf0]  ;;  %v3498_v14 = vld [vmem:[%s5282_s5 + $0x4a4] sm:$0xf]  ;;  %v3013_v15 = vld [vmem:[%s5282_s5 + $0x4bc] sm:$0xf0] }
  0xaf   :  { %v3012_v48 = vor.u32 %v3501_v41, %v3011_v40  ;;  %v3417_v30 = vld [vmem:[%s5282_s5 + $0x218] sm:$0xf0]  ;;  %v3265_v41 = vld [vmem:[%s5282_s5 + $0x6b4] sm:$0xf0] }
  0xb0   :  { %v3561_v40 = vld [vmem:[%s5282_s5 + $0x69c] sm:$0xf] }
 0x10b   :  { %v280_v45 = vpop.f32.mrf.mxu1 }
 0x10c   :  { %v281_v46 = vadd.f32 %v280_v45, %v103_v43  ;;  %v319_v47 = vpop.f32.mrf.mxu0  ;;  %v2507_v43 = vld [vmem:[%s5282_s5 + $0xb0] sm:$0xf]  ;;  %v2788_v45 = vor.u32 %v3445_v38, %v2787_v37  ;;  %v2676_v38 = vor.u32 %v3417_v30, %v2675_v29  ;;  %v2985_v29 = vld [vmem:[%s5282_s5 + $0x484] sm:$0xf0] }
 0x10d   :  { %v320_v50 = vadd.f32 %v319_v47, %v106_v44  ;;  %v3375_v44 = vld [vmem:[%s5282_s5 + $0xc8] sm:$0xf0] }
 0x10e   :  { %v323_v53 = vmax.f32 %v281_v46, 0.0  ;;  %v3179_v46 = vld [vmem:[%s5282_s5 + $0x5f0] sm:$0xf]  ;;  %v3543_v47 = vld [vmem:[%s5282_s5 + $0x608] sm:$0xf0]  ;;  %v2508_v51 = vor.u32 %v3375_v44, %v2507_v43 }
 0x10f   :  { %v326_v55 = vmax.f32 %v320_v50, 0.0  ;;  %v3438_v50 = vld [vmem:[%s5282_s5 + $0x2c0] sm:$0xf0]  ;;  %v2647_v43 = vld [vmem:[%s5282_s5 + $0x1c8] sm:$0xf] }
 0x110   :  { %v4275_v58 = vpack.c.bf16 %v323_v53, %v323_v53  ;;  %v3494_v53 = vld [vmem:[%s5282_s5 + $0x480] sm:$0xf0] }
 0x111   :  { %v4283_v62 = vpack.c.bf16 %v326_v55, %v326_v55  ;;  %v293_v63 = vpop.f32.mrf.mxu2  ;;  %v2479_v55 = vld [vmem:[%s5282_s5 + $0x78] sm:$0xf]  ;;  %v2984_v61 = vor.u32 %v3494_v53, %v2983_v52  ;;  %v3410_v44 = vld [vmem:[%s5282_s5 + $0x1e0] sm:$0xf0]  ;;  %v3268_v52 = vor.u32 %v3561_v40, %v3265_v41  ;;  %v3484_v40 = vld [vmem:[%s5282_s5 + $0x434] sm:$0xf] }
 0x112   :  { %v294_v2 = vadd.f32 %v293_v63, %v104_v54  ;;  %v306_v3 = vpop.f32.mrf.mxu3  ;;  %1763 = vmatmul.bf16.vlgmr.msrb.gmra.mxu1 %v4275_v58  ;;  %v3180_v54 = vor.u32 %v3543_v47, %v3179_v46  ;;  %v2731_v63 = vld [vmem:[%s5282_s5 + $0x270] sm:$0xf]  ;;  %v3466_v46 = vld [vmem:[%s5282_s5 + $0x3a0] sm:$0xf0]  ;;  %v3456_v47 = vld [vmem:[%s5282_s5 + $0x354] sm:$0xf]  ;;  %v2648_v53 = vor.u32 %v3410_v44, %v2647_v43 }
 0x113   :  { %v307_v6 = vadd.f32 %v306_v3, %v105_v56  ;;  %1802 = vmatmul.bf16.vlgmr.msra.gmra.mxu0 %v4283_v62  ;;  %1859 = vmatpush.bf16.msrb.mxu1 %v2620_v57  ;;  %v282_v7 = vpop.f32.mrf.mxu1  ;;  %v3368_v56 = vld [vmem:[%s5282_s5 + $0x90] sm:$0xf0]  ;;  %v2760_v57 = vor.u32 %v3438_v50, %v2759_v49  ;;  %v3487_v3 = vld [vmem:[%s5282_s5 + $0x448] sm:$0xf0]  ;;  %v2957_v41 = vld [vmem:[%s5282_s5 + $0x44c] sm:$0xf0] }
 0x114   :  { %v324_v11 = vmax.f32 %v294_v2, 0.0  ;;  %1898 = vmatpush.bf16.msra.mxu0 %v3292_v59  ;;  %v321_v12 = vpop.f32.mrf.mxu0  ;;  %v3151_v59 = vld [vmem:[%s5282_s5 + $0x5b8] sm:$0xf]  ;;  %v2480_v1 = vor.u32 %v3368_v56, %v2479_v55  ;;  %v2955_v2 = vld [vmem:[%s5282_s5 + $0x430] sm:$0xf]  ;;  %v2732_v7 = vor.u32 %v3431_v0, %v2731_v63 }
 0x115   :  { %v325_v16 = vmax.f32 %v307_v6, 0.0  ;;  %v3152_v4 = vor.u32 %v3536_v60, %v3151_v59  ;;  %v3361_v6 = vld [vmem:[%s5282_s5 + $0x58] sm:$0xf0]  ;;  %v2956_v10 = vor.u32 %v3487_v3, %v2955_v2  ;;  %v3424_v12 = vld [vmem:[%s5282_s5 + $0x250] sm:$0xf0] }
 0x116   :  { %v4317_v20 = vpack.c.bf16 %v324_v11, %v324_v11  ;;  %v2703_v11 = vld [vmem:[%s5282_s5 + $0x238] sm:$0xf]  ;;  %v3512_v50 = vld [vmem:[%s5282_s5 + $0x514] sm:$0xf]  ;;  %v2565_v55 = vld [vmem:[%s5282_s5 + $0x13c] sm:$0xf0] }
 0x117   :  { %v4325_v24 = vpack.c.bf16 %v325_v16, %v325_v16  ;;  %1860 = vmatpush.bf16.msrb.mxu1 %v2592_v8  ;;  %v3123_v8 = vld [vmem:[%s5282_s5 + $0x580] sm:$0xf]  ;;  %v2423_v16 = vld [vmem:[%s5282_s5 + $0x8] sm:$0xf]  ;;  %v2704_v22 = vor.u32 %v3424_v12, %v2703_v11  ;;  %v3554_v59 = vld [vmem:[%s5282_s5 + $0x664] sm:$0xf] }
 0x118   :  { %1899 = vmatpush.bf16.msra.mxu0 %v3264_v13  ;;  %1776 = vmatmul.bf16.vlgmr.msrb.gmra.mxu2 %v4317_v20  ;;  %v2452_v13 = vor.u32 %v3361_v6, %v2451_v5  ;;  %v3237_v60 = vld [vmem:[%s5282_s5 + $0x67c] sm:$0xf0]  ;;  %v3449_v63 = vld [vmem:[%s5282_s5 + $0x31c] sm:$0xf]  ;;  %v2817_v0 = vld [vmem:[%s5282_s5 + $0x334] sm:$0xf0] }
 0x119   :  { %1789 = vmatmul.bf16.vlgmr.msrb.gmra.mxu3 %v4325_v24  ;;  %1872 = vmatpush.bf16.msrb.mxu2 %v2844_v17  ;;  %v295_v31 = vpop.f32.mrf.mxu2  ;;  %v3124_v17 = vor.u32 %v3529_v9, %v3123_v8  ;;  %v3505_v2 = vld [vmem:[%s5282_s5 + $0x4dc] sm:$0xf]  ;;  %v3041_v3 = vld [vmem:[%s5282_s5 + $0x4f4] sm:$0xf0]  ;;  %v3379_v5 = vld [vmem:[%s5282_s5 + $0xec] sm:$0xf] }
 0x11a   :  { %1885 = vmatpush.bf16.msrb.mxu3 %v3068_v21  ;;  %v308_v35 = vpop.f32.mrf.mxu3  ;;  %v3522_v21 = vld [vmem:[%s5282_s5 + $0x560] sm:$0xf0]  ;;  %v2424_v31 = vor.u32 %v3354_v18, %v2423_v16  ;;  %v2537_v6 = vld [vmem:[%s5282_s5 + $0x104] sm:$0xf0]  ;;  %v3547_v8 = vld [vmem:[%s5282_s5 + $0x62c] sm:$0xf] }
 0x11b   :  { %1861 = vmatpush.bf16.msrb.mxu1 %v2564_v25  ;;  %v2621_v25 = vld [vmem:[%s5282_s5 + $0x1ac] sm:$0xf0]  ;;  %v3096_v34 = vor.u32 %v3522_v21, %v3095_v19  ;;  %v3209_v9 = vld [vmem:[%s5282_s5 + $0x644] sm:$0xf0]  ;;  %v3442_v11 = vld [vmem:[%s5282_s5 + $0x2e4] sm:$0xf] }
 0x11c   :  { %1900 = vmatpush.bf16.msra.mxu0 %v3236_v28  ;;  %v3293_v28 = vld [vmem:[%s5282_s5 + $0x6ec] sm:$0xf0]  ;;  %v2624_v35 = vor.u32 %v3400_v23, %v2621_v25  ;;  %v2789_v12 = vld [vmem:[%s5282_s5 + $0x2fc] sm:$0xf0]  ;;  %v3212_v16 = vor.u32 %v3547_v8, %v3209_v9  ;;  %v3540_v21 = vld [vmem:[%s5282_s5 + $0x5f4] sm:$0xf]  ;;  %v3016_v23 = vor.u32 %v3498_v14, %v3013_v15 }
 0x11d   :  { %1873 = vmatpush.bf16.msrb.mxu2 %v2816_v32  ;;  %v2899_v32 = vld [vmem:[%s5282_s5 + $0x3c0] sm:$0xf]  ;;  %v3296_v37 = vor.u32 %v3568_v26, %v3293_v28  ;;  %v2509_v18 = vld [vmem:[%s5282_s5 + $0xcc] sm:$0xf0]  ;;  %v2792_v19 = vor.u32 %v3442_v11, %v2789_v12  ;;  %v3435_v25 = vld [vmem:[%s5282_s5 + $0x2ac] sm:$0xf] }
 0x11e   :  { %1886 = vmatpush.bf16.msrb.mxu3 %v3040_v36  ;;  %v3393_v36 = vld [vmem:[%s5282_s5 + $0x15c] sm:$0xf]  ;;  %v2761_v26 = vld [vmem:[%s5282_s5 + $0x2c4] sm:$0xf0]  ;;  %v3491_v28 = vld [vmem:[%s5282_s5 + $0x46c] sm:$0xf] }
 0x11f   :  { %1862 = vmatpush.bf16.msrb.mxu1 %v2536_v39  ;;  %v2593_v39 = vld [vmem:[%s5282_s5 + $0x174] sm:$0xf0]  ;;  %v3358_v43 = vld [vmem:[%s5282_s5 + $0x44] sm:$0xf]  ;;  %v2453_v44 = vld [vmem:[%s5282_s5 + $0x5c] sm:$0xf0] }
 0x120   :  { %1901 = vmatpush.bf16.msra.mxu0 %v3208_v42  ;;  %v2900_v42 = vor.u32 %v3473_v33, %v2899_v32  ;;  %v2596_v49 = vor.u32 %v3393_v36, %v2593_v39  ;;  %v2481_v32 = vld [vmem:[%s5282_s5 + $0x94] sm:$0xf0]  ;;  %v2764_v33 = vor.u32 %v3435_v25, %v2761_v26  ;;  %v2988_v36 = vor.u32 %v3491_v28, %v2985_v29  ;;  %v3271_v14 = vld [vmem:[%s5282_s5 + $0x6a0] sm:$0xf]  ;;  %v3565_v15 = vld [vmem:[%s5282_s5 + $0x6b8] sm:$0xf0] }
 0x121   :  { %1874 = vmatpush.bf16.msrb.mxu2 %v2788_v45  ;;  %v2871_v45 = vld [vmem:[%s5282_s5 + $0x388] sm:$0xf]  ;;  %v3075_v26 = vld [vmem:[%s5282_s5 + $0x518] sm:$0xf]  ;;  %v3272_v28 = vor.u32 %v3565_v15, %v3271_v14  ;;  %v3488_v15 = vld [vmem:[%s5282_s5 + $0x450] sm:$0xf0] }
 0x122   :  { %1887 = vmatpush.bf16.msrb.mxu3 %v3012_v48  ;;  %1815 = vmatmul.bf16.vlgmr.msra.gmra.mxu1 %v4275_v58  ;;  %v2845_v48 = vld [vmem:[%s5282_s5 + $0x36c] sm:$0xf0]  ;;  %v2872_v56 = vor.u32 %v3466_v46, %v2871_v45  ;;  %v3526_v46 = vld [vmem:[%s5282_s5 + $0x584] sm:$0xf]  ;;  %v2963_v14 = vld [vmem:[%s5282_s5 + $0x438] sm:$0xf] }
 0x123   :  { %1854 = vmatmul.bf16.vlgmr.msrb.gmra.mxu0 %v4283_v62  ;;  %1863 = vmatpush.bf16.msrb.mxu1 %v2508_v51  ;;  %v3069_v51 = vld [vmem:[%s5282_s5 + $0x52c] sm:$0xf0] }
 0x124   :  { %1902 = vmatpush.bf16.msra.mxu0 %v3180_v54  ;;  %v3386_v54 = vld [vmem:[%s5282_s5 + $0x124] sm:$0xf] }
 0x125   :  { %1875 = vmatpush.bf16.msrb.mxu2 %v2760_v57  ;;  %v2848_v57 = vor.u32 %v3456_v47, %v2845_v48  ;;  %v3125_v47 = vld [vmem:[%s5282_s5 + $0x59c] sm:$0xf0]  ;;  %v2960_v48 = vor.u32 %v3484_v40, %v2957_v41  ;;  %v3509_v41 = vld [vmem:[%s5282_s5 + $0x4f8] sm:$0xf0] }
 0x126   :  { %1888 = vmatpush.bf16.msrb.mxu3 %v2984_v61  ;;  %v3072_v61 = vor.u32 %v3512_v50, %v3069_v51  ;;  %v2705_v50 = vld [vmem:[%s5282_s5 + $0x254] sm:$0xf0]  ;;  %v2456_v51 = vor.u32 %v3358_v43, %v2453_v44  ;;  %v3047_v40 = vld [vmem:[%s5282_s5 + $0x4e0] sm:$0xf]  ;;  %v2543_v43 = vld [vmem:[%s5282_s5 + $0xf0] sm:$0xf] }
 0x127   :  { %1864 = vmatpush.bf16.msrb.mxu1 %v2480_v1  ;;  %v2568_v1 = vor.u32 %v3386_v54, %v2565_v55  ;;  %v3351_v54 = vld [vmem:[%s5282_s5 + $0xc] sm:$0xf]  ;;  %v3128_v55 = vor.u32 %v3526_v46, %v3125_v47  ;;  %v3215_v46 = vld [vmem:[%s5282_s5 + $0x630] sm:$0xf] }
 0x128   :  { %1903 = vmatpush.bf16.msra.mxu0 %v3152_v4  ;;  %1828 = vmatmul.bf16.vlgmr.msra.gmra.mxu2 %v4317_v20  ;;  %v3240_v4 = vor.u32 %v3554_v59, %v3237_v60  ;;  %v3097_v59 = vld [vmem:[%s5282_s5 + $0x564] sm:$0xf0]  ;;  %v3383_v44 = vld [vmem:[%s5282_s5 + $0x108] sm:$0xf0] }
 0x129   :  { %1841 = vmatmul.bf16.vlgmr.msra.gmra.mxu3 %v4325_v24  ;;  %1876 = vmatpush.bf16.msrb.mxu2 %v2732_v7  ;;  %v2820_v7 = vor.u32 %v3449_v63, %v2817_v0  ;;  %v3404_v63 = vld [vmem:[%s5282_s5 + $0x1b0] sm:$0xf0]  ;;  %v3299_v0 = vld [vmem:[%s5282_s5 + $0x6d8] sm:$0xf]  ;;  %v3551_v47 = vld [vmem:[%s5282_s5 + $0x648] sm:$0xf0] }
 0x12a   :  { %1889 = vmatpush.bf16.msrb.mxu3 %v2956_v10  ;;  %v3044_v10 = vor.u32 %v3505_v2, %v3041_v3  ;;  %v3572_v2 = vld [vmem:[%s5282_s5 + $0x6f0] sm:$0xf0]  ;;  %v3414_v3 = vld [vmem:[%s5282_s5 + $0x204] sm:$0xf] }
 0x12b   :  { %1865 = vmatpush.bf16.msrb.mxu1 %v2452_v13  ;;  %v2540_v13 = vor.u32 %v3379_v5, %v2537_v6  ;;  %v3470_v6 = vld [vmem:[%s5282_s5 + $0x3c4] sm:$0xf]  ;;  %v3300_v11 = vor.u32 %v3572_v2, %v3299_v0  ;;  %v3439_v0 = vld [vmem:[%s5282_s5 + $0x2c8] sm:$0xf0]  ;;  %v2991_v2 = vld [vmem:[%s5282_s5 + $0x470] sm:$0xf] }
 0x12c   :  { %1904 = vmatpush.bf16.msra.mxu0 %v3124_v17  ;;  %v3372_v17 = vld [vmem:[%s5282_s5 + $0xb4] sm:$0xf] }
 0x12d   :  { %1877 = vmatpush.bf16.msrb.mxu2 %v2704_v22  ;;  %v3181_v22 = vld [vmem:[%s5282_s5 + $0x60c] sm:$0xf0] }
 0x12e   :  { %1890 = vmatpush.bf16.msrb.mxu3 %v2928_v27  ;;  %v2512_v27 = vor.u32 %v3372_v17, %v2509_v18  ;;  %v3184_v30 = vor.u32 %v3540_v21, %v3181_v22  ;;  %v3407_v17 = vld [vmem:[%s5282_s5 + $0x1cc] sm:$0xf]  ;;  %v2649_v18 = vld [vmem:[%s5282_s5 + $0x1e4] sm:$0xf0]  ;;  %v2851_v22 = vld [vmem:[%s5282_s5 + $0x358] sm:$0xf] }
 0x12f   :  { %1866 = vmatpush.bf16.msrb.mxu1 %v2424_v31  ;;  %v3365_v31 = vld [vmem:[%s5282_s5 + $0x7c] sm:$0xf]  ;;  %v2873_v21 = vld [vmem:[%s5282_s5 + $0x3a4] sm:$0xf0]  ;;  %v2652_v29 = vor.u32 %v3407_v17, %v2649_v18  ;;  %v3362_v18 = vld [vmem:[%s5282_s5 + $0x60] sm:$0xf0] }
 0x130   :  { %1905 = vmatpush.bf16.msra.mxu0 %v3096_v34  ;;  %v3533_v34 = vld [vmem:[%s5282_s5 + $0x5bc] sm:$0xf]  ;;  %v2484_v39 = vor.u32 %v3365_v31, %v2481_v32  ;;  %v3390_v31 = vld [vmem:[%s5282_s5 + $0x140] sm:$0xf0]  ;;  %v2459_v17 = vld [vmem:[%s5282_s5 + $0x48] sm:$0xf] }
 0x131   :  { %1878 = vmatpush.bf16.msrb.mxu2 %v2676_v38  ;;  %v2733_v38 = vld [vmem:[%s5282_s5 + $0x28c] sm:$0xf0] }
 0x132   :  { %1891 = vmatpush.bf16.msrb.mxu3 %v2900_v42  ;;  %1867 = vmatmul.bf16.vlgmr.msrb.gmra.mxu1 %v4275_v58 }
 0x133   :  { %1911 = vmatpush.bf16.msra.mxu1 %v2624_v35  ;;  %1906 = vmatmul.bf16.vlgmr.msra.gmra.mxu0 %v4283_v62  ;;  %v3153_v35 = vld [vmem:[%s5282_s5 + $0x5d4] sm:$0xf0] }
 0x134   :  { %1950 = vmatpush.bf16.msrb.mxu0 %v3296_v37  ;;  %v3428_v37 = vld [vmem:[%s5282_s5 + $0x274] sm:$0xf]  ;;  %v3156_v42 = vor.u32 %v3533_v34, %v3153_v35  ;;  %v3243_v34 = vld [vmem:[%s5282_s5 + $0x668] sm:$0xf]  ;;  %v3558_v35 = vld [vmem:[%s5282_s5 + $0x680] sm:$0xf0] }
 0x135   :  { %1879 = vmatpush.bf16.msrb.mxu2 %v2648_v53  ;;  %v2736_v45 = vor.u32 %v3428_v37, %v2733_v38  ;;  %v2929_v53 = vld [vmem:[%s5282_s5 + $0x414] sm:$0xf0]  ;;  %v2823_v37 = vld [vmem:[%s5282_s5 + $0x320] sm:$0xf]  ;;  %v3453_v38 = vld [vmem:[%s5282_s5 + $0x338] sm:$0xf0] }
 0x136   :  { %1892 = vmatpush.bf16.msrb.mxu3 %v2872_v56  ;;  %v2425_v56 = vld [vmem:[%s5282_s5 + $0x24] sm:$0xf0] }
 0x137   :  { %1912 = vmatpush.bf16.msra.mxu1 %v2596_v49  ;;  %v3421_v49 = vld [vmem:[%s5282_s5 + $0x23c] sm:$0xf]  ;;  %v2428_v5 = vor.u32 %v3351_v54, %v2425_v56  ;;  %v3216_v54 = vor.u32 %v3551_v47, %v3215_v46  ;;  %v3376_v56 = vld [vmem:[%s5282_s5 + $0xd0] sm:$0xf0] }
 0x138   :  { %1951 = vmatpush.bf16.msrb.mxu0 %v3268_v52  ;;  %1880 = vmatmul.bf16.vlgmr.msrb.gmra.mxu2 %v4317_v20  ;;  %v3477_v52 = vld [vmem:[%s5282_s5 + $0x3fc] sm:$0xf]  ;;  %v2708_v60 = vor.u32 %v3421_v49, %v2705_v50  ;;  %v2795_v49 = vld [vmem:[%s5282_s5 + $0x2e8] sm:$0xf]  ;;  %v3446_v50 = vld [vmem:[%s5282_s5 + $0x300] sm:$0xf0] }
 0x139   :  { %1924 = vmatpush.bf16.msra.mxu2 %v2848_v57  ;;  %1893 = vmatmul.bf16.vlgmr.msrb.gmra.mxu3 %v4325_v24  ;;  %v3519_v57 = vld [vmem:[%s5282_s5 + $0x54c] sm:$0xf] }
 0x13a   :  { %1937 = vmatpush.bf16.msra.mxu3 %v3072_v61  ;;  %v2627_v61 = vld [vmem:[%s5282_s5 + $0x198] sm:$0xf]  ;;  %v3100_v8 = vor.u32 %v3519_v57, %v3097_v59  ;;  %v2796_v57 = vor.u32 %v3446_v50, %v2795_v49 }
 0x13b   :  { %1913 = vmatpush.bf16.msra.mxu1 %v2568_v1  ;;  %v2932_v1 = vor.u32 %v3477_v52, %v2929_v53  ;;  %v2628_v9 = vor.u32 %v3404_v63, %v2627_v61  ;;  %v3019_v52 = vld [vmem:[%s5282_s5 + $0x4a8] sm:$0xf]  ;;  %v3502_v53 = vld [vmem:[%s5282_s5 + $0x4c0] sm:$0xf0]  ;;  %v3187_v59 = vld [vmem:[%s5282_s5 + $0x5f8] sm:$0xf] }
 0x13c   :  { %1952 = vmatpush.bf16.msrb.mxu0 %v3240_v4  ;;  %v2677_v4 = vld [vmem:[%s5282_s5 + $0x21c] sm:$0xf0]  ;;  %v3020_v61 = vor.u32 %v3502_v53, %v3019_v52  ;;  %v2767_v63 = vld [vmem:[%s5282_s5 + $0x2b0] sm:$0xf]  ;;  %v3562_v52 = vld [vmem:[%s5282_s5 + $0x6a4] sm:$0xf] }
 0x13d   :  { %1925 = vmatpush.bf16.msra.mxu2 %v2820_v7  ;;  %v2901_v7 = vld [vmem:[%s5282_s5 + $0x3dc] sm:$0xf0]  ;;  %v2680_v12 = vor.u32 %v3414_v3, %v2677_v4  ;;  %v3495_v3 = vld [vmem:[%s5282_s5 + $0x488] sm:$0xf0] }
 0x13e   :  { %1938 = vmatpush.bf16.msra.mxu3 %v3044_v10  ;;  %v2599_v10 = vld [vmem:[%s5282_s5 + $0x160] sm:$0xf] }
 0x13f   :  { %1914 = vmatpush.bf16.msra.mxu1 %v2540_v13  ;;  %v3397_v13 = vld [vmem:[%s5282_s5 + $0x178] sm:$0xf0]  ;;  %v3273_v53 = vld [vmem:[%s5282_s5 + $0x6bc] sm:$0xf0] }
 0x140   :  { %1953 = vmatpush.bf16.msrb.mxu0 %v3212_v16  ;;  %v2904_v16 = vor.u32 %v3470_v6, %v2901_v7  ;;  %v2600_v25 = vor.u32 %v3397_v13, %v2599_v10  ;;  %v3369_v6 = vld [vmem:[%s5282_s5 + $0x98] sm:$0xf0]  ;;  %v2768_v7 = vor.u32 %v3439_v0, %v2767_v63  ;;  %v2992_v10 = vor.u32 %v3495_v3, %v2991_v2 }
 0x141   :  { %1926 = vmatpush.bf16.msra.mxu2 %v2792_v19  ;;  %v3463_v19 = vld [vmem:[%s5282_s5 + $0x38c] sm:$0xf]  ;;  %v3513_v0 = vld [vmem:[%s5282_s5 + $0x51c] sm:$0xf]  ;;  %v3276_v2 = vor.u32 %v3562_v52, %v3273_v53  ;;  %v2965_v53 = vld [vmem:[%s5282_s5 + $0x454] sm:$0xf0] }
 0x142   :  { %1939 = vmatpush.bf16.msra.mxu3 %v3016_v23  ;;  %v3460_v23 = vld [vmem:[%s5282_s5 + $0x370] sm:$0xf0]  ;;  %v2876_v32 = vor.u32 %v3463_v19, %v2873_v21  ;;  %v3131_v21 = vld [vmem:[%s5282_s5 + $0x588] sm:$0xf]  ;;  %v3485_v52 = vld [vmem:[%s5282_s5 + $0x43c] sm:$0xf] }
 0x143   :  { %1915 = vmatpush.bf16.msra.mxu1 %v2512_v27  ;;  %v3516_v27 = vld [vmem:[%s5282_s5 + $0x530] sm:$0xf0] }
 0x144   :  { %1954 = vmatpush.bf16.msrb.mxu0 %v3184_v30  ;;  %v2571_v30 = vld [vmem:[%s5282_s5 + $0x128] sm:$0xf] }
 0x145   :  { %1927 = vmatpush.bf16.msra.mxu2 %v2764_v33  ;;  %v2852_v33 = vor.u32 %v3460_v23, %v2851_v22  ;;  %v3530_v22 = vld [vmem:[%s5282_s5 + $0x5a0] sm:$0xf0]  ;;  %v2964_v23 = vor.u32 %v3488_v15, %v2963_v14  ;;  %v3049_v15 = vld [vmem:[%s5282_s5 + $0x4fc] sm:$0xf0] }
 0x146   :  { %1940 = vmatpush.bf16.msra.mxu3 %v2988_v36  ;;  %v3076_v36 = vor.u32 %v3516_v27, %v3075_v26  ;;  %v3425_v26 = vld [vmem:[%s5282_s5 + $0x258] sm:$0xf0]  ;;  %v2460_v27 = vor.u32 %v3362_v18, %v2459_v17  ;;  %v3506_v14 = vld [vmem:[%s5282_s5 + $0x4e4] sm:$0xf]  ;;  %v3380_v17 = vld [vmem:[%s5282_s5 + $0xf4] sm:$0xf] }
 0x147   :  { %1916 = vmatpush.bf16.msra.mxu1 %v2484_v39  ;;  %v2572_v39 = vor.u32 %v3390_v31, %v2571_v30  ;;  %v2431_v30 = vld [vmem:[%s5282_s5 + $0x10] sm:$0xf]  ;;  %v3132_v31 = vor.u32 %v3530_v22, %v3131_v21  ;;  %v3548_v21 = vld [vmem:[%s5282_s5 + $0x634] sm:$0xf] }
 0x148   :  { %1955 = vmatpush.bf16.msrb.mxu0 %v3156_v42  ;;  %v3244_v42 = vor.u32 %v3558_v35, %v3243_v34  ;;  %v3523_v34 = vld [vmem:[%s5282_s5 + $0x568] sm:$0xf0]  ;;  %v2545_v18 = vld [vmem:[%s5282_s5 + $0x10c] sm:$0xf0] }
 0x149   :  { %1928 = vmatpush.bf16.msra.mxu2 %v2736_v45  ;;  %v2824_v45 = vor.u32 %v3453_v38, %v2823_v37  ;;  %v2629_v37 = vld [vmem:[%s5282_s5 + $0x1b4] sm:$0xf0]  ;;  %v3569_v38 = vld [vmem:[%s5282_s5 + $0x6dc] sm:$0xf]  ;;  %v3217_v22 = vld [vmem:[%s5282_s5 + $0x64c] sm:$0xf0] }
 0x14a   :  { %1941 = vmatpush.bf16.msra.mxu3 %v2960_v48  ;;  %v3048_v48 = vor.u32 %v3509_v41, %v3047_v40  ;;  %v3301_v40 = vld [vmem:[%s5282_s5 + $0x6f4] sm:$0xf0]  ;;  %v2683_v41 = vld [vmem:[%s5282_s5 + $0x208] sm:$0xf] }
 0x14b   :  { %1917 = vmatpush.bf16.msra.mxu1 %v2456_v51  ;;  %v2544_v51 = vor.u32 %v3383_v44, %v2543_v43  ;;  %v2907_v44 = vld [vmem:[%s5282_s5 + $0x3c8] sm:$0xf]  ;;  %v3304_v49 = vor.u32 %v3569_v38, %v3301_v40  ;;  %v2769_v38 = vld [vmem:[%s5282_s5 + $0x2cc] sm:$0xf0]  ;;  %v3492_v40 = vld [vmem:[%s5282_s5 + $0x474] sm:$0xf] }
 0x14c   :  { %1956 = vmatpush.bf16.msrb.mxu0 %v3128_v55  ;;  %v2515_v55 = vld [vmem:[%s5282_s5 + $0xb8] sm:$0xf] }
 0x14d   :  { %1929 = vmatpush.bf16.msra.mxu2 %v2708_v60  ;;  %v3544_v60 = vld [vmem:[%s5282_s5 + $0x610] sm:$0xf0] }
 0x14e   :  { %1942 = vmatpush.bf16.msra.mxu3 %v2932_v1  ;;  %v2516_v1 = vor.u32 %v3376_v56, %v2515_v55  ;;  %v3188_v4 = vor.u32 %v3544_v60, %v3187_v59  ;;  %v2655_v55 = vld [vmem:[%s5282_s5 + $0x1d0] sm:$0xf]  ;;  %v3411_v56 = vld [vmem:[%s5282_s5 + $0x1e8] sm:$0xf0]  ;;  %v3457_v60 = vld [vmem:[%s5282_s5 + $0x35c] sm:$0xf] }
 0x14f   :  { %1918 = vmatpush.bf16.msra.mxu1 %v2428_v5  ;;  %v2487_v5 = vld [vmem:[%s5282_s5 + $0x80] sm:$0xf]  ;;  %v3467_v59 = vld [vmem:[%s5282_s5 + $0x3a8] sm:$0xf0]  ;;  %v2656_v3 = vor.u32 %v3411_v56, %v2655_v55  ;;  %v2461_v56 = vld [vmem:[%s5282_s5 + $0x64] sm:$0xf0] }
 0x150   :  { %1957 = vmatpush.bf16.msrb.mxu0 %v3100_v8  ;;  %v3159_v8 = vld [vmem:[%s5282_s5 + $0x5c0] sm:$0xf]  ;;  %v2488_v13 = vor.u32 %v3369_v6, %v2487_v5  ;;  %v2573_v5 = vld [vmem:[%s5282_s5 + $0x144] sm:$0xf0]  ;;  %v3359_v55 = vld [vmem:[%s5282_s5 + $0x4c] sm:$0xf] }
 0x151   :  { %1930 = vmatpush.bf16.msra.mxu2 %v2680_v12  ;;  %v3432_v12 = vld [vmem:[%s5282_s5 + $0x290] sm:$0xf0] }
 0x152   :  { %1943 = vmatpush.bf16.msra.mxu3 %v2904_v16  ;;  %1919 = vmatmul.bf16.vlgmr.msra.gmra.mxu1 %v4275_v58 }
 0x153   :  { %1963 = vmatpush.bf16.msrb.mxu1 %v2628_v9  ;;  %1958 = vmatmul.bf16.vlgmr.msrb.gmra.mxu0 %v4283_v62  ;;  %v3537_v9 = vld [vmem:[%s5282_s5 + $0x5d8] sm:$0xf0] }
 0x154   :  { %2002 = vmatpush.bf16.msra.mxu0 %v3300_v11  ;;  %v2739_v11 = vld [vmem:[%s5282_s5 + $0x278] sm:$0xf]  ;;  %v3160_v16 = vor.u32 %v3537_v9, %v3159_v8  ;;  %v3555_v8 = vld [vmem:[%s5282_s5 + $0x66c] sm:$0xf]  ;;  %v3245_v9 = vld [vmem:[%s5282_s5 + $0x684] sm:$0xf0] }
 0x155   :  { %1931 = vmatpush.bf16.msra.mxu2 %v2652_v29  ;;  %v2740_v19 = vor.u32 %v3432_v12, %v2739_v11  ;;  %v3481_v29 = vld [vmem:[%s5282_s5 + $0x418] sm:$0xf0]  ;;  %v3450_v11 = vld [vmem:[%s5282_s5 + $0x324] sm:$0xf]  ;;  %v2825_v12 = vld [vmem:[%s5282_s5 + $0x33c] sm:$0xf0] }
 0x156   :  { %1944 = vmatpush.bf16.msra.mxu3 %v2876_v32  ;;  %v3355_v32 = vld [vmem:[%s5282_s5 + $0x28] sm:$0xf0] }
 0x157   :  { %1964 = vmatpush.bf16.msrb.mxu1 %v2600_v25  ;;  %v2711_v25 = vld [vmem:[%s5282_s5 + $0x240] sm:$0xf]  ;;  %v2432_v43 = vor.u32 %v3355_v32, %v2431_v30  ;;  %v3220_v30 = vor.u32 %v3548_v21, %v3217_v22  ;;  %v2517_v32 = vld [vmem:[%s5282_s5 + $0xd4] sm:$0xf0] }
 0x158   :  { %2003 = vmatpush.bf16.msra.mxu0 %v3272_v28  ;;  %1932 = vmatmul.bf16.vlgmr.msra.gmra.mxu2 %v4317_v20  ;;  %v2935_v28 = vld [vmem:[%s5282_s5 + $0x400] sm:$0xf]  ;;  %v2712_v35 = vor.u32 %v3425_v26, %v2711_v25  ;;  %v3443_v25 = vld [vmem:[%s5282_s5 + $0x2ec] sm:$0xf]  ;;  %v2797_v26 = vld [vmem:[%s5282_s5 + $0x304] sm:$0xf0] }
 0x159   :  { %1976 = vmatpush.bf16.msrb.mxu2 %v2852_v33  ;;  %1945 = vmatmul.bf16.vlgmr.msra.gmra.mxu3 %v4325_v24  ;;  %v3103_v33 = vld [vmem:[%s5282_s5 + $0x550] sm:$0xf] }
 0x15a   :  { %1989 = vmatpush.bf16.msrb.mxu3 %v3076_v36  ;;  %v3401_v36 = vld [vmem:[%s5282_s5 + $0x19c] sm:$0xf]  ;;  %v3104_v46 = vor.u32 %v3523_v34, %v3103_v33  ;;  %v2800_v33 = vor.u32 %v3443_v25, %v2797_v26 }
 0x15b   :  { %1965 = vmatpush.bf16.msrb.mxu1 %v2572_v39  ;;  %v2936_v39 = vor.u32 %v3481_v29, %v2935_v28  ;;  %v2632_v47 = vor.u32 %v3401_v36, %v2629_v37  ;;  %v3499_v28 = vld [vmem:[%s5282_s5 + $0x4ac] sm:$0xf]  ;;  %v3021_v29 = vld [vmem:[%s5282_s5 + $0x4c4] sm:$0xf0]  ;;  %v3541_v34 = vld [vmem:[%s5282_s5 + $0x5fc] sm:$0xf] }
 0x15c   :  { %2004 = vmatpush.bf16.msra.mxu0 %v3244_v42  ;;  %v3418_v42 = vld [vmem:[%s5282_s5 + $0x220] sm:$0xf0]  ;;  %v3024_v36 = vor.u32 %v3499_v28, %v3021_v29  ;;  %v3436_v37 = vld [vmem:[%s5282_s5 + $0x2b4] sm:$0xf]  ;;  %v3279_v28 = vld [vmem:[%s5282_s5 + $0x6a8] sm:$0xf] }
 0x15d   :  { %1977 = vmatpush.bf16.msrb.mxu2 %v2824_v45  ;;  %v3474_v45 = vld [vmem:[%s5282_s5 + $0x3e0] sm:$0xf0]  ;;  %v2684_v50 = vor.u32 %v3418_v42, %v2683_v41  ;;  %v2993_v41 = vld [vmem:[%s5282_s5 + $0x48c] sm:$0xf0] }
 0x15e   :  { %1990 = vmatpush.bf16.msrb.mxu3 %v3048_v48  ;;  %v3394_v48 = vld [vmem:[%s5282_s5 + $0x164] sm:$0xf] }
 0x15f   :  { %1966 = vmatpush.bf16.msrb.mxu1 %v2544_v51  ;;  %v2601_v51 = vld [vmem:[%s5282_s5 + $0x17c] sm:$0xf0]  ;;  %v3566_v29 = vld [vmem:[%s5282_s5 + $0x6c0] sm:$0xf0] }
 0x160   :  { %2005 = vmatpush.bf16.msra.mxu0 %v3216_v54  ;;  %v2908_v54 = vor.u32 %v3474_v45, %v2907_v44  ;;  %v2604_v63 = vor.u32 %v3394_v48, %v2601_v51  ;;  %v2489_v44 = vld [vmem:[%s5282_s5 + $0x9c] sm:$0xf0]  ;;  %v2772_v45 = vor.u32 %v3436_v37, %v2769_v38  ;;  %v2996_v48 = vor.u32 %v3492_v40, %v2993_v41 }
 0x161   :  { %1978 = vmatpush.bf16.msrb.mxu2 %v2796_v57  ;;  %v2879_v57 = vld [vmem:[%s5282_s5 + $0x390] sm:$0xf]  ;;  %v3083_v38 = vld [vmem:[%s5282_s5 + $0x520] sm:$0xf]  ;;  %v3280_v40 = vor.u32 %v3566_v29, %v3279_v28 }
 0x162   :  { %1991 = vmatpush.bf16.msrb.mxu3 %v3020_v61  ;;  %v2853_v61 = vld [vmem:[%s5282_s5 + $0x374] sm:$0xf0]  ;;  %v2880_v6 = vor.u32 %v3467_v59, %v2879_v57  ;;  %v3527_v59 = vld [vmem:[%s5282_s5 + $0x58c] sm:$0xf]  ;;  %v2747_v29 = vld [vmem:[%s5282_s5 + $0x280] sm:$0xf] }
 0x163   :  { %1967 = vmatpush.bf16.msrb.mxu1 %v2516_v1  ;;  %v3077_v1 = vld [vmem:[%s5282_s5 + $0x534] sm:$0xf0] }
 0x164   :  { %2006 = vmatpush.bf16.msra.mxu0 %v3188_v4  ;;  %v3387_v4 = vld [vmem:[%s5282_s5 + $0x12c] sm:$0xf] }
 0x165   :  { %1979 = vmatpush.bf16.msrb.mxu2 %v2768_v7  ;;  %v2856_v7 = vor.u32 %v3457_v60, %v2853_v61  ;;  %v3133_v60 = vld [vmem:[%s5282_s5 + $0x5a4] sm:$0xf0]  ;;  %v2968_v61 = vor.u32 %v3485_v52, %v2965_v53  ;;  %v3510_v53 = vld [vmem:[%s5282_s5 + $0x500] sm:$0xf0] }
 0x166   :  { %1992 = vmatpush.bf16.msrb.mxu3 %v2992_v10  ;;  %v3080_v10 = vor.u32 %v3513_v0, %v3077_v1  ;;  %v2713_v0 = vld [vmem:[%s5282_s5 + $0x25c] sm:$0xf0]  ;;  %v2464_v1 = vor.u32 %v3359_v55, %v2461_v56  ;;  %v3055_v52 = vld [vmem:[%s5282_s5 + $0x4e8] sm:$0xf]  ;;  %v2551_v55 = vld [vmem:[%s5282_s5 + $0xf8] sm:$0xf] }
 0x167   :  { %1968 = vmatpush.bf16.msrb.mxu1 %v2488_v13  ;;  %v2576_v13 = vor.u32 %v3387_v4, %v2573_v5  ;;  %v3352_v4 = vld [vmem:[%s5282_s5 + $0x14] sm:$0xf]  ;;  %v3136_v5 = vor.u32 %v3527_v59, %v3133_v60  ;;  %v3223_v59 = vld [vmem:[%s5282_s5 + $0x638] sm:$0xf] }
 0x168   :  { %2007 = vmatpush.bf16.msra.mxu0 %v3160_v16  ;;  %v3248_v16 = vor.u32 %v3555_v8, %v3245_v9  ;;  %v3105_v8 = vld [vmem:[%s5282_s5 + $0x56c] sm:$0xf0]  ;;  %v3384_v56 = vld [vmem:[%s5282_s5 + $0x110] sm:$0xf0] }
 0x169   :  { %1980 = vmatpush.bf16.msrb.mxu2 %v2740_v19  ;;  %v2828_v19 = vor.u32 %v3450_v11, %v2825_v12  ;;  %v3405_v11 = vld [vmem:[%s5282_s5 + $0x1b8] sm:$0xf0]  ;;  %v3307_v12 = vld [vmem:[%s5282_s5 + $0x6e0] sm:$0xf]  ;;  %v3552_v60 = vld [vmem:[%s5282_s5 + $0x650] sm:$0xf0] }
 0x16a   :  { %1993 = vmatpush.bf16.msrb.mxu3 %v2964_v23  ;;  %v3052_v23 = vor.u32 %v3506_v14, %v3049_v15  ;;  %v3573_v14 = vld [vmem:[%s5282_s5 + $0x6f8] sm:$0xf0]  ;;  %v3415_v15 = vld [vmem:[%s5282_s5 + $0x20c] sm:$0xf] }
 0x16b   :  { %1969 = vmatpush.bf16.msrb.mxu1 %v2460_v27  ;;  %v2548_v27 = vor.u32 %v3380_v17, %v2545_v18  ;;  %v3471_v18 = vld [vmem:[%s5282_s5 + $0x3cc] sm:$0xf]  ;;  %v3308_v25 = vor.u32 %v3573_v14, %v3307_v12  ;;  %v3440_v14 = vld [vmem:[%s5282_s5 + $0x2d0] sm:$0xf0] }
 0x16c   :  { %2008 = vmatpush.bf16.msra.mxu0 %v3132_v31  ;;  %v3373_v31 = vld [vmem:[%s5282_s5 + $0xbc] sm:$0xf] }
 0x16d   :  { %1981 = vmatpush.bf16.msrb.mxu2 %v2712_v35  ;;  %v3189_v35 = vld [vmem:[%s5282_s5 + $0x614] sm:$0xf0] }
 0x16e   :  { %1994 = vmatpush.bf16.msrb.mxu3 %v2936_v39  ;;  %v2520_v39 = vor.u32 %v3373_v31, %v2517_v32  ;;  %v3192_v42 = vor.u32 %v3541_v34, %v3189_v35  ;;  %v3408_v31 = vld [vmem:[%s5282_s5 + $0x1d4] sm:$0xf]  ;;  %v2657_v32 = vld [vmem:[%s5282_s5 + $0x1ec] sm:$0xf0]  ;;  %v2859_v35 = vld [vmem:[%s5282_s5 + $0x360] sm:$0xf] }
 0x16f   :  { %1970 = vmatpush.bf16.msrb.mxu1 %v2432_v43  ;;  %v3366_v43 = vld [vmem:[%s5282_s5 + $0x84] sm:$0xf]  ;;  %v2881_v34 = vld [vmem:[%s5282_s5 + $0x3ac] sm:$0xf0]  ;;  %v2660_v41 = vor.u32 %v3408_v31, %v2657_v32 }
 0x170   :  { %2009 = vmatpush.bf16.msra.mxu0 %v3104_v46  ;;  %v3534_v46 = vld [vmem:[%s5282_s5 + $0x5c4] sm:$0xf]  ;;  %v2492_v51 = vor.u32 %v3366_v43, %v2489_v44  ;;  %v3391_v43 = vld [vmem:[%s5282_s5 + $0x148] sm:$0xf0] }
 0x171   :  { %1982 = vmatpush.bf16.msrb.mxu2 %v2684_v50  ;;  %v2741_v50 = vld [vmem:[%s5282_s5 + $0x294] sm:$0xf0] }
 0x172   :  { %1995 = vmatpush.bf16.msrb.mxu3 %v2908_v54  ;;  %1971 = vmatmul.bf16.vlgmr.msrb.gmra.mxu1 %v4275_v58 }
 0x173   :  { %2015 = vmatpush.bf16.msra.mxu1 %v2632_v47  ;;  %2010 = vmatmul.bf16.vlgmr.msra.gmra.mxu0 %v4283_v62  ;;  %v3161_v47 = vld [vmem:[%s5282_s5 + $0x5dc] sm:$0xf0] }
 0x174   :  { %2054 = vmatpush.bf16.msrb.mxu0 %v3304_v49  ;;  %v3429_v49 = vld [vmem:[%s5282_s5 + $0x27c] sm:$0xf]  ;;  %v3164_v54 = vor.u32 %v3534_v46, %v3161_v47  ;;  %v3251_v46 = vld [vmem:[%s5282_s5 + $0x670] sm:$0xf]  ;;  %v3559_v47 = vld [vmem:[%s5282_s5 + $0x688] sm:$0xf0] }
 0x175   :  { %1983 = vmatpush.bf16.msrb.mxu2 %v2656_v3  ;;  %v2744_v57 = vor.u32 %v3429_v49, %v2741_v50  ;;  %v2937_v3 = vld [vmem:[%s5282_s5 + $0x41c] sm:$0xf0]  ;;  %v2831_v49 = vld [vmem:[%s5282_s5 + $0x328] sm:$0xf]  ;;  %v3454_v50 = vld [vmem:[%s5282_s5 + $0x340] sm:$0xf0] }
 0x176   :  { %1996 = vmatpush.bf16.msrb.mxu3 %v2880_v6  ;;  %v2433_v6 = vld [vmem:[%s5282_s5 + $0x2c] sm:$0xf0] }
 0x177   :  { %2016 = vmatpush.bf16.msra.mxu1 %v2604_v63  ;;  %v3422_v63 = vld [vmem:[%s5282_s5 + $0x244] sm:$0xf]  ;;  %v2436_v17 = vor.u32 %v3352_v4, %v2433_v6  ;;  %v3503_v4 = vld [vmem:[%s5282_s5 + $0x4c8] sm:$0xf0]  ;;  %v3224_v6 = vor.u32 %v3552_v60, %v3223_v59 }
 0x178   :  { %2055 = vmatpush.bf16.msrb.mxu0 %v3276_v2  ;;  %1984 = vmatmul.bf16.vlgmr.msrb.gmra.mxu2 %v4317_v20  ;;  %v3478_v2 = vld [vmem:[%s5282_s5 + $0x404] sm:$0xf]  ;;  %v2716_v9 = vor.u32 %v3422_v63, %v2713_v0  ;;  %v2803_v63 = vld [vmem:[%s5282_s5 + $0x2f0] sm:$0xf]  ;;  %v3447_v0 = vld [vmem:[%s5282_s5 + $0x308] sm:$0xf0] }
 0x179   :  { %2028 = vmatpush.bf16.msra.mxu2 %v2856_v7  ;;  %1997 = vmatmul.bf16.vlgmr.msrb.gmra.mxu3 %v4325_v24  ;;  %v3520_v7 = vld [vmem:[%s5282_s5 + $0x554] sm:$0xf] }
 0x17a   :  { %2041 = vmatpush.bf16.msra.mxu3 %v3080_v10  ;;  %v2635_v10 = vld [vmem:[%s5282_s5 + $0x1a0] sm:$0xf]  ;;  %v3108_v21 = vor.u32 %v3520_v7, %v3105_v8  ;;  %v3377_v8 = vld [vmem:[%s5282_s5 + $0xd8] sm:$0xf0] }
 0x17b   :  { %2017 = vmatpush.bf16.msra.mxu1 %v2576_v13  ;;  %v2940_v13 = vor.u32 %v3478_v2, %v2937_v3  ;;  %v2636_v22 = vor.u32 %v3405_v11, %v2635_v10  ;;  %v2552_v2 = vor.u32 %v3384_v56, %v2551_v55  ;;  %v3027_v3 = vld [vmem:[%s5282_s5 + $0x4b0] sm:$0xf]  ;;  %v2523_v7 = vld [vmem:[%s5282_s5 + $0xc0] sm:$0xf]  ;;  %v3545_v11 = vld [vmem:[%s5282_s5 + $0x618] sm:$0xf0] }
 0x17c   :  { %2056 = vmatpush.bf16.msrb.mxu0 %v3248_v16  ;;  %v2685_v16 = vld [vmem:[%s5282_s5 + $0x224] sm:$0xf0]  ;;  %v3195_v10 = vld [vmem:[%s5282_s5 + $0x600] sm:$0xf]  ;;  %v3028_v12 = vor.u32 %v3503_v4, %v3027_v3  ;;  %v3111_v56 = vld [vmem:[%s5282_s5 + $0x558] sm:$0xf] }
 0x17d   :  { %2029 = vmatpush.bf16.msra.mxu2 %v2828_v19  ;;  %v2909_v19 = vld [vmem:[%s5282_s5 + $0x3e4] sm:$0xf0]  ;;  %v2688_v26 = vor.u32 %v3415_v15, %v2685_v16  ;;  %v5170_v15 = vld [vmem:[%s5283_s6] sm:$0x7f]  ;;  %v2524_v16 = vor.u32 %v3377_v8, %v2523_v7  ;;  %v3475_v3 = vld [vmem:[%s5282_s5 + $0x3e8] sm:$0xf0] }
 0x17e   :  { %2042 = vmatpush.bf16.msra.mxu3 %v3052_v23  ;;  %v2607_v23 = vld [vmem:[%s5282_s5 + $0x168] sm:$0xf] }
 0x17f   :  { %2018 = vmatpush.bf16.msra.mxu1 %v2548_v27  ;;  %v3398_v27 = vld [vmem:[%s5282_s5 + $0x180] sm:$0xf0] }
 0x180   :  { %2057 = vmatpush.bf16.msrb.mxu0 %v3220_v30  ;;  %v2912_v30 = vor.u32 %v3471_v18, %v2909_v19  ;;  %v2608_v37 = vor.u32 %v3398_v27, %v2607_v23  ;;  %v3496_v18 = vld [vmem:[%s5282_s5 + $0x490] sm:$0xf0]  ;;  %v3196_v19 = vor.u32 %v3545_v11, %v3195_v10  ;;  %v589_v27 = vperm.slane %v5170_v15, 0  ;;  %v2663_v11 = vld [vmem:[%s5282_s5 + $0x1d8] sm:$0xf] }
 0x181   :  { %2030 = vmatpush.bf16.msra.mxu2 %v2800_v33  ;;  %v3464_v33 = vld [vmem:[%s5282_s5 + $0x394] sm:$0xf] }
 0x182   :  { %2043 = vmatpush.bf16.msra.mxu3 %v3024_v36  ;;  %v3461_v36 = vld [vmem:[%s5282_s5 + $0x378] sm:$0xf0]  ;;  %v2884_v44 = vor.u32 %v3464_v33, %v2881_v34  ;;  %v2971_v33 = vld [vmem:[%s5282_s5 + $0x440] sm:$0xf] }
 0x183   :  { %2019 = vmatpush.bf16.msra.mxu1 %v2520_v39  ;;  %v3517_v39 = vld [vmem:[%s5282_s5 + $0x538] sm:$0xf0] }
 0x184   :  { %2058 = vmatpush.bf16.msrb.mxu0 %v3192_v42  ;;  %v2579_v42 = vld [vmem:[%s5282_s5 + $0x130] sm:$0xf]  ;;  %v3489_v34 = vld [vmem:[%s5282_s5 + $0x458] sm:$0xf0] }
 0x185   :  { %2031 = vmatpush.bf16.msra.mxu2 %v2772_v45  ;;  %v2860_v45 = vor.u32 %v3461_v36, %v2859_v35 }
 0x186   :  { %2044 = vmatpush.bf16.msra.mxu3 %v2996_v48  ;;  %v3084_v48 = vor.u32 %v3517_v39, %v3083_v38  ;;  %v3363_v38 = vld [vmem:[%s5282_s5 + $0x68] sm:$0xf0] }
 0x187   :  { %2020 = vmatpush.bf16.msra.mxu1 %v2492_v51  ;;  %v2580_v51 = vor.u32 %v3391_v43, %v2579_v42  ;;  %v2972_v43 = vor.u32 %v3489_v34, %v2971_v33 }
 0x188   :  { %2059 = vmatpush.bf16.msrb.mxu0 %v3164_v54  ;;  %v3252_v54 = vor.u32 %v3559_v47, %v3251_v46 }
 0x189   :  { %2032 = vmatpush.bf16.msra.mxu2 %v2744_v57  ;;  %v2832_v57 = vor.u32 %v3454_v50, %v2831_v49  ;;  %v3482_v49 = vld [vmem:[%s5282_s5 + $0x420] sm:$0xf0] }
 0x18a   :  { %2045 = vmatpush.bf16.msra.mxu3 %v2968_v61  ;;  %v3056_v61 = vor.u32 %v3510_v53, %v3055_v52  ;;  %v2439_v53 = vld [vmem:[%s5282_s5 + $0x18] sm:$0xf] }
 0x18b   :  { %2021 = vmatpush.bf16.msra.mxu1 %v2464_v1 }
 0x18c   :  { %2060 = vmatpush.bf16.msrb.mxu0 %v3136_v5 }
 0x18d   :  { %2033 = vmatpush.bf16.msra.mxu2 %v2716_v9  ;;  %v2804_v9 = vor.u32 %v3447_v0, %v2803_v63  ;;  %v3419_v63 = vld [vmem:[%s5282_s5 + $0x228] sm:$0xf0] }
 0x18e   :  { %2046 = vmatpush.bf16.msra.mxu3 %v2940_v13  ;;  %v2775_v13 = vld [vmem:[%s5282_s5 + $0x2b8] sm:$0xf] }
 0x18f   :  { %2022 = vmatpush.bf16.msra.mxu1 %v2436_v17  ;;  %v1764_v1 = vpop.f32.mrf.mxu1  ;;  %v2999_v17 = vld [vmem:[%s5282_s5 + $0x478] sm:$0xf]  ;;  %v2776_v23 = vor.u32 %v3440_v14, %v2775_v13  ;;  %v3468_v14 = vld [vmem:[%s5282_s5 + $0x3b0] sm:$0xf0] }
 0x190   :  { %2061 = vmatpush.bf16.msrb.mxu0 %v3108_v21  ;;  %v5147_v5 = vpop.f32.mrf.mxu0  ;;  %v2495_v21 = vld [vmem:[%s5282_s5 + $0x88] sm:$0xf]  ;;  %v3000_v28 = vor.u32 %v3496_v18, %v2999_v17  ;;  %v1765_v42 = vadd.f32 %v1764_v1, %v589_v27  ;;  %v590_v18 = vperm.slane %v5170_v15, 1 }
 0x191   :  { %2034 = vmatpush.bf16.msra.mxu2 %v2688_v26  ;;  %v3538_v26 = vld [vmem:[%s5282_s5 + $0x5e0] sm:$0xf0] }
 0x192   :  { %2047 = vmatpush.bf16.msra.mxu3 %v2912_v30  ;;  %2023 = vmatmul.bf16.vlgmr.msra.gmra.mxu1 %v4275_v58  ;;  %v3433_v30 = vld [vmem:[%s5282_s5 + $0x298] sm:$0xf0] }
 0x193   :  { %2067 = vmatpush.bf16.msrb.mxu1 %v2636_v22  ;;  %2062 = vmatmul.bf16.vlgmr.msrb.gmra.mxu0 %v4283_v62  ;;  %v3370_v22 = vld [vmem:[%s5282_s5 + $0xa0] sm:$0xf0]  ;;  %v2748_v39 = vor.u32 %v3433_v30, %v2747_v29 }
 0x194   :  { %2106 = vmatpush.bf16.msra.mxu0 %v3308_v25  ;;  %v3167_v25 = vld [vmem:[%s5282_s5 + $0x5c8] sm:$0xf]  ;;  %v2496_v32 = vor.u32 %v3370_v22, %v2495_v21 }
 0x195   :  { %2035 = vmatpush.bf16.msra.mxu2 %v2660_v41  ;;  %v3168_v36 = vor.u32 %v3538_v26, %v3167_v25  ;;  %v3531_v41 = vld [vmem:[%s5282_s5 + $0x5a8] sm:$0xf0] }
 0x196   :  { %2048 = vmatpush.bf16.msra.mxu3 %v2884_v44  ;;  %v2719_v44 = vld [vmem:[%s5282_s5 + $0x248] sm:$0xf] }
 0x197   :  { %2068 = vmatpush.bf16.msrb.mxu1 %v2608_v37  ;;  %v1766_v31 = vpop.f32.mrf.mxu1  ;;  %v2467_v37 = vld [vmem:[%s5282_s5 + $0x50] sm:$0xf] }
 0x198   :  { %2107 = vmatpush.bf16.msra.mxu0 %v3280_v40  ;;  %2036 = vmatmul.bf16.vlgmr.msra.gmra.mxu2 %v4317_v20  ;;  %v1805_v35 = vpop.f32.mrf.mxu0  ;;  %v3139_v40 = vld [vmem:[%s5282_s5 + $0x590] sm:$0xf]  ;;  %v2468_v47 = vor.u32 %v3363_v38, %v2467_v37  ;;  %v591_v38 = vperm.slane %v5170_v15, 2 }
 0x199   :  { %2080 = vmatpush.bf16.msrb.mxu2 %v2860_v45  ;;  %2049 = vmatmul.bf16.vlgmr.msra.gmra.mxu3 %v4325_v24  ;;  %v3426_v45 = vld [vmem:[%s5282_s5 + $0x260] sm:$0xf0]  ;;  %v3140_v52 = vor.u32 %v3531_v41, %v3139_v40 }
 0x19a   :  { %2093 = vmatpush.bf16.msrb.mxu3 %v3084_v48  ;;  %v2943_v48 = vld [vmem:[%s5282_s5 + $0x408] sm:$0xf]  ;;  %v2720_v55 = vor.u32 %v3426_v45, %v2719_v44 }
 0x19b   :  { %2069 = vmatpush.bf16.msrb.mxu1 %v2580_v51  ;;  %v1777_v46 = vpop.f32.mrf.mxu2  ;;  %v2944_v60 = vor.u32 %v3482_v49, %v2943_v48 }
 0x19c   :  { %2108 = vmatpush.bf16.msra.mxu0 %v3252_v54  ;;  %v1778_v50 = vadd.f32 %v1777_v46, %v1765_v42  ;;  %v1790_v51 = vpop.f32.mrf.mxu3  ;;  %v3356_v54 = vld [vmem:[%s5282_s5 + $0x30] sm:$0xf0] }
 0x19d   :  { %2081 = vmatpush.bf16.msrb.mxu2 %v2832_v57  ;;  %v3524_v57 = vld [vmem:[%s5282_s5 + $0x570] sm:$0xf0]  ;;  %v2440_v1 = vor.u32 %v3356_v54, %v2439_v53 }
 0x19e   :  { %2094 = vmatpush.bf16.msrb.mxu3 %v3056_v61  ;;  %v1791_v59 = vadd.f32 %v1790_v51, %v1778_v50  ;;  %v2691_v61 = vld [vmem:[%s5282_s5 + $0x210] sm:$0xf]  ;;  %v3112_v7 = vor.u32 %v3524_v57, %v3111_v56 }
 0x19f   :  { %2070 = vmatpush.bf16.msrb.mxu1 %v2552_v2  ;;  %v1816_v0 = vpop.f32.mrf.mxu1  ;;  %v2915_v2 = vld [vmem:[%s5282_s5 + $0x3d0] sm:$0xf]  ;;  %v2692_v8 = vor.u32 %v3419_v63, %v2691_v61 }
 0x1a0   :  { %2109 = vmatpush.bf16.msra.mxu0 %v3224_v6  ;;  %v1804_v4 = vadd.f32 %v5147_v5, %v1791_v59  ;;  %v1855_v6 = vpop.f32.mrf.mxu0  ;;  %v2916_v10 = vor.u32 %v3475_v3, %v2915_v2  ;;  %v2887_v5 = vld [vmem:[%s5282_s5 + $0x398] sm:$0xf]  ;;  %v1817_v25 = vadd.f32 %v1816_v0, %v590_v18 }
 0x1a1   :  { %2082 = vmatpush.bf16.msrb.mxu2 %v2804_v9 }
 0x1a2   :  { %2095 = vmatpush.bf16.msrb.mxu3 %v3028_v12  ;;  %v3309_v9 = vmul.f32 -1.442695, %v1804_v4  ;;  %v3412_v12 = vld [vmem:[%s5282_s5 + $0x1f0] sm:$0xf0]  ;;  %s3630_s5 = smov [#allocation2]  }
 0x1a3   :  { %2071 = vmatpush.bf16.msrb.mxu1 %v2524_v16  ;;  %v1779_v13 = vpop.f32.mrf.mxu2  ;;  %v2664_v17 = vor.u32 %v3412_v12, %v2663_v11  ;;  %v592_v11 = vperm.slane %v5170_v15, 3  ;;  %s2265_s23 = sshll.u32 %s3630_s5, 4  ;;  %s2266_s23 = int_to_ptr.vmem [resolvable:$true] %s2265_s23 }
 0x1a4   :  { %2110 = vmatpush.bf16.msra.mxu0 %v3196_v19  ;;  %3576 = vpow2.f32 %v3309_v9  ;;  %v1792_v16 = vpop.f32.mrf.mxu3  ;;  %v2888_v19 = vor.u32 %v3468_v14, %v2887_v5 }
 0x1a5   :  { %2083 = vmatpush.bf16.msrb.mxu2 %v2776_v23 }
 0x1a6   :  { %2096 = vmatpush.bf16.msrb.mxu3 %v3000_v28 }
 0x1a7   :  { %2072 = vmatpush.bf16.msrb.mxu1 %v2496_v32  ;;  %v1818_v21 = vpop.f32.mrf.mxu1 }
 0x1a8   :  { %2111 = vmatpush.bf16.msra.mxu0 %v3168_v36  ;;  %v1857_v22 = vpop.f32.mrf.mxu0 }
 0x1a9   :  { %2084 = vmatpush.bf16.msrb.mxu2 %v2748_v39 }
 0x1aa   :  { %2097 = vmatpush.bf16.msrb.mxu3 %v2972_v43  ;;  %v3577_v23 = vpop.eup %3576 }
 0x1ab   :  { %2073 = vmatpush.bf16.msrb.mxu1 %v2468_v47  ;;  %v2140_v26 = vadd.f32 1.0, %v3577_v23  ;;  %v1829_v27 = vpop.f32.mrf.mxu2 }
 0x1ac   :  { %2112 = vmatpush.bf16.msra.mxu0 %v3140_v52  ;;  %v1830_v28 = vadd.f32 %v1829_v27, %v1817_v25  ;;  %v1842_v29 = vpop.f32.mrf.mxu3 }
 0x1ad   :  { %2085 = vmatpush.bf16.msrb.mxu2 %v2720_v55  ;;  %3578 = vrcp.f32 %v2140_v26  ;;  %v2158_v39 = vand.u32 2147483648, %v2140_v26  ;;  %vm2152_vm2 = vweird.f32 %v2140_v26 }
 0x1ae   :  { %2098 = vmatpush.bf16.msrb.mxu3 %v2944_v60  ;;  %v1843_v30 = vadd.f32 %v1842_v29, %v1830_v28 }
 0x1af   :  { %2074 = vmatpush.bf16.msrb.mxu1 %v2440_v1  ;;  %v2159_v45 = vor.u32 1.1754944e-38, %v2158_v39 }
 0x1b0   :  { %2113 = vmatpush.bf16.msra.mxu0 %v3112_v7  ;;  %v1856_v31 = vadd.f32 %v1855_v6, %v1843_v30  ;;  %v1907_v32 = vpop.f32.mrf.mxu0 }
 0x1b1   :  { %2086 = vmatpush.bf16.msrb.mxu2 %v2692_v8 }
 0x1b2   :  { %2099 = vmatpush.bf16.msrb.mxu3 %v2916_v10  ;;  %2075 = vmatmul.bf16.vlgmr.msrb.gmra.mxu1 %v4275_v58  ;;  %v1868_v58 = vpop.f32.mrf.mxu1 }
 0x1b3   :  { %2114 = vmatmul.bf16.vlgmr.msra.gmra.mxu0 %v4283_v62  ;;  %v3310_v62 = vmul.f32 -1.442695, %v1856_v31  ;;  %v3579_v33 = vpop.eup %3578  ;;  %v1831_v34 = vpop.f32.mrf.mxu2  ;;  %v1869_v44 = vadd.f32 %v1868_v58, %v591_v38 }
 0x1b4   :  { %v2148_v35 = vmul.f32 %v3579_v33, %v2140_v26  ;;  %v1844_v36 = vpop.f32.mrf.mxu3  ;;  %vm2153_vm1 = vweird.f32 %v3579_v33 }
 0x1b5   :  { %2087 = vmatpush.bf16.msrb.mxu2 %v2664_v17  ;;  %3580 = vpow2.f32 %v3310_v62  ;;  %vm2154_vm3 = vmor %vm2152_vm2, %vm2153_vm1 }
 0x1b6   :  { %2100 = vmatpush.bf16.msrb.mxu3 %v2888_v19  ;;  %v2149_v37 = vsub.f32 1.0, %v2148_v35 }
 0x1b8   :  { %2088 = vmatmul.bf16.vlgmr.msrb.gmra.mxu2 %v4317_v20  ;;  %v2150_v41 = vmul.f32 %v3579_v33, %v2149_v37  ;;  %v2156_v20 = vand.u32 2147483647, %v2140_v26  ;;  %v1909_v42 = vpop.f32.mrf.mxu0  ;;  %v593_v37 = vperm.slane %v5170_v15, 4 }
 0x1b9   :  { %2101 = vmatmul.bf16.vlgmr.msrb.gmra.mxu3 %v4325_v24 }
 0x1ba   :  { %v1870_v40 = vpop.f32.mrf.mxu1  ;;  %v2151_v43 = vadd.f32 %v3579_v33, %v2150_v41  ;;  %vm2157_vm4 = vcmp.eq.f32.partialorder %v2156_v20, 8.507059e+37 }
 0x1bb   :  { %v3581_v24 = vpop.eup %3580  ;;  %v1881_v47 = vpop.f32.mrf.mxu2 }
 0x1bc   :  { %v2141_v46 = vadd.f32 1.0, %v3581_v24  ;;  %v2155_v48 = vsel %vm2154_vm3, %v3579_v33, %v2151_v43  ;;  %v1882_v49 = vadd.f32 %v1881_v47, %v1869_v44  ;;  %v1894_v50 = vpop.f32.mrf.mxu3 }
 0x1bd   :  { %v2160_v51 = vsel %vm2157_vm4, %v2159_v45, %v2155_v48 }
 0x1be   :  { %3582 = vrcp.f32 %v2141_v46  ;;  %2252 = vst [vmem:[#allocation2] sm:$0xff] %v2160_v51  ;;  %v1895_v52 = vadd.f32 %v1894_v50, %v1882_v49  ;;  %v2173_v61 = vand.u32 2147483648, %v2141_v46  ;;  %v2171_v0 = vand.u32 2147483647, %v2141_v46 }
 0x1bf   :  { %vm2167_vm6 = vweird.f32 %v2141_v46 }
 0x1c0   :  { %v1908_v53 = vadd.f32 %v1907_v32, %v1895_v52  ;;  %v2174_v3 = vor.u32 1.1754944e-38, %v2173_v61  ;;  %vm2172_vm8 = vcmp.eq.f32.partialorder %v2171_v0, 8.507059e+37 }
 0x1c2   :  { %v3311_v54 = vmul.f32 -1.442695, %v1908_v53 }
 0x1c3   :  { %v1883_v56 = vpop.f32.mrf.mxu2 }
 0x1c4   :  { %v3583_v55 = vpop.eup %3582  ;;  %3584 = vpow2.f32 %v3311_v54  ;;  %v1896_v59 = vpop.f32.mrf.mxu3 }
 0x1c5   :  { %v2163_v57 = vmul.f32 %v3583_v55, %v2141_v46  ;;  %vm2168_vm5 = vweird.f32 %v3583_v55 }
 0x1c6   :  { %vm2169_vm7 = vmor %vm2167_vm6, %vm2168_vm5 }
 0x1c7   :  { %v2164_v60 = vsub.f32 1.0, %v2163_v57 }
 0x1c9   :  { %v2165_v63 = vmul.f32 %v3583_v55, %v2164_v60 }
 0x1ca   :  { %v3585_v1 = vpop.eup %3584 }
 0x1cb   :  { %v2166_v2 = vadd.f32 %v3583_v55, %v2165_v63  ;;  %v2142_v4 = vadd.f32 1.0, %v3585_v1  ;;  %v594_v63 = vperm.slane %v5170_v15, 5 }
 0x1cd   :  { %v2170_v6 = vsel %vm2169_vm7, %v3583_v55, %v2166_v2  ;;  %3586 = vrcp.f32 %v2142_v4  ;;  %v2188_v16 = vand.u32 2147483648, %v2142_v4  ;;  %v2186_v19 = vand.u32 2147483647, %v2142_v4 }
 0x1ce   :  { %v2175_v8 = vsel %vm2172_vm8, %v2174_v3, %v2170_v6  ;;  %vm2182_vm10 = vweird.f32 %v2142_v4 }
 0x1cf   :  { %v1920_v7 = vpop.f32.mrf.mxu1  ;;  %2253 = vst [vmem:[#allocation2 + $0x8] sm:$0xff] %v2175_v8  ;;  %v2189_v26 = vor.u32 1.1754944e-38, %v2188_v16  ;;  %vm2187_vm12 = vcmp.eq.f32.partialorder %v2186_v19, 8.507059e+37 }
 0x1d0   :  { %v1959_v9 = vpop.f32.mrf.mxu0  ;;  %v1921_v17 = vadd.f32 %v1920_v7, %v592_v11 }
 0x1d3   :  { %v3587_v10 = vpop.eup %3586 }
 0x1d4   :  { %v2178_v12 = vmul.f32 %v3587_v10, %v2142_v4  ;;  %vm2183_vm9 = vweird.f32 %v3587_v10 }
 0x1d5   :  { %vm2184_vm11 = vmor %vm2182_vm10, %vm2183_vm9 }
 0x1d6   :  { %v2179_v14 = vsub.f32 1.0, %v2178_v12 }
 0x1d7   :  { %v1922_v13 = vpop.f32.mrf.mxu1 }
 0x1d8   :  { %v1961_v5 = vpop.f32.mrf.mxu0  ;;  %v2180_v18 = vmul.f32 %v3587_v10, %v2179_v14 }
 0x1da   :  { %v2181_v25 = vadd.f32 %v3587_v10, %v2180_v18 }
 0x1db   :  { %v1933_v21 = vpop.f32.mrf.mxu2 }
 0x1dc   :  { %v1934_v22 = vadd.f32 %v1933_v21, %v1921_v17  ;;  %v1946_v23 = vpop.f32.mrf.mxu3  ;;  %v2185_v28 = vsel %vm2184_vm11, %v3587_v10, %v2181_v25 }
 0x1dd   :  { %v2190_v29 = vsel %vm2187_vm12, %v2189_v26, %v2185_v28  ;;  %v595_v28 = vperm.slane %v5170_v15, 6  ;;  %vm2258_vm12 = vcmask 130048  }
 0x1de   :  { %v1947_v27 = vadd.f32 %v1946_v23, %v1934_v22  ;;  %2254 = vst [vmem:[#allocation2 + $0x10] sm:$0xff] %v2190_v29 }
 0x1e0   :  { %v1960_v30 = vadd.f32 %v1959_v9, %v1947_v27 }
 0x1e2   :  { %v3312_v58 = vmul.f32 -1.442695, %v1960_v30 }
 0x1e3   :  { %v1935_v31 = vpop.f32.mrf.mxu2 }
 0x1e4   :  { %3588 = vpow2.f32 %v3312_v58  ;;  %v1948_v32 = vpop.f32.mrf.mxu3 }
 0x1ea   :  { %v3589_v62 = vpop.eup %3588 }
 0x1eb   :  { %v2143_v33 = vadd.f32 1.0, %v3589_v62 }
 0x1ed   :  { %3590 = vrcp.f32 %v2143_v33  ;;  %v2203_v20 = vand.u32 2147483648, %v2143_v33  ;;  %v2201_v43 = vand.u32 2147483647, %v2143_v33  ;;  %vm2197_vm14 = vweird.f32 %v2143_v33 }
 0x1ef   :  { %v1972_v34 = vpop.f32.mrf.mxu1  ;;  %v2204_v48 = vor.u32 1.1754944e-38, %v2203_v20  ;;  %vm2202_vm0 = vcmp.eq.f32.partialorder %v2201_v43, 8.507059e+37 }
 0x1f0   :  { %v2011_v35 = vpop.f32.mrf.mxu0  ;;  %v1973_v42 = vadd.f32 %v1972_v34, %v593_v37 }
 0x1f3   :  { %v3591_v36 = vpop.eup %3590 }
 0x1f4   :  { %v2193_v38 = vmul.f32 %v3591_v36, %v2143_v33  ;;  %vm2198_vm13 = vweird.f32 %v3591_v36 }
 0x1f5   :  { %vm2199_vm15 = vmor %vm2197_vm14, %vm2198_vm13 }
 0x1f6   :  { %v2194_v41 = vsub.f32 1.0, %v2193_v38 }
 0x1f7   :  { %v1974_v39 = vpop.f32.mrf.mxu1 }
 0x1f8   :  { %v2013_v40 = vpop.f32.mrf.mxu0  ;;  %v2195_v24 = vmul.f32 %v3591_v36, %v2194_v41 }
 0x1fa   :  { %v2196_v47 = vadd.f32 %v3591_v36, %v2195_v24 }
 0x1fb   :  { %v1985_v44 = vpop.f32.mrf.mxu2 }
 0x1fc   :  { %v1986_v45 = vadd.f32 %v1985_v44, %v1973_v42  ;;  %v1998_v46 = vpop.f32.mrf.mxu3  ;;  %v2200_v50 = vsel %vm2199_vm15, %v3591_v36, %v2196_v47 }
 0x1fd   :  { %v2205_v51 = vsel %vm2202_vm0, %v2204_v48, %v2200_v50 }
 0x1fe   :  { %v1999_v49 = vadd.f32 %v1998_v46, %v1986_v45  ;;  %2255 = vst [vmem:[#allocation2 + $0x18] sm:$0xff] %v2205_v51 }
 0x200   :  { %v2012_v52 = vadd.f32 %v2011_v35, %v1999_v49 }
 0x202   :  { %v3313_v53 = vmul.f32 -1.442695, %v2012_v52 }
 0x203   :  { %v1987_v54 = vpop.f32.mrf.mxu2 }
 0x204   :  { %3592 = vpow2.f32 %v3313_v53  ;;  %v2000_v55 = vpop.f32.mrf.mxu3 }
 0x20a   :  { %v3593_v56 = vpop.eup %3592 }
 0x20b   :  { %v2144_v57 = vadd.f32 1.0, %v3593_v56 }
 0x20d   :  { %3594 = vrcp.f32 %v2144_v57  ;;  %v2218_v4 = vand.u32 2147483648, %v2144_v57  ;;  %v2216_v8 = vand.u32 2147483647, %v2144_v57  ;;  %vm2212_vm2 = vweird.f32 %v2144_v57 }
 0x20f   :  { %v2024_v59 = vpop.f32.mrf.mxu1  ;;  %v2219_v13 = vor.u32 1.1754944e-38, %v2218_v4  ;;  %vm2217_vm4 = vcmp.eq.f32.partialorder %v2216_v8, 8.507059e+37 }
 0x210   :  { %v2063_v60 = vpop.f32.mrf.mxu0  ;;  %v2025_v6 = vadd.f32 %v2024_v59, %v594_v63 }
 0x213   :  { %v3595_v61 = vpop.eup %3594 }
 0x214   :  { %v2208_v0 = vmul.f32 %v3595_v61, %v2144_v57  ;;  %vm2213_vm1 = vweird.f32 %v3595_v61 }
 0x215   :  { %vm2214_vm3 = vmor %vm2212_vm2, %vm2213_vm1 }
 0x216   :  { %v2209_v3 = vsub.f32 1.0, %v2208_v0 }
 0x217   :  { %v2026_v1 = vpop.f32.mrf.mxu1 }
 0x218   :  { %v2065_v2 = vpop.f32.mrf.mxu0  ;;  %v2210_v7 = vmul.f32 %v3595_v61, %v2209_v3 }
 0x21a   :  { %v2211_v12 = vadd.f32 %v3595_v61, %v2210_v7 }
 0x21b   :  { %v2037_v9 = vpop.f32.mrf.mxu2 }
 0x21c   :  { %v2038_v10 = vadd.f32 %v2037_v9, %v2025_v6  ;;  %v2050_v11 = vpop.f32.mrf.mxu3  ;;  %v2215_v14 = vsel %vm2214_vm3, %v3595_v61, %v2211_v12 }
 0x21d   :  { %v2220_v16 = vsel %vm2217_vm4, %v2219_v13, %v2215_v14 }
 0x21e   :  { %v2051_v5 = vadd.f32 %v2050_v11, %v2038_v10  ;;  %2256 = vst [vmem:[#allocation2 + $0x20] sm:$0xff] %v2220_v16 }
 0x220   :  { %v2064_v17 = vadd.f32 %v2063_v60, %v2051_v5 }
 0x222   :  { %v3314_v18 = vmul.f32 -1.442695, %v2064_v17 }
 0x223   :  { %v2039_v19 = vpop.f32.mrf.mxu2 }
 0x224   :  { %3596 = vpow2.f32 %v3314_v18  ;;  %v2052_v21 = vpop.f32.mrf.mxu3 }
 0x22a   :  { %v3597_v22 = vpop.eup %3596 }
 0x22b   :  { %v2145_v23 = vadd.f32 1.0, %v3597_v22 }
 0x22d   :  { %3598 = vrcp.f32 %v2145_v23  ;;  %v2233_v32 = vand.u32 2147483648, %v2145_v23  ;;  %v2231_v34 = vand.u32 2147483647, %v2145_v23  ;;  %vm2227_vm6 = vweird.f32 %v2145_v23 }
 0x22f   :  { %v2076_v25 = vpop.f32.mrf.mxu1  ;;  %v2234_v39 = vor.u32 1.1754944e-38, %v2233_v32  ;;  %vm2232_vm8 = vcmp.eq.f32.partialorder %v2231_v34, 8.507059e+37 }
 0x230   :  { %v2115_v26 = vpop.f32.mrf.mxu0  ;;  %v2077_v62 = vadd.f32 %v2076_v25, %v595_v28 }
 0x233   :  { %v3599_v27 = vpop.eup %3598 }
 0x234   :  { %v2223_v29 = vmul.f32 %v3599_v27, %v2145_v23  ;;  %vm2228_vm5 = vweird.f32 %v3599_v27 }
 0x235   :  { %vm2229_vm7 = vmor %vm2227_vm6, %vm2228_vm5 }
 0x236   :  { %v2224_v31 = vsub.f32 1.0, %v2223_v29 }
 0x237   :  { %v2078_v30 = vpop.f32.mrf.mxu1 }
 0x238   :  { %v2117_v58 = vpop.f32.mrf.mxu0  ;;  %v2225_v33 = vmul.f32 %v3599_v27, %v2224_v31 }
 0x23a   :  { %v2226_v38 = vadd.f32 %v3599_v27, %v2225_v33 }
 0x23b   :  { %v2089_v35 = vpop.f32.mrf.mxu2 }
 0x23c   :  { %v2090_v36 = vadd.f32 %v2089_v35, %v2077_v62  ;;  %v2102_v37 = vpop.f32.mrf.mxu3  ;;  %v2230_v41 = vsel %vm2229_vm7, %v3599_v27, %v2226_v38 }
 0x23d   :  { %v2235_v15 = vsel %vm2232_vm8, %v2234_v39, %v2230_v41 }
 0x23e   :  { %v2103_v40 = vadd.f32 %v2102_v37, %v2090_v36  ;;  %2257 = vst [vmem:[#allocation2 + $0x28] sm:$0xff] %v2235_v15 }
 0x240   :  { %v2116_v20 = vadd.f32 %v2115_v26, %v2103_v40 }
 0x242   :  { %v3315_v42 = vmul.f32 -1.442695, %v2116_v20 }
 0x243   :  { %v2091_v24 = vpop.f32.mrf.mxu2 }
 0x244   :  { %3600 = vpow2.f32 %v3315_v42  ;;  %v2104_v43 = vpop.f32.mrf.mxu3 }
 0x24a   :  { %v3601_v44 = vpop.eup %3600 }
 0x24b   :  { %v2146_v45 = vadd.f32 1.0, %v3601_v44 }
 0x24d   :  { %3602 = vrcp.f32 %v2146_v45  ;;  %v2248_v49 = vand.u32 2147483648, %v2146_v45  ;;  %v2246_v51 = vand.u32 2147483647, %v2146_v45  ;;  %vm2242_vm10 = vweird.f32 %v2146_v45 }
 0x24f   :  { %v2249_v53 = vor.u32 1.1754944e-38, %v2248_v49  ;;  %vm2247_vm13 = vcmp.eq.f32.partialorder %v2246_v51, 8.507059e+37 }
 0x253   :  { %v3603_v46 = vpop.eup %3602 }
 0x254   :  { %v2238_v47 = vmul.f32 %v3603_v46, %v2146_v45  ;;  %vm2243_vm9 = vweird.f32 %v3603_v46 }
 0x255   :  { %vm2244_vm11 = vmor %vm2242_vm10, %vm2243_vm9 }
 0x256   :  { %v2239_v48 = vsub.f32 1.0, %v2238_v47 }
 0x258   :  { %v2240_v50 = vmul.f32 %v3603_v46, %v2239_v48 }
 0x25a   :  { %v2241_v52 = vadd.f32 %v3603_v46, %v2240_v50 }
 0x25c   :  { %v2245_v54 = vsel %vm2244_vm11, %v3603_v46, %v2241_v52 }
 0x25d   :  { %v2250_v55 = vsel %vm2247_vm13, %v2249_v53, %v2245_v54 }
 0x25e   :  { %2259 = vst.msk [vmem:[#allocation2 + $0x30] sm:$0xff] %vm2258_vm12, %v2250_v55 }
 0x25f   :  { %2270 = dma.vmem_to_hbm [thread:$0]  %s2266_s23, 896, %s2268_s26, [#allocation3]  }
 0x260   :  { %3628 = dma.done.wait [#allocation3], 896  }
 0x261   :  { %3629 = vsyncadd [#allocation3], 4294966400 }
 0x262   :  { %2275 = vsyncpa [#allocation3], 1 }

</bundles_post_ra>
